<compile_context>
chip_gen: v7x
topology: tpu7x:2x2x1
jax: 0.10.0
libtpu: 0.0.40
codegen_flags: <defaults>
</compile_context>

<pallas_src>
import functools
import numpy as np
import jax
import jax.numpy as jnp
from jax.experimental import pallas as pl
from jax.experimental.pallas import tpu as pltpu


LANE = 128

# ----------------------------------------------------------------------------
# Synthetic cfg (replaces parse_cfg of a .cfg file — no file I/O allowed).
# ----------------------------------------------------------------------------
CFG_BLOCKS = [
    {"type": "net", "height": "32", "width": "32", "channels": "3"},
    {"type": "convolutional", "batch_normalize": "1", "filters": "8",
     "size": "3", "stride": "1", "pad": "1", "activation": "leaky"},          # 0
    {"type": "convolutional", "batch_normalize": "1", "filters": "16",
     "size": "3", "stride": "2", "pad": "1", "activation": "leaky"},          # 1
    {"type": "convolutional", "batch_normalize": "1", "filters": "16",
     "size": "3", "stride": "1", "pad": "1", "activation": "leaky"},          # 2
    {"type": "shortcut", "from": "-2", "activation": "linear"},               # 3
    {"type": "convolutional", "batch_normalize": "1", "filters": "32",
     "size": "3", "stride": "2", "pad": "1", "activation": "leaky"},          # 4
    {"type": "convolutional", "filters": "21",
     "size": "1", "stride": "1", "pad": "1", "activation": "linear"},         # 5
    {"type": "yolo", "mask": "0,1,2",
     "anchors": "10,14, 23,27, 37,58", "classes": "2", "num": "3"},           # 6
    {"type": "route", "layers": "-3"},                                        # 7
    {"type": "convolutional", "batch_normalize": "1", "filters": "16",
     "size": "1", "stride": "1", "pad": "1", "activation": "leaky"},          # 8
    {"type": "upsample", "stride": "2"},                                      # 9
    {"type": "route", "layers": "-1, -8"},                                    # 10
    {"type": "convolutional", "filters": "21",
     "size": "1", "stride": "1", "pad": "1", "activation": "linear"},         # 11
    {"type": "yolo", "mask": "0,1,2",
     "anchors": "10,14, 23,27, 37,58", "classes": "2", "num": "3"},           # 12
]


def _round_up(x, m):
    return ((x + m - 1) // m) * m


def _pick_tm(M):
    """Largest row tile that divides M and leaves >= 2 grid steps (v7x: 2 TCs)."""
    for tm in (512, 256, 128, 64):
        if M % tm == 0 and M // tm >= 2:
            return tm
    if M <= 512:
        return _round_up(M, 8)
    return 512


# ----------------------------------------------------------------------------
# Pallas kernels
# ----------------------------------------------------------------------------
def _mm_bias_act_kernel(slope, x_ref, w_ref, b_ref, o_ref):
    # bf16 x bf16 -> f32 on the MXU; bias + LeakyReLU in f32; store bf16.
    acc = jnp.dot(x_ref[...], w_ref[...], preferred_element_type=jnp.float32)
    y = acc + b_ref[...]
    y = jnp.where(y > 0, y, slope * y)
    o_ref[...] = y.astype(o_ref.dtype)


def fused_matmul_bias_act(x, w_p, b_p, slope, out_dtype=jnp.bfloat16):
    """leaky_relu(x @ w_p + b_p).

    x:   (M, K)  activations (any float dtype; cast to bf16 here).
    w_p: (Kp, Np) bf16, BN scale already folded in, pre-padded at model init.
    b_p: (1, Np)  f32, pre-padded at model init.
    """
    M, K = x.shape
    Kp, Np = w_p.shape
    xp = x.astype(jnp.bfloat16)
    if Kp != K:
        xp = jnp.pad(xp, ((0, 0), (0, Kp - K)))
    tm = _pick_tm(M)
    Mp = _round_up(M, tm)
    if Mp != M:
        xp = jnp.pad(xp, ((0, Mp - M), (0, 0)))
    out = pl.pallas_call(
        functools.partial(_mm_bias_act_kernel, float(slope)),
        out_shape=jax.ShapeDtypeStruct((Mp, Np), out_dtype),
        grid=(Mp // tm,),
        in_specs=[
            pl.BlockSpec((tm, Kp), lambda i: (i, 0)),
            pl.BlockSpec((Kp, Np), lambda i: (0, 0)),
            pl.BlockSpec((1, Np), lambda i: (0, 0)),
        ],
        out_specs=pl.BlockSpec((tm, Np), lambda i: (i, 0)),
        compiler_params=pltpu.CompilerParams(
            dimension_semantics=("parallel",)),
    )(xp, w_p, b_p)
    return out[:M]


def _upsample2x_kernel(x_ref, uh_ref, kw_ref, o_ref):
    # One batch item per grid step: y_b = Uh @ x_b @ kron(Uw, I_C)^T
    x = x_ref[...].astype(jnp.float32)                                   # (H, W*C)
    t = jnp.dot(uh_ref[...], x, preferred_element_type=jnp.float32)      # (2H, W*C)
    y = jnp.dot(t, kw_ref[...], preferred_element_type=jnp.float32)      # (2H, 2W*C)
    o_ref[...] = y.astype(o_ref.dtype)


def _yolo_kernel(stride, p_ref, off_ref, anc_ref, o_ref):
    # Lane-dense layout: rows = attribute index (0..AP-1), lanes = box index.
    p = p_ref[...]
    row = jax.lax.broadcasted_iota(jnp.int32, p.shape, 0)
    is_xy = row < 2
    is_wh = (row >= 2) & (row < 4)
    sig = 1.0 / (1.0 + jnp.exp(-p))
    wh = jnp.exp(jnp.where(is_wh, p, 0.0)) * anc_ref[...]   # masked exp: no inf
    out = jnp.where(is_wh, wh, sig)
    out = out + jnp.where(is_xy, off_ref[...], 0.0)
    o_ref[...] = jnp.where(row < 4, out * stride, out)


# ----------------------------------------------------------------------------
# Layer implementations built on the kernels above
# ----------------------------------------------------------------------------
def conv2d_fused(x_nhwc, w_p, b_p, k, stride, pad, slope, cout):
    """Conv (im2col) + folded BN/bias + LeakyReLU; matmul + epilogue in Pallas."""
    B, H, W, Cin = x_nhwc.shape
    if pad > 0:
        x_nhwc = jnp.pad(x_nhwc, ((0, 0), (pad, pad), (pad, pad), (0, 0)))
    Hp, Wp = H + 2 * pad, W + 2 * pad
    Hout = (Hp - k) // stride + 1
    Wout = (Wp - k) // stride + 1
    if k == 1:
        col = x_nhwc[:, ::stride, ::stride, :].reshape(B * Hout * Wout, Cin)
    else:
        # TODO(synk): the k*k im2col is still materialized by XLA (one fused
        # slice+concat) before the pallas_call; a fully in-kernel im2col (tap loop
        # over a resident NHWC block) would cut conv-input HBM traffic ~k*k x at
        # real YOLO resolutions.
        patches = [
            x_nhwc[:, dy:dy + (Hout - 1) * stride + 1:stride,
                   dx:dx + (Wout - 1) * stride + 1:stride, :]
            for dy in range(k) for dx in range(k)]
        col = jnp.concatenate(patches, axis=-1).reshape(B * Hout * Wout, k * k * Cin)
    out = fused_matmul_bias_act(col, w_p, b_p, slope)
    return out[:, :cout].reshape(B, Hout, Wout, cout)


def _bilinear_matrix(n_in, scale=2):
    """Interpolation matrix matching PyTorch bilinear (align_corners=False)."""
    n_out = n_in * scale
    i = np.arange(n_out, dtype=np.float64)
    src = np.maximum((i + 0.5) / scale - 0.5, 0.0)
    lo = np.minimum(np.floor(src).astype(np.int64), n_in - 1)
    hi = np.minimum(lo + 1, n_in - 1)
    w_hi = (src - lo).astype(np.float32)
    w_lo = 1.0 - w_hi
    U = np.zeros((n_out, n_in), dtype=np.float32)
    U[np.arange(n_out), lo] += w_lo
    U[np.arange(n_out), hi] += w_hi
    return U


def upsample_bilinear_2x(x_nhwc):
    """Bilinear 2x upsample as a single Pallas kernel (separable, no transposes)."""
    B, H, W, C = x_nhwc.shape
    Uh = _bilinear_matrix(H)                                        # (2H, H)
    Uw = _bilinear_matrix(W)                                        # (2W, W)
    # Width interpolation as a right-multiplication on the flattened (W*C) lanes.
    Kw = np.kron(Uw, np.eye(C, dtype=np.float32)).T                 # (W*C, 2W*C)
    x2d = x_nhwc.reshape(B * H, W * C)
    out = pl.pallas_call(
        _upsample2x_kernel,
        out_shape=jax.ShapeDtypeStruct((B * 2 * H, 2 * W * C), x_nhwc.dtype),
        grid=(B,),
        in_specs=[
            pl.BlockSpec((H, W * C), lambda b: (b, 0)),
            pl.BlockSpec((2 * H, H), lambda b: (0, 0)),
            pl.BlockSpec((W * C, 2 * W * C), lambda b: (0, 0)),
        ],
        out_specs=pl.BlockSpec((2 * H, 2 * W * C), lambda b: (b, 0)),
        compiler_params=pltpu.CompilerParams(
            dimension_semantics=("parallel",)),
    )(x2d, jnp.asarray(Uh), jnp.asarray(Kw))
    return out.reshape(B, 2 * H, 2 * W, C)


def _yolo_tables(G, anchors, stride, AP, Npad):
    A = len(anchors)
    N = G * G * A
    gy, gx = np.meshgrid(np.arange(G), np.arange(G), indexing="ij")
    off = np.zeros((AP, Npad), np.float32)
    off[0, :N] = np.repeat(gx.reshape(-1), A)
    off[1, :N] = np.repeat(gy.reshape(-1), A)
    anc = np.ones((AP, Npad), np.float32)
    anc[2, :N] = np.tile(np.asarray([a[0] for a in anchors], np.float32) / stride, G * G)
    anc[3, :N] = np.tile(np.asarray([a[1] for a in anchors], np.float32) / stride, G * G)
    return off, anc


def transform_predict(x_nhwc, img_size, anchors, num_classes):
    """Canonical YOLO detection transform; sigmoid/exp hot path in Pallas."""
    B, G, _, _ = x_nhwc.shape
    A = len(anchors)
    attrs = 5 + num_classes
    N = G * G * A
    stride = img_size // G
    Npad = _round_up(N, LANE)
    AP = _round_up(attrs, 8)

    # (B, G, G, A*attrs) -> (B, attrs, N): boxes on the 128-lane axis.
    pred = x_nhwc.reshape(B, N, attrs).astype(jnp.float32)
    pred = jnp.transpose(pred, (0, 2, 1))
    pred = jnp.pad(pred, ((0, 0), (0, AP - attrs), (0, Npad - N)))
    pred2d = pred.reshape(B * AP, Npad)

    off, anc = _yolo_tables(G, anchors, stride, AP, Npad)
    out2d = pl.pallas_call(
        functools.partial(_yolo_kernel, float(stride)),
        out_shape=jax.ShapeDtypeStruct((B * AP, Npad), jnp.float32),
        grid=(B,),
        in_specs=[pl.BlockSpec((AP, Npad), lambda b: (b, 0)),
                  pl.BlockSpec((AP, Npad), lambda b: (0, 0)),
                  pl.BlockSpec((AP, Npad), lambda b: (0, 0))],
        out_specs=pl.BlockSpec((AP, Npad), lambda b: (b, 0)),
        compiler_params=pltpu.CompilerParams(
            dimension_semantics=("parallel",)),
    )(pred2d, jnp.asarray(off), jnp.asarray(anc))

    out = out2d.reshape(B, AP, Npad)[:, :attrs, :N]
    return jnp.transpose(out, (0, 2, 1))                              # (B, N, attrs)


# ----------------------------------------------------------------------------
# Darknet model
# ----------------------------------------------------------------------------
class DarknetPallas:
    def __init__(self, blocks, key):
        self.blocks = blocks
        self.net_info = blocks[0]
        self.params = []   # per-block dict of arrays (convs) or None
        self.meta = []     # per-block static config (convs) or None
        self.anchors = {}  # per yolo block idx
        prev_filters = int(self.net_info.get("channels", 3))
        filters = prev_filters
        output_filters = []
        for idx, b in enumerate(blocks[1:]):
            p, m = None, None
            if b["type"] == "convolutional":
                bn = int(b.get("batch_normalize", 0))
                filters = int(b["filters"])
                size = int(b["size"])
                stride = int(b["stride"])
                pad = (size - 1) // 2 if int(b["pad"]) else 0
                slope = 0.1 if b["activation"] == "leaky" else 1.0
                key, k1, k2, k3, k4, k5 = jax.random.split(key, 6)
                w = jax.random.normal(k1, (filters, prev_filters, size, size),
                                      jnp.float32) * 0.1
                if bn:
                    eps = 1e-5
                    gamma = 1.0 + 0.1 * jax.random.normal(k2, (filters,), jnp.float32)
                    beta = 0.1 * jax.random.normal(k3, (filters,), jnp.float32)
                    mean = 0.1 * jax.random.normal(k4, (filters,), jnp.float32)
                    var = 1.0 + 0.1 * jnp.abs(jax.random.normal(k5, (filters,), jnp.float32))
                    scale = gamma / jnp.sqrt(var + eps)   # eval-mode BN folded
                    bias = beta - mean * scale
                else:
                    scale = jnp.ones((filters,), jnp.float32)
                    bias = 0.1 * jax.random.normal(k2, (filters,), jnp.float32)
                # Pre-pack once: fold BN scale into the weight matrix, pad K only
                # to a multiple of 16 (bf16 sublane tile), Cout to one lane tile.
                K = size * size * prev_filters
                Kp = _round_up(K, 16)
                Np = _round_up(filters, LANE)
                wmat = jnp.transpose(w, (2, 3, 1, 0)).reshape(K, filters) * scale[None, :]
                w_p = jnp.pad(wmat, ((0, Kp - K), (0, Np - filters))).astype(jnp.bfloat16)
                b_p = jnp.pad(bias.reshape(1, -1),
                              ((0, 0), (0, Np - filters))).astype(jnp.float32)
                p = {"w": w_p, "b": b_p}
                m = {"k": size, "stride": stride, "pad": pad,
                     "slope": slope, "cout": filters}
            elif b["type"] == "route":
                layers = [int(v) for v in b["layers"].split(",")]
                if layers[0] > 0:
                    layers[0] -= idx
                if len(layers) == 1:
                    filters = output_filters[layers[0] + idx]
                else:
                    if layers[1] > 0:
                        layers[1] -= idx
                    filters = (output_filters[layers[0] + idx]
                               + output_filters[layers[1] + idx])
            elif b["type"] == "yolo":
                mask = [int(v) for v in b["mask"].split(",")]
                a = [int(v) for v in b["anchors"].split(",")]
                a = [(a[i], a[i + 1]) for i in range(0, len(a), 2)]
                self.anchors[idx] = [a[i] for i in mask]
            self.params.append(p)
            self.meta.append(m)
            prev_filters = filters
            output_filters.append(filters)
        self._forward_jit = jax.jit(self._forward_impl)

    def _forward_impl(self, params, x_nchw):
        x = jnp.transpose(x_nchw.astype(jnp.float32), (0, 2, 3, 1))  # NCHW -> NHWC
        x = x.astype(jnp.bfloat16)  # bf16 activations between layers
        img_size = int(self.net_info["height"])
        outputs = {}
        dets = None
        for idx, block in enumerate(self.blocks[1:]):
            t = block["type"]
            if t == "convolutional":
                mm = self.meta[idx]
                pp = params[idx]
                x = conv2d_fused(x, pp["w"], pp["b"], mm["k"], mm["stride"],
                                 mm["pad"], mm["slope"], mm["cout"])
            elif t == "upsample":
                x = upsample_bilinear_2x(x)
            elif t == "route":
                layers = [int(v) for v in block["layers"].split(",")]
                if layers[0] > 0:
                    layers[0] -= idx
                if len(layers) == 1:
                    x = outputs[layers[0] + idx]
                else:
                    if layers[1] > 0:
                        layers[1] -= idx
                    x = jnp.concatenate((outputs[layers[0] + idx],
                                         outputs[layers[1] + idx]), axis=-1)
            elif t == "shortcut":
                # Residual add left to XLA elementwise fusion inside the jit
                # (review: a grid=(1,) Pallas add kernel was pure launch/pad overhead).
                x = x + outputs[int(block["from"]) + idx]
            elif t == "yolo":
                x = transform_predict(x, img_size, self.anchors[idx],
                                      int(block["classes"]))
                dets = x if dets is None else jnp.concatenate((dets, x), axis=1)
            outputs[idx] = x
        return dets

    def forward(self, x_nchw):
        return self._forward_jit(self.params, x_nchw)


# TODO(synk): cfg/weights file parsing (parse_cfg / load_weights) is host-side
# I/O with no kernel equivalent; parameters are synthesized deterministically.

if __name__ == "__main__":
    key = jax.random.PRNGKey(0)
    key, kx = jax.random.split(key)
    model = DarknetPallas(CFG_BLOCKS, key)

    # NCHW input matching the cfg: batch=2, channels=3, 32x32 image.
    x = jax.random.normal(kx, (2, 3, 32, 32), jnp.float32)

    dets = model.forward(x)
    dets = jax.block_until_ready(dets)

    # yolo head 1: 8x8 grid * 3 anchors = 192; head 2: 16x16 * 3 = 768 -> 960 boxes
    assert dets.shape == (2, 960, 7), dets.shape
    assert bool(jnp.all(jnp.isfinite(dets)))
    print("KERNEL_OK")
</pallas_src>

<mosaic_0001>
module attributes {stable_mosaic.version = 11 : i64} {
  func.func @_mm_bias_act_kernel(%arg0: i32, %arg1: memref<512x32xbf16, #tpu.memory_space<vmem>>, %arg2: memref<32x128xbf16, #tpu.memory_space<vmem>>, %arg3: memref<1x128xf32, #tpu.memory_space<vmem>>, %arg4: memref<512x128xbf16, #tpu.memory_space<vmem>>) attributes {dimension_semantics = [#tpu.dimension_semantics<parallel>], iteration_bounds = array<i64: 4>, scalar_prefetch = 0 : i64, scratch_operands = 0 : i64, tpu.core_type = #tpu.core_type<tc>, window_params = [{transform_indices = @transform_0, window_bounds = array<i64: 512, 32>}, {pipeline_mode = #tpu.pipeline_mode<synchronous>, transform_indices = @transform_1, window_bounds = array<i64: 32, 128>}, {pipeline_mode = #tpu.pipeline_mode<synchronous>, transform_indices = @transform_2, window_bounds = array<i64: 1, 128>}, {transform_indices = @transform_3, window_bounds = array<i64: 512, 128>}]} {
    %c0 = arith.constant 0 : index
    %c0_0 = arith.constant 0 : index
    %0 = vector.load %arg1[%c0, %c0_0] : memref<512x32xbf16, #tpu.memory_space<vmem>>, vector<512x32xbf16>
    %c0_1 = arith.constant 0 : index
    %c0_2 = arith.constant 0 : index
    %1 = vector.load %arg2[%c0_1, %c0_2] : memref<32x128xbf16, #tpu.memory_space<vmem>>, vector<32x128xbf16>
    %cst = arith.constant dense<0.000000e+00> : vector<512x128xf32>
    %2 = tpu.matmul %0, %1, %cst {dimension_numbers = #tpu.dot_dimension_numbers<[1], [0], [0], [1], [0, 0, 1, 1], [], []>} : vector<512x32xbf16>, vector<32x128xbf16>, vector<512x128xf32> -> vector<512x128xf32>
    %c0_3 = arith.constant 0 : index
    %c0_4 = arith.constant 0 : index
    %3 = vector.load %arg3[%c0_3, %c0_4] : memref<1x128xf32, #tpu.memory_space<vmem>>, vector<1x128xf32>
    %4 = vector.broadcast %3 : vector<1x128xf32> to vector<512x128xf32>
    %5 = arith.addf %2, %4 : vector<512x128xf32>
    %cst_5 = arith.constant 0.000000e+00 : f32
    %6 = vector.broadcast %cst_5 : f32 to vector<512x128xf32>
    %7 = arith.cmpf ogt, %5, %6 : vector<512x128xf32>
    %cst_6 = arith.constant 1.000000e-01 : f32
    %8 = vector.broadcast %cst_6 : f32 to vector<512x128xf32>
    %9 = arith.mulf %8, %5 : vector<512x128xf32>
    %10 = arith.select %7, %5, %9 : vector<512x128xi1>, vector<512x128xf32>
    %11 = arith.truncf %10 : vector<512x128xf32> to vector<512x128xbf16>
    %c0_7 = arith.constant 0 : index
    %c0_8 = arith.constant 0 : index
    %12 = vector.load %arg4[%c0_7, %c0_8] : memref<512x128xbf16, #tpu.memory_space<vmem>>, vector<512x128xbf16>
    tpu.vector_store %arg4[%c0_7, %c0_8], %11 {strides = array<i32>} : memref<512x128xbf16, #tpu.memory_space<vmem>>, vector<512x128xbf16>,
    return
  }
  func.func @transform_0(%arg0: i32) -> (i32, i32) {
    %c0_i32 = arith.constant 0 : i32
    %c0_i32_0 = arith.constant 0 : i32
    return %arg0, %c0_i32 : i32, i32
  }
  func.func @transform_1(%arg0: i32) -> (i32, i32) {
    %c0_i32 = arith.constant 0 : i32
    %c0_i32_0 = arith.constant 0 : i32
    %c0_i32_1 = arith.constant 0 : i32
    return %c0_i32, %c0_i32_0 : i32, i32
  }
  func.func @transform_2(%arg0: i32) -> (i32, i32) {
    %c0_i32 = arith.constant 0 : i32
    %c0_i32_0 = arith.constant 0 : i32
    %c0_i32_1 = arith.constant 0 : i32
    return %c0_i32, %c0_i32_0 : i32, i32
  }
  func.func @transform_3(%arg0: i32) -> (i32, i32) {
    %c0_i32 = arith.constant 0 : i32
    %c0_i32_0 = arith.constant 0 : i32
    return %arg0, %c0_i32 : i32, i32
  }
}

module attributes {stable_mosaic.version = 11 : i64} {
  func.func @_mm_bias_act_kernel(%arg0: i32, %arg1: memref<256x80xbf16, #tpu.memory_space<vmem>>, %arg2: memref<80x128xbf16, #tpu.memory_space<vmem>>, %arg3: memref<1x128xf32, #tpu.memory_space<vmem>>, %arg4: memref<256x128xbf16, #tpu.memory_space<vmem>>) attributes {dimension_semantics = [#tpu.dimension_semantics<parallel>], iteration_bounds = array<i64: 2>, scalar_prefetch = 0 : i64, scratch_operands = 0 : i64, tpu.core_type = #tpu.core_type<tc>, window_params = [{transform_indices = @transform_0, window_bounds = array<i64: 256, 80>}, {pipeline_mode = #tpu.pipeline_mode<synchronous>, transform_indices = @transform_1, window_bounds = array<i64: 80, 128>}, {pipeline_mode = #tpu.pipeline_mode<synchronous>, transform_indices = @transform_2, window_bounds = array<i64: 1, 128>}, {transform_indices = @transform_3, window_bounds = array<i64: 256, 128>}]} {
    %c0 = arith.constant 0 : index
    %c0_0 = arith.constant 0 : index
    %0 = vector.load %arg1[%c0, %c0_0] : memref<256x80xbf16, #tpu.memory_space<vmem>>, vector<256x80xbf16>
    %c0_1 = arith.constant 0 : index
    %c0_2 = arith.constant 0 : index
    %1 = vector.load %arg2[%c0_1, %c0_2] : memref<80x128xbf16, #tpu.memory_space<vmem>>, vector<80x128xbf16>
    %cst = arith.constant dense<0.000000e+00> : vector<256x128xf32>
    %2 = tpu.matmul %0, %1, %cst {dimension_numbers = #tpu.dot_dimension_numbers<[1], [0], [0], [1], [0, 0, 1, 1], [], []>} : vector<256x80xbf16>, vector<80x128xbf16>, vector<256x128xf32> -> vector<256x128xf32>
    %c0_3 = arith.constant 0 : index
    %c0_4 = arith.constant 0 : index
    %3 = vector.load %arg3[%c0_3, %c0_4] : memref<1x128xf32, #tpu.memory_space<vmem>>, vector<1x128xf32>
    %4 = vector.broadcast %3 : vector<1x128xf32> to vector<256x128xf32>
    %5 = arith.addf %2, %4 : vector<256x128xf32>
    %cst_5 = arith.constant 0.000000e+00 : f32
    %6 = vector.broadcast %cst_5 : f32 to vector<256x128xf32>
    %7 = arith.cmpf ogt, %5, %6 : vector<256x128xf32>
    %cst_6 = arith.constant 1.000000e-01 : f32
    %8 = vector.broadcast %cst_6 : f32 to vector<256x128xf32>
    %9 = arith.mulf %8, %5 : vector<256x128xf32>
    %10 = arith.select %7, %5, %9 : vector<256x128xi1>, vector<256x128xf32>
    %11 = arith.truncf %10 : vector<256x128xf32> to vector<256x128xbf16>
    %c0_7 = arith.constant 0 : index
    %c0_8 = arith.constant 0 : index
    %12 = vector.load %arg4[%c0_7, %c0_8] : memref<256x128xbf16, #tpu.memory_space<vmem>>, vector<256x128xbf16>
    tpu.vector_store %arg4[%c0_7, %c0_8], %11 {strides = array<i32>} : memref<256x128xbf16, #tpu.memory_space<vmem>>, vector<256x128xbf16>,
    return
  }
  func.func @transform_0(%arg0: i32) -> (i32, i32) {
    %c0_i32 = arith.constant 0 : i32
    %c0_i32_0 = arith.constant 0 : i32
    return %arg0, %c0_i32 : i32, i32
  }
  func.func @transform_1(%arg0: i32) -> (i32, i32) {
    %c0_i32 = arith.constant 0 : i32
    %c0_i32_0 = arith.constant 0 : i32
    %c0_i32_1 = arith.constant 0 : i32
    return %c0_i32, %c0_i32_0 : i32, i32
  }
  func.func @transform_2(%arg0: i32) -> (i32, i32) {
    %c0_i32 = arith.constant 0 : i32
    %c0_i32_0 = arith.constant 0 : i32
    %c0_i32_1 = arith.constant 0 : i32
    return %c0_i32, %c0_i32_0 : i32, i32
  }
  func.func @transform_3(%arg0: i32) -> (i32, i32) {
    %c0_i32 = arith.constant 0 : i32
    %c0_i32_0 = arith.constant 0 : i32
    return %arg0, %c0_i32 : i32, i32
  }
}

module attributes {stable_mosaic.version = 11 : i64} {
  func.func @_mm_bias_act_kernel(%arg0: i32, %arg1: memref<256x144xbf16, #tpu.memory_space<vmem>>, %arg2: memref<144x128xbf16, #tpu.memory_space<vmem>>, %arg3: memref<1x128xf32, #tpu.memory_space<vmem>>, %arg4: memref<256x128xbf16, #tpu.memory_space<vmem>>) attributes {dimension_semantics = [#tpu.dimension_semantics<parallel>], iteration_bounds = array<i64: 2>, scalar_prefetch = 0 : i64, scratch_operands = 0 : i64, tpu.core_type = #tpu.core_type<tc>, window_params = [{transform_indices = @transform_0, window_bounds = array<i64: 256, 144>}, {pipeline_mode = #tpu.pipeline_mode<synchronous>, transform_indices = @transform_1, window_bounds = array<i64: 144, 128>}, {pipeline_mode = #tpu.pipeline_mode<synchronous>, transform_indices = @transform_2, window_bounds = array<i64: 1, 128>}, {transform_indices = @transform_3, window_bounds = array<i64: 256, 128>}]} {
    %c0 = arith.constant 0 : index
    %c0_0 = arith.constant 0 : index
    %0 = vector.load %arg1[%c0, %c0_0] : memref<256x144xbf16, #tpu.memory_space<vmem>>, vector<256x144xbf16>
    %c0_1 = arith.constant 0 : index
    %c0_2 = arith.constant 0 : index
    %1 = vector.load %arg2[%c0_1, %c0_2] : memref<144x128xbf16, #tpu.memory_space<vmem>>, vector<144x128xbf16>
    %cst = arith.constant dense<0.000000e+00> : vector<256x128xf32>
    %2 = tpu.matmul %0, %1, %cst {dimension_numbers = #tpu.dot_dimension_numbers<[1], [0], [0], [1], [0, 0, 1, 1], [], []>} : vector<256x144xbf16>, vector<144x128xbf16>, vector<256x128xf32> -> vector<256x128xf32>
    %c0_3 = arith.constant 0 : index
    %c0_4 = arith.constant 0 : index
    %3 = vector.load %arg3[%c0_3, %c0_4] : memref<1x128xf32, #tpu.memory_space<vmem>>, vector<1x128xf32>
    %4 = vector.broadcast %3 : vector<1x128xf32> to vector<256x128xf32>
    %5 = arith.addf %2, %4 : vector<256x128xf32>
    %cst_5 = arith.constant 0.000000e+00 : f32
    %6 = vector.broadcast %cst_5 : f32 to vector<256x128xf32>
    %7 = arith.cmpf ogt, %5, %6 : vector<256x128xf32>
    %cst_6 = arith.constant 1.000000e-01 : f32
    %8 = vector.broadcast %cst_6 : f32 to vector<256x128xf32>
    %9 = arith.mulf %8, %5 : vector<256x128xf32>
    %10 = arith.select %7, %5, %9 : vector<256x128xi1>, vector<256x128xf32>
    %11 = arith.truncf %10 : vector<256x128xf32> to vector<256x128xbf16>
    %c0_7 = arith.constant 0 : index
    %c0_8 = arith.constant 0 : index
    %12 = vector.load %arg4[%c0_7, %c0_8] : memref<256x128xbf16, #tpu.memory_space<vmem>>, vector<256x128xbf16>
    tpu.vector_store %arg4[%c0_7, %c0_8], %11 {strides = array<i32>} : memref<256x128xbf16, #tpu.memory_space<vmem>>, vector<256x128xbf16>,
    return
  }
  func.func @transform_0(%arg0: i32) -> (i32, i32) {
    %c0_i32 = arith.constant 0 : i32
    %c0_i32_0 = arith.constant 0 : i32
    return %arg0, %c0_i32 : i32, i32
  }
  func.func @transform_1(%arg0: i32) -> (i32, i32) {
    %c0_i32 = arith.constant 0 : i32
    %c0_i32_0 = arith.constant 0 : i32
    %c0_i32_1 = arith.constant 0 : i32
    return %c0_i32, %c0_i32_0 : i32, i32
  }
  func.func @transform_2(%arg0: i32) -> (i32, i32) {
    %c0_i32 = arith.constant 0 : i32
    %c0_i32_0 = arith.constant 0 : i32
    %c0_i32_1 = arith.constant 0 : i32
    return %c0_i32, %c0_i32_0 : i32, i32
  }
  func.func @transform_3(%arg0: i32) -> (i32, i32) {
    %c0_i32 = arith.constant 0 : i32
    %c0_i32_0 = arith.constant 0 : i32
    return %arg0, %c0_i32 : i32, i32
  }
}

module attributes {stable_mosaic.version = 11 : i64} {
  func.func @_mm_bias_act_kernel(%arg0: i32, %arg1: memref<64x144xbf16, #tpu.memory_space<vmem>>, %arg2: memref<144x128xbf16, #tpu.memory_space<vmem>>, %arg3: memref<1x128xf32, #tpu.memory_space<vmem>>, %arg4: memref<64x128xbf16, #tpu.memory_space<vmem>>) attributes {dimension_semantics = [#tpu.dimension_semantics<parallel>], iteration_bounds = array<i64: 2>, scalar_prefetch = 0 : i64, scratch_operands = 0 : i64, tpu.core_type = #tpu.core_type<tc>, window_params = [{transform_indices = @transform_0, window_bounds = array<i64: 64, 144>}, {pipeline_mode = #tpu.pipeline_mode<synchronous>, transform_indices = @transform_1, window_bounds = array<i64: 144, 128>}, {pipeline_mode = #tpu.pipeline_mode<synchronous>, transform_indices = @transform_2, window_bounds = array<i64: 1, 128>}, {transform_indices = @transform_3, window_bounds = array<i64: 64, 128>}]} {
    %c0 = arith.constant 0 : index
    %c0_0 = arith.constant 0 : index
    %0 = vector.load %arg1[%c0, %c0_0] : memref<64x144xbf16, #tpu.memory_space<vmem>>, vector<64x144xbf16>
    %c0_1 = arith.constant 0 : index
    %c0_2 = arith.constant 0 : index
    %1 = vector.load %arg2[%c0_1, %c0_2] : memref<144x128xbf16, #tpu.memory_space<vmem>>, vector<144x128xbf16>
    %cst = arith.constant dense<0.000000e+00> : vector<64x128xf32>
    %2 = tpu.matmul %0, %1, %cst {dimension_numbers = #tpu.dot_dimension_numbers<[1], [0], [0], [1], [0, 0, 1, 1], [], []>} : vector<64x144xbf16>, vector<144x128xbf16>, vector<64x128xf32> -> vector<64x128xf32>
    %c0_3 = arith.constant 0 : index
    %c0_4 = arith.constant 0 : index
    %3 = vector.load %arg3[%c0_3, %c0_4] : memref<1x128xf32, #tpu.memory_space<vmem>>, vector<1x128xf32>
    %4 = vector.broadcast %3 : vector<1x128xf32> to vector<64x128xf32>
    %5 = arith.addf %2, %4 : vector<64x128xf32>
    %cst_5 = arith.constant 0.000000e+00 : f32
    %6 = vector.broadcast %cst_5 : f32 to vector<64x128xf32>
    %7 = arith.cmpf ogt, %5, %6 : vector<64x128xf32>
    %cst_6 = arith.constant 1.000000e-01 : f32
    %8 = vector.broadcast %cst_6 : f32 to vector<64x128xf32>
    %9 = arith.mulf %8, %5 : vector<64x128xf32>
    %10 = arith.select %7, %5, %9 : vector<64x128xi1>, vector<64x128xf32>
    %11 = arith.truncf %10 : vector<64x128xf32> to vector<64x128xbf16>
    %c0_7 = arith.constant 0 : index
    %c0_8 = arith.constant 0 : index
    %12 = vector.load %arg4[%c0_7, %c0_8] : memref<64x128xbf16, #tpu.memory_space<vmem>>, vector<64x128xbf16>
    tpu.vector_store %arg4[%c0_7, %c0_8], %11 {strides = array<i32>} : memref<64x128xbf16, #tpu.memory_space<vmem>>, vector<64x128xbf16>,
    return
  }
  func.func @transform_0(%arg0: i32) -> (i32, i32) {
    %c0_i32 = arith.constant 0 : i32
    %c0_i32_0 = arith.constant 0 : i32
    return %arg0, %c0_i32 : i32, i32
  }
  func.func @transform_1(%arg0: i32) -> (i32, i32) {
    %c0_i32 = arith.constant 0 : i32
    %c0_i32_0 = arith.constant 0 : i32
    %c0_i32_1 = arith.constant 0 : i32
    return %c0_i32, %c0_i32_0 : i32, i32
  }
  func.func @transform_2(%arg0: i32) -> (i32, i32) {
    %c0_i32 = arith.constant 0 : i32
    %c0_i32_0 = arith.constant 0 : i32
    %c0_i32_1 = arith.constant 0 : i32
    return %c0_i32, %c0_i32_0 : i32, i32
  }
  func.func @transform_3(%arg0: i32) -> (i32, i32) {
    %c0_i32 = arith.constant 0 : i32
    %c0_i32_0 = arith.constant 0 : i32
    return %arg0, %c0_i32 : i32, i32
  }
}

module attributes {stable_mosaic.version = 11 : i64} {
  func.func @_mm_bias_act_kernel(%arg0: i32, %arg1: memref<64x32xbf16, #tpu.memory_space<vmem>>, %arg2: memref<32x128xbf16, #tpu.memory_space<vmem>>, %arg3: memref<1x128xf32, #tpu.memory_space<vmem>>, %arg4: memref<64x128xbf16, #tpu.memory_space<vmem>>) attributes {dimension_semantics = [#tpu.dimension_semantics<parallel>], iteration_bounds = array<i64: 2>, scalar_prefetch = 0 : i64, scratch_operands = 0 : i64, tpu.core_type = #tpu.core_type<tc>, window_params = [{transform_indices = @transform_0, window_bounds = array<i64: 64, 32>}, {pipeline_mode = #tpu.pipeline_mode<synchronous>, transform_indices = @transform_1, window_bounds = array<i64: 32, 128>}, {pipeline_mode = #tpu.pipeline_mode<synchronous>, transform_indices = @transform_2, window_bounds = array<i64: 1, 128>}, {transform_indices = @transform_3, window_bounds = array<i64: 64, 128>}]} {
    %c0 = arith.constant 0 : index
    %c0_0 = arith.constant 0 : index
    %0 = vector.load %arg1[%c0, %c0_0] : memref<64x32xbf16, #tpu.memory_space<vmem>>, vector<64x32xbf16>
    %c0_1 = arith.constant 0 : index
    %c0_2 = arith.constant 0 : index
    %1 = vector.load %arg2[%c0_1, %c0_2] : memref<32x128xbf16, #tpu.memory_space<vmem>>, vector<32x128xbf16>
    %cst = arith.constant dense<0.000000e+00> : vector<64x128xf32>
    %2 = tpu.matmul %0, %1, %cst {dimension_numbers = #tpu.dot_dimension_numbers<[1], [0], [0], [1], [0, 0, 1, 1], [], []>} : vector<64x32xbf16>, vector<32x128xbf16>, vector<64x128xf32> -> vector<64x128xf32>
    %c0_3 = arith.constant 0 : index
    %c0_4 = arith.constant 0 : index
    %3 = vector.load %arg3[%c0_3, %c0_4] : memref<1x128xf32, #tpu.memory_space<vmem>>, vector<1x128xf32>
    %4 = vector.broadcast %3 : vector<1x128xf32> to vector<64x128xf32>
    %5 = arith.addf %2, %4 : vector<64x128xf32>
    %cst_5 = arith.constant 0.000000e+00 : f32
    %6 = vector.broadcast %cst_5 : f32 to vector<64x128xf32>
    %7 = arith.cmpf ogt, %5, %6 : vector<64x128xf32>
    %cst_6 = arith.constant 1.000000e-01 : f32
    %8 = vector.broadcast %cst_6 : f32 to vector<64x128xf32>
    %9 = arith.mulf %8, %5 : vector<64x128xf32>
    %10 = arith.select %7, %5, %9 : vector<64x128xi1>, vector<64x128xf32>
    %11 = arith.truncf %10 : vector<64x128xf32> to vector<64x128xbf16>
    %c0_7 = arith.constant 0 : index
    %c0_8 = arith.constant 0 : index
    %12 = vector.load %arg4[%c0_7, %c0_8] : memref<64x128xbf16, #tpu.memory_space<vmem>>, vector<64x128xbf16>
    tpu.vector_store %arg4[%c0_7, %c0_8], %11 {strides = array<i32>} : memref<64x128xbf16, #tpu.memory_space<vmem>>, vector<64x128xbf16>,
    return
  }
  func.func @transform_0(%arg0: i32) -> (i32, i32) {
    %c0_i32 = arith.constant 0 : i32
    %c0_i32_0 = arith.constant 0 : i32
    return %arg0, %c0_i32 : i32, i32
  }
  func.func @transform_1(%arg0: i32) -> (i32, i32) {
    %c0_i32 = arith.constant 0 : i32
    %c0_i32_0 = arith.constant 0 : i32
    %c0_i32_1 = arith.constant 0 : i32
    return %c0_i32, %c0_i32_0 : i32, i32
  }
  func.func @transform_2(%arg0: i32) -> (i32, i32) {
    %c0_i32 = arith.constant 0 : i32
    %c0_i32_0 = arith.constant 0 : i32
    %c0_i32_1 = arith.constant 0 : i32
    return %c0_i32, %c0_i32_0 : i32, i32
  }
  func.func @transform_3(%arg0: i32) -> (i32, i32) {
    %c0_i32 = arith.constant 0 : i32
    %c0_i32_0 = arith.constant 0 : i32
    return %arg0, %c0_i32 : i32, i32
  }
}

module attributes {stable_mosaic.version = 11 : i64} {
  func.func @_mm_bias_act_kernel(%arg0: i32, %arg1: memref<64x32xbf16, #tpu.memory_space<vmem>>, %arg2: memref<32x128xbf16, #tpu.memory_space<vmem>>, %arg3: memref<1x128xf32, #tpu.memory_space<vmem>>, %arg4: memref<64x128xbf16, #tpu.memory_space<vmem>>) attributes {dimension_semantics = [#tpu.dimension_semantics<parallel>], iteration_bounds = array<i64: 2>, scalar_prefetch = 0 : i64, scratch_operands = 0 : i64, tpu.core_type = #tpu.core_type<tc>, window_params = [{transform_indices = @transform_0, window_bounds = array<i64: 64, 32>}, {pipeline_mode = #tpu.pipeline_mode<synchronous>, transform_indices = @transform_1, window_bounds = array<i64: 32, 128>}, {pipeline_mode = #tpu.pipeline_mode<synchronous>, transform_indices = @transform_2, window_bounds = array<i64: 1, 128>}, {transform_indices = @transform_3, window_bounds = array<i64: 64, 128>}]} {
    %c0 = arith.constant 0 : index
    %c0_0 = arith.constant 0 : index
    %0 = vector.load %arg1[%c0, %c0_0] : memref<64x32xbf16, #tpu.memory_space<vmem>>, vector<64x32xbf16>
    %c0_1 = arith.constant 0 : index
    %c0_2 = arith.constant 0 : index
    %1 = vector.load %arg2[%c0_1, %c0_2] : memref<32x128xbf16, #tpu.memory_space<vmem>>, vector<32x128xbf16>
    %cst = arith.constant dense<0.000000e+00> : vector<64x128xf32>
    %2 = tpu.matmul %0, %1, %cst {dimension_numbers = #tpu.dot_dimension_numbers<[1], [0], [0], [1], [0, 0, 1, 1], [], []>} : vector<64x32xbf16>, vector<32x128xbf16>, vector<64x128xf32> -> vector<64x128xf32>
    %c0_3 = arith.constant 0 : index
    %c0_4 = arith.constant 0 : index
    %3 = vector.load %arg3[%c0_3, %c0_4] : memref<1x128xf32, #tpu.memory_space<vmem>>, vector<1x128xf32>
    %4 = vector.broadcast %3 : vector<1x128xf32> to vector<64x128xf32>
    %5 = arith.addf %2, %4 : vector<64x128xf32>
    %cst_5 = arith.constant 0.000000e+00 : f32
    %6 = vector.broadcast %cst_5 : f32 to vector<64x128xf32>
    %7 = arith.cmpf ogt, %5, %6 : vector<64x128xf32>
    %cst_6 = arith.constant 1.000000e+00 : f32
    %8 = vector.broadcast %cst_6 : f32 to vector<64x128xf32>
    %9 = arith.mulf %8, %5 : vector<64x128xf32>
    %10 = arith.select %7, %5, %9 : vector<64x128xi1>, vector<64x128xf32>
    %11 = arith.truncf %10 : vector<64x128xf32> to vector<64x128xbf16>
    %c0_7 = arith.constant 0 : index
    %c0_8 = arith.constant 0 : index
    %12 = vector.load %arg4[%c0_7, %c0_8] : memref<64x128xbf16, #tpu.memory_space<vmem>>, vector<64x128xbf16>
    tpu.vector_store %arg4[%c0_7, %c0_8], %11 {strides = array<i32>} : memref<64x128xbf16, #tpu.memory_space<vmem>>, vector<64x128xbf16>,
    return
  }
  func.func @transform_0(%arg0: i32) -> (i32, i32) {
    %c0_i32 = arith.constant 0 : i32
    %c0_i32_0 = arith.constant 0 : i32
    return %arg0, %c0_i32 : i32, i32
  }
  func.func @transform_1(%arg0: i32) -> (i32, i32) {
    %c0_i32 = arith.constant 0 : i32
    %c0_i32_0 = arith.constant 0 : i32
    %c0_i32_1 = arith.constant 0 : i32
    return %c0_i32, %c0_i32_0 : i32, i32
  }
  func.func @transform_2(%arg0: i32) -> (i32, i32) {
    %c0_i32 = arith.constant 0 : i32
    %c0_i32_0 = arith.constant 0 : i32
    %c0_i32_1 = arith.constant 0 : i32
    return %c0_i32, %c0_i32_0 : i32, i32
  }
  func.func @transform_3(%arg0: i32) -> (i32, i32) {
    %c0_i32 = arith.constant 0 : i32
    %c0_i32_0 = arith.constant 0 : i32
    return %arg0, %c0_i32 : i32, i32
  }
}

module attributes {stable_mosaic.version = 11 : i64} {
  func.func @_upsample2x_kernel(%arg0: i32, %arg1: memref<8x128xbf16, #tpu.memory_space<vmem>>, %arg2: memref<16x8xf32, #tpu.memory_space<vmem>>, %arg3: memref<128x256xf32, #tpu.memory_space<vmem>>, %arg4: memref<16x256xbf16, #tpu.memory_space<vmem>>) attributes {dimension_semantics = [#tpu.dimension_semantics<parallel>], iteration_bounds = array<i64: 2>, scalar_prefetch = 0 : i64, scratch_operands = 0 : i64, tpu.core_type = #tpu.core_type<tc>, window_params = [{transform_indices = @transform_0, window_bounds = array<i64: 8, 128>}, {pipeline_mode = #tpu.pipeline_mode<synchronous>, transform_indices = @transform_1, window_bounds = array<i64: 16, 8>}, {pipeline_mode = #tpu.pipeline_mode<synchronous>, transform_indices = @transform_2, window_bounds = array<i64: 128, 256>}, {transform_indices = @transform_3, window_bounds = array<i64: 16, 256>}]} {
    %c0 = arith.constant 0 : index
    %c0_0 = arith.constant 0 : index
    %0 = vector.load %arg1[%c0, %c0_0] : memref<8x128xbf16, #tpu.memory_space<vmem>>, vector<8x128xbf16>
    %1 = arith.extf %0 : vector<8x128xbf16> to vector<8x128xf32>
    %c0_1 = arith.constant 0 : index
    %c0_2 = arith.constant 0 : index
    %2 = vector.load %arg2[%c0_1, %c0_2] : memref<16x8xf32, #tpu.memory_space<vmem>>, vector<16x8xf32>
    %cst = arith.constant dense<0.000000e+00> : vector<16x128xf32>
    %3 = tpu.matmul %2, %1, %cst {dimension_numbers = #tpu.dot_dimension_numbers<[1], [0], [0], [1], [0, 0, 1, 1], [], []>} : vector<16x8xf32>, vector<8x128xf32>, vector<16x128xf32> -> vector<16x128xf32>
    %c0_3 = arith.constant 0 : index
    %c0_4 = arith.constant 0 : index
    %4 = vector.load %arg3[%c0_3, %c0_4] : memref<128x256xf32, #tpu.memory_space<vmem>>, vector<128x256xf32>
    %cst_5 = arith.constant dense<0.000000e+00> : vector<16x256xf32>
    %5 = tpu.matmul %3, %4, %cst_5 {dimension_numbers = #tpu.dot_dimension_numbers<[1], [0], [0], [1], [0, 0, 1, 1], [], []>} : vector<16x128xf32>, vector<128x256xf32>, vector<16x256xf32> -> vector<16x256xf32>
    %6 = arith.truncf %5 : vector<16x256xf32> to vector<16x256xbf16>
    %c0_6 = arith.constant 0 : index
    %c0_7 = arith.constant 0 : index
    %7 = vector.load %arg4[%c0_6, %c0_7] : memref<16x256xbf16, #tpu.memory_space<vmem>>, vector<16x256xbf16>
    tpu.vector_store %arg4[%c0_6, %c0_7], %6 {strides = array<i32>} : memref<16x256xbf16, #tpu.memory_space<vmem>>, vector<16x256xbf16>,
    return
  }
  func.func @transform_0(%arg0: i32) -> (i32, i32) {
    %c0_i32 = arith.constant 0 : i32
    %c0_i32_0 = arith.constant 0 : i32
    return %arg0, %c0_i32 : i32, i32
  }
  func.func @transform_1(%arg0: i32) -> (i32, i32) {
    %c0_i32 = arith.constant 0 : i32
    %c0_i32_0 = arith.constant 0 : i32
    %c0_i32_1 = arith.constant 0 : i32
    return %c0_i32, %c0_i32_0 : i32, i32
  }
  func.func @transform_2(%arg0: i32) -> (i32, i32) {
    %c0_i32 = arith.constant 0 : i32
    %c0_i32_0 = arith.constant 0 : i32
    %c0_i32_1 = arith.constant 0 : i32
    return %c0_i32, %c0_i32_0 : i32, i32
  }
  func.func @transform_3(%arg0: i32) -> (i32, i32) {
    %c0_i32 = arith.constant 0 : i32
    %c0_i32_0 = arith.constant 0 : i32
    return %arg0, %c0_i32 : i32, i32
  }
}

module attributes {stable_mosaic.version = 11 : i64} {
  func.func @_yolo_kernel(%arg0: i32, %arg1: memref<8x256xf32, #tpu.memory_space<vmem>>, %arg2: memref<8x256xf32, #tpu.memory_space<vmem>>, %arg3: memref<8x256xf32, #tpu.memory_space<vmem>>, %arg4: memref<8x256xf32, #tpu.memory_space<vmem>>) attributes {dimension_semantics = [#tpu.dimension_semantics<parallel>], iteration_bounds = array<i64: 2>, scalar_prefetch = 0 : i64, scratch_operands = 0 : i64, tpu.core_type = #tpu.core_type<tc>, window_params = [{transform_indices = @transform_0, window_bounds = array<i64: 8, 256>}, {pipeline_mode = #tpu.pipeline_mode<synchronous>, transform_indices = @transform_1, window_bounds = array<i64: 8, 256>}, {pipeline_mode = #tpu.pipeline_mode<synchronous>, transform_indices = @transform_2, window_bounds = array<i64: 8, 256>}, {transform_indices = @transform_3, window_bounds = array<i64: 8, 256>}]} {
    %c0 = arith.constant 0 : index
    %c0_0 = arith.constant 0 : index
    %0 = vector.load %arg1[%c0, %c0_0] : memref<8x256xf32, #tpu.memory_space<vmem>>, vector<8x256xf32>
    %1 = tpu.iota {dimensions = array<i32: 0>} : vector<8x256xi32>
    %c2_i32 = arith.constant 2 : i32
    %2 = vector.broadcast %c2_i32 : i32 to vector<8x256xi32>
    %3 = arith.cmpi slt, %1, %2 : vector<8x256xi32>
    %c2_i32_1 = arith.constant 2 : i32
    %4 = vector.broadcast %c2_i32_1 : i32 to vector<8x256xi32>
    %5 = arith.cmpi sge, %1, %4 : vector<8x256xi32>
    %c4_i32 = arith.constant 4 : i32
    %6 = vector.broadcast %c4_i32 : i32 to vector<8x256xi32>
    %7 = arith.cmpi slt, %1, %6 : vector<8x256xi32>
    %8 = arith.andi %5, %7 : vector<8x256xi1>
    %cst = arith.constant 0.000000e+00 : f32
    %9 = vector.broadcast %cst : f32 to vector<8x256xf32>
    %10 = arith.subf %9, %0 : vector<8x256xf32>
    %11 = math.exp %10 : vector<8x256xf32>
    %cst_2 = arith.constant 1.000000e+00 : f32
    %12 = vector.broadcast %cst_2 : f32 to vector<8x256xf32>
    %13 = arith.addf %12, %11 : vector<8x256xf32>
    %cst_3 = arith.constant 1.000000e+00 : f32
    %14 = vector.broadcast %cst_3 : f32 to vector<8x256xf32>
    %15 = arith.divf %14, %13 : vector<8x256xf32>
    %cst_4 = arith.constant 0.000000e+00 : f32
    %16 = vector.broadcast %cst_4 : f32 to vector<8x256xf32>
    %17 = arith.select %8, %0, %16 : vector<8x256xi1>, vector<8x256xf32>
    %18 = math.exp %17 : vector<8x256xf32>
    %c0_5 = arith.constant 0 : index
    %c0_6 = arith.constant 0 : index
    %19 = vector.load %arg3[%c0_5, %c0_6] : memref<8x256xf32, #tpu.memory_space<vmem>>, vector<8x256xf32>
    %20 = arith.mulf %18, %19 : vector<8x256xf32>
    %21 = arith.select %8, %20, %15 : vector<8x256xi1>, vector<8x256xf32>
    %c0_7 = arith.constant 0 : index
    %c0_8 = arith.constant 0 : index
    %22 = vector.load %arg2[%c0_7, %c0_8] : memref<8x256xf32, #tpu.memory_space<vmem>>, vector<8x256xf32>
    %cst_9 = arith.constant 0.000000e+00 : f32
    %23 = vector.broadcast %cst_9 : f32 to vector<8x256xf32>
    %24 = arith.select %3, %22, %23 : vector<8x256xi1>, vector<8x256xf32>
    %25 = arith.addf %21, %24 : vector<8x256xf32>
    %c4_i32_10 = arith.constant 4 : i32
    %26 = vector.broadcast %c4_i32_10 : i32 to vector<8x256xi32>
    %27 = arith.cmpi slt, %1, %26 : vector<8x256xi32>
    %cst_11 = arith.constant 4.000000e+00 : f32
    %28 = vector.broadcast %cst_11 : f32 to vector<8x256xf32>
    %29 = arith.mulf %25, %28 : vector<8x256xf32>
    %30 = arith.select %27, %29, %25 : vector<8x256xi1>, vector<8x256xf32>
    %c0_12 = arith.constant 0 : index
    %c0_13 = arith.constant 0 : index
    %31 = vector.load %arg4[%c0_12, %c0_13] : memref<8x256xf32, #tpu.memory_space<vmem>>, vector<8x256xf32>
    tpu.vector_store %arg4[%c0_12, %c0_13], %30 {strides = array<i32>} : memref<8x256xf32, #tpu.memory_space<vmem>>, vector<8x256xf32>,
    return
  }
  func.func @transform_0(%arg0: i32) -> (i32, i32) {
    %c0_i32 = arith.constant 0 : i32
    %c0_i32_0 = arith.constant 0 : i32
    return %arg0, %c0_i32 : i32, i32
  }
  func.func @transform_1(%arg0: i32) -> (i32, i32) {
    %c0_i32 = arith.constant 0 : i32
    %c0_i32_0 = arith.constant 0 : i32
    %c0_i32_1 = arith.constant 0 : i32
    return %c0_i32, %c0_i32_0 : i32, i32
  }
  func.func @transform_2(%arg0: i32) -> (i32, i32) {
    %c0_i32 = arith.constant 0 : i32
    %c0_i32_0 = arith.constant 0 : i32
    %c0_i32_1 = arith.constant 0 : i32
    return %c0_i32, %c0_i32_0 : i32, i32
  }
  func.func @transform_3(%arg0: i32) -> (i32, i32) {
    %c0_i32 = arith.constant 0 : i32
    %c0_i32_0 = arith.constant 0 : i32
    return %arg0, %c0_i32 : i32, i32
  }
}

module attributes {stable_mosaic.version = 11 : i64} {
  func.func @_mm_bias_act_kernel(%arg0: i32, %arg1: memref<256x32xbf16, #tpu.memory_space<vmem>>, %arg2: memref<32x128xbf16, #tpu.memory_space<vmem>>, %arg3: memref<1x128xf32, #tpu.memory_space<vmem>>, %arg4: memref<256x128xbf16, #tpu.memory_space<vmem>>) attributes {dimension_semantics = [#tpu.dimension_semantics<parallel>], iteration_bounds = array<i64: 2>, scalar_prefetch = 0 : i64, scratch_operands = 0 : i64, tpu.core_type = #tpu.core_type<tc>, window_params = [{transform_indices = @transform_0, window_bounds = array<i64: 256, 32>}, {pipeline_mode = #tpu.pipeline_mode<synchronous>, transform_indices = @transform_1, window_bounds = array<i64: 32, 128>}, {pipeline_mode = #tpu.pipeline_mode<synchronous>, transform_indices = @transform_2, window_bounds = array<i64: 1, 128>}, {transform_indices = @transform_3, window_bounds = array<i64: 256, 128>}]} {
    %c0 = arith.constant 0 : index
    %c0_0 = arith.constant 0 : index
    %0 = vector.load %arg1[%c0, %c0_0] : memref<256x32xbf16, #tpu.memory_space<vmem>>, vector<256x32xbf16>
    %c0_1 = arith.constant 0 : index
    %c0_2 = arith.constant 0 : index
    %1 = vector.load %arg2[%c0_1, %c0_2] : memref<32x128xbf16, #tpu.memory_space<vmem>>, vector<32x128xbf16>
    %cst = arith.constant dense<0.000000e+00> : vector<256x128xf32>
    %2 = tpu.matmul %0, %1, %cst {dimension_numbers = #tpu.dot_dimension_numbers<[1], [0], [0], [1], [0, 0, 1, 1], [], []>} : vector<256x32xbf16>, vector<32x128xbf16>, vector<256x128xf32> -> vector<256x128xf32>
    %c0_3 = arith.constant 0 : index
    %c0_4 = arith.constant 0 : index
    %3 = vector.load %arg3[%c0_3, %c0_4] : memref<1x128xf32, #tpu.memory_space<vmem>>, vector<1x128xf32>
    %4 = vector.broadcast %3 : vector<1x128xf32> to vector<256x128xf32>
    %5 = arith.addf %2, %4 : vector<256x128xf32>
    %cst_5 = arith.constant 0.000000e+00 : f32
    %6 = vector.broadcast %cst_5 : f32 to vector<256x128xf32>
    %7 = arith.cmpf ogt, %5, %6 : vector<256x128xf32>
    %cst_6 = arith.constant 1.000000e+00 : f32
    %8 = vector.broadcast %cst_6 : f32 to vector<256x128xf32>
    %9 = arith.mulf %8, %5 : vector<256x128xf32>
    %10 = arith.select %7, %5, %9 : vector<256x128xi1>, vector<256x128xf32>
    %11 = arith.truncf %10 : vector<256x128xf32> to vector<256x128xbf16>
    %c0_7 = arith.constant 0 : index
    %c0_8 = arith.constant 0 : index
    %12 = vector.load %arg4[%c0_7, %c0_8] : memref<256x128xbf16, #tpu.memory_space<vmem>>, vector<256x128xbf16>
    tpu.vector_store %arg4[%c0_7, %c0_8], %11 {strides = array<i32>} : memref<256x128xbf16, #tpu.memory_space<vmem>>, vector<256x128xbf16>,
    return
  }
  func.func @transform_0(%arg0: i32) -> (i32, i32) {
    %c0_i32 = arith.constant 0 : i32
    %c0_i32_0 = arith.constant 0 : i32
    return %arg0, %c0_i32 : i32, i32
  }
  func.func @transform_1(%arg0: i32) -> (i32, i32) {
    %c0_i32 = arith.constant 0 : i32
    %c0_i32_0 = arith.constant 0 : i32
    %c0_i32_1 = arith.constant 0 : i32
    return %c0_i32, %c0_i32_0 : i32, i32
  }
  func.func @transform_2(%arg0: i32) -> (i32, i32) {
    %c0_i32 = arith.constant 0 : i32
    %c0_i32_0 = arith.constant 0 : i32
    %c0_i32_1 = arith.constant 0 : i32
    return %c0_i32, %c0_i32_0 : i32, i32
  }
  func.func @transform_3(%arg0: i32) -> (i32, i32) {
    %c0_i32 = arith.constant 0 : i32
    %c0_i32_0 = arith.constant 0 : i32
    return %arg0, %c0_i32 : i32, i32
  }
}

module attributes {stable_mosaic.version = 11 : i64} {
  func.func @_yolo_kernel(%arg0: i32, %arg1: memref<8x768xf32, #tpu.memory_space<vmem>>, %arg2: memref<8x768xf32, #tpu.memory_space<vmem>>, %arg3: memref<8x768xf32, #tpu.memory_space<vmem>>, %arg4: memref<8x768xf32, #tpu.memory_space<vmem>>) attributes {dimension_semantics = [#tpu.dimension_semantics<parallel>], iteration_bounds = array<i64: 2>, scalar_prefetch = 0 : i64, scratch_operands = 0 : i64, tpu.core_type = #tpu.core_type<tc>, window_params = [{transform_indices = @transform_0, window_bounds = array<i64: 8, 768>}, {pipeline_mode = #tpu.pipeline_mode<synchronous>, transform_indices = @transform_1, window_bounds = array<i64: 8, 768>}, {pipeline_mode = #tpu.pipeline_mode<synchronous>, transform_indices = @transform_2, window_bounds = array<i64: 8, 768>}, {transform_indices = @transform_3, window_bounds = array<i64: 8, 768>}]} {
    %c0 = arith.constant 0 : index
    %c0_0 = arith.constant 0 : index
    %0 = vector.load %arg1[%c0, %c0_0] : memref<8x768xf32, #tpu.memory_space<vmem>>, vector<8x768xf32>
    %1 = tpu.iota {dimensions = array<i32: 0>} : vector<8x768xi32>
    %c2_i32 = arith.constant 2 : i32
    %2 = vector.broadcast %c2_i32 : i32 to vector<8x768xi32>
    %3 = arith.cmpi slt, %1, %2 : vector<8x768xi32>
    %c2_i32_1 = arith.constant 2 : i32
    %4 = vector.broadcast %c2_i32_1 : i32 to vector<8x768xi32>
    %5 = arith.cmpi sge, %1, %4 : vector<8x768xi32>
    %c4_i32 = arith.constant 4 : i32
    %6 = vector.broadcast %c4_i32 : i32 to vector<8x768xi32>
    %7 = arith.cmpi slt, %1, %6 : vector<8x768xi32>
    %8 = arith.andi %5, %7 : vector<8x768xi1>
    %cst = arith.constant 0.000000e+00 : f32
    %9 = vector.broadcast %cst : f32 to vector<8x768xf32>
    %10 = arith.subf %9, %0 : vector<8x768xf32>
    %11 = math.exp %10 : vector<8x768xf32>
    %cst_2 = arith.constant 1.000000e+00 : f32
    %12 = vector.broadcast %cst_2 : f32 to vector<8x768xf32>
    %13 = arith.addf %12, %11 : vector<8x768xf32>
    %cst_3 = arith.constant 1.000000e+00 : f32
    %14 = vector.broadcast %cst_3 : f32 to vector<8x768xf32>
    %15 = arith.divf %14, %13 : vector<8x768xf32>
    %cst_4 = arith.constant 0.000000e+00 : f32
    %16 = vector.broadcast %cst_4 : f32 to vector<8x768xf32>
    %17 = arith.select %8, %0, %16 : vector<8x768xi1>, vector<8x768xf32>
    %18 = math.exp %17 : vector<8x768xf32>
    %c0_5 = arith.constant 0 : index
    %c0_6 = arith.constant 0 : index
    %19 = vector.load %arg3[%c0_5, %c0_6] : memref<8x768xf32, #tpu.memory_space<vmem>>, vector<8x768xf32>
    %20 = arith.mulf %18, %19 : vector<8x768xf32>
    %21 = arith.select %8, %20, %15 : vector<8x768xi1>, vector<8x768xf32>
    %c0_7 = arith.constant 0 : index
    %c0_8 = arith.constant 0 : index
    %22 = vector.load %arg2[%c0_7, %c0_8] : memref<8x768xf32, #tpu.memory_space<vmem>>, vector<8x768xf32>
    %cst_9 = arith.constant 0.000000e+00 : f32
    %23 = vector.broadcast %cst_9 : f32 to vector<8x768xf32>
    %24 = arith.select %3, %22, %23 : vector<8x768xi1>, vector<8x768xf32>
    %25 = arith.addf %21, %24 : vector<8x768xf32>
    %c4_i32_10 = arith.constant 4 : i32
    %26 = vector.broadcast %c4_i32_10 : i32 to vector<8x768xi32>
    %27 = arith.cmpi slt, %1, %26 : vector<8x768xi32>
    %cst_11 = arith.constant 2.000000e+00 : f32
    %28 = vector.broadcast %cst_11 : f32 to vector<8x768xf32>
    %29 = arith.mulf %25, %28 : vector<8x768xf32>
    %30 = arith.select %27, %29, %25 : vector<8x768xi1>, vector<8x768xf32>
    %c0_12 = arith.constant 0 : index
    %c0_13 = arith.constant 0 : index
    %31 = vector.load %arg4[%c0_12, %c0_13] : memref<8x768xf32, #tpu.memory_space<vmem>>, vector<8x768xf32>
    tpu.vector_store %arg4[%c0_12, %c0_13], %30 {strides = array<i32>} : memref<8x768xf32, #tpu.memory_space<vmem>>, vector<8x768xf32>,
    return
  }
  func.func @transform_0(%arg0: i32) -> (i32, i32) {
    %c0_i32 = arith.constant 0 : i32
    %c0_i32_0 = arith.constant 0 : i32
    return %arg0, %c0_i32 : i32, i32
  }
  func.func @transform_1(%arg0: i32) -> (i32, i32) {
    %c0_i32 = arith.constant 0 : i32
    %c0_i32_0 = arith.constant 0 : i32
    %c0_i32_1 = arith.constant 0 : i32
    return %c0_i32, %c0_i32_0 : i32, i32
  }
  func.func @transform_2(%arg0: i32) -> (i32, i32) {
    %c0_i32 = arith.constant 0 : i32
    %c0_i32_0 = arith.constant 0 : i32
    %c0_i32_1 = arith.constant 0 : i32
    return %c0_i32, %c0_i32_0 : i32, i32
  }
  func.func @transform_3(%arg0: i32) -> (i32, i32) {
    %c0_i32 = arith.constant 0 : i32
    %c0_i32_0 = arith.constant 0 : i32
    return %arg0, %c0_i32 : i32, i32
  }
}

</mosaic_0001>

<bundles_post_ra>
// kernel: _forward_impl.10
= control target key start
LH: loop header
LB: loop body
LE: loop exit
PB: predicated region body
PF: predicated region fallthrough
CT: control target
= control target key end

     0   :  { %s1949_s12 = smov 0   ;;  %s2151_s0 = inlined_call_operand.vmem [shape: bf16[2048,32], index: 0, kind: input, shape index: {}]   ;;  %s2152_s1 = inlined_call_operand.vmem [shape: bf16[32,128], index: 1, kind: input, shape index: {}]   ;;  %s2153_s2 = inlined_call_operand.vmem [shape: f32[1,128], index: 2, kind: input, shape index: {}]   ;;  %s2154_s3 = inlined_call_operand.vmem [shape: bf16[2048,128], index: 3, kind: output, shape index: {}]  }
   0x1 LB: > { %s1376_s13 = sadd.s32 4294967295, %s1927_s12   ;;  %p1380_p0 = scmp.ge.s32.totalorder %s1927_s12, 1  ;;  %s1927_s12 = sphi %s1949_s12, %s13_s12  }
   0x2   : > { %p138_p1 = scmp.lt.s32.totalorder %s1927_s12, 5 }
   0x4   : > { %p139_p2 = pnand %p1380_p0, %p138_p1 }
   0x5   : > { %v1887_v0 = vld [vmem:[%s2152_s1] sm:$0xff] (!%p139_p2)   ;;  %s1381_s16 = sshll.u32 (!%p139_p2), %s1376_s13, 6  ;;  %v1888_v1 = vld [vmem:[%s2152_s1 + $0x8] sm:$0xff] (!%p139_p2)   ;;  %vm422_vm0 = vcmask (!%p139_p2), 261120  }
   0x6   : > { %142 = sbr.rel (%p139_p2) target bundleno = 307 (0x133), region = 32  ;;  %p163_p3 = scmp.lt.s32.totalorder (!%p139_p2), %s1381_s16, 255  ;;  %1807 = vmatprep.subr.bf16.mxu0 (!%p139_p2), %v1887_v0  ;;  %1875 = vmatprep.subr.bf16.mxu1 (!%p139_p2), %v1887_v0  ;;  %v2040_v34 = vld [vmem:[%s2153_s2] ss:$0 sm:$0xff] (!%p139_p2) }
   0x7   : > { %1808 = vmatpush3.bf16.msra.mxu0 (!%p139_p2), %v1887_v0  ;;  %1877 = vmatpush3.bf16.msra.mxu1 (!%p139_p2), %v1887_v0 }
   0x8   : > { %1809 = vmatprep.subr.bf16.mxu0 (!%p139_p2), %v1888_v1  ;;  %1876 = vmatprep.subr.bf16.mxu1 (!%p139_p2), %v1888_v1 }
   0xb   : > { %1810 = vmatpush3.bf16.msra.mxu0 (!%p139_p2), %v1888_v1  ;;  %1878 = vmatpush3.bf16.msra.mxu1 (!%p139_p2), %v1888_v1 }
   0xd   : > { %s2156_s16 = smov (!%p163_p3, %s1381_s16), 255 }
   0xe   : > { %s1382_s19 = sshll.u32 %s2156_s16, 2 }
   0xf   : > { %s1971_s22 = scalar_lea.vmem %s2151_s0, %s1382_s19  ;;  %s2055_s27 = scalar_lea.vmem %s2154_s3, %s1382_s19 }
  0x10   : > { %v1889_v2 = vld [vmem:[%s1971_s22] sm:$0xff]   ;;  %v1891_v4 = vld [vmem:[%s1971_s22 + $0x8] sm:$0xff]   ;;  %v1893_v6 = vld [vmem:[%s1971_s22 + $0x10] sm:$0xff]  }
  0x11   : > { %v1890_v3 = vld [vmem:[%s1971_s22 + $0x80] sm:$0xff]   ;;  %1811 = vmatprep.mubr.msk.bf16.mxu0 %vm422_vm0, %v1889_v2  ;;  %v1892_v5 = vld [vmem:[%s1971_s22 + $0x88] sm:$0xff]   ;;  %v1894_v7 = vld [vmem:[%s1971_s22 + $0x90] sm:$0xff]  }
  0x12   : > { %1843 = vmatprep.mubr.msk.bf16.mxu1 %vm422_vm0, %v1890_v3  ;;  %1812 = vmatmul.mubr.msk.bf16.vlgmr.msra.gmra.mrb[0].mxu0 %vm422_vm0, %v1891_v4  ;;  %v1895_v8 = vld [vmem:[%s1971_s22 + $0x18] sm:$0xff]   ;;  %v1897_v10 = vld [vmem:[%s1971_s22 + $0x20] sm:$0xff]   ;;  %v1899_v12 = vld [vmem:[%s1971_s22 + $0x28] sm:$0xff]  }
  0x13   : > { %1844 = vmatmul.mubr.msk.bf16.vlgmr.msra.gmra.mrb[0].mxu1 %vm422_vm0, %v1892_v5  ;;  %1815 = vmatprep.mubr.msk.bf16.mxu0 %vm422_vm0, %v1893_v6  ;;  %v1896_v9 = vld [vmem:[%s1971_s22 + $0x98] sm:$0xff]   ;;  %v1898_v11 = vld [vmem:[%s1971_s22 + $0xa0] sm:$0xff]   ;;  %v1900_v13 = vld [vmem:[%s1971_s22 + $0xa8] sm:$0xff]  }
  0x14   : > { %1847 = vmatprep.mubr.msk.bf16.mxu1 %vm422_vm0, %v1894_v7  ;;  %v1901_v14 = vld [vmem:[%s1971_s22 + $0x30] sm:$0xff]   ;;  %v1903_v16 = vld [vmem:[%s1971_s22 + $0x38] sm:$0xff]   ;;  %v1905_v18 = vld [vmem:[%s1971_s22 + $0x40] sm:$0xff]  }
  0x15   : > { %v1902_v15 = vld [vmem:[%s1971_s22 + $0xb0] sm:$0xff]   ;;  %v1904_v17 = vld [vmem:[%s1971_s22 + $0xb8] sm:$0xff]   ;;  %v1906_v19 = vld [vmem:[%s1971_s22 + $0xc0] sm:$0xff]  }
  0x16   : > { %v1907_v20 = vld [vmem:[%s1971_s22 + $0x48] sm:$0xff]   ;;  %v1909_v22 = vld [vmem:[%s1971_s22 + $0x50] sm:$0xff]   ;;  %v1911_v24 = vld [vmem:[%s1971_s22 + $0x58] sm:$0xff]  }
  0x17   : > { %v1908_v21 = vld [vmem:[%s1971_s22 + $0xc8] sm:$0xff]   ;;  %v1910_v23 = vld [vmem:[%s1971_s22 + $0xd0] sm:$0xff]   ;;  %v1912_v25 = vld [vmem:[%s1971_s22 + $0xd8] sm:$0xff]  }
  0x18   : > { %v1913_v26 = vld [vmem:[%s1971_s22 + $0x60] sm:$0xff]   ;;  %v1915_v28 = vld [vmem:[%s1971_s22 + $0x68] sm:$0xff]   ;;  %v1917_v30 = vld [vmem:[%s1971_s22 + $0x70] sm:$0xff]  }
  0x19   : > { %v1914_v27 = vld [vmem:[%s1971_s22 + $0xe0] sm:$0xff]   ;;  %v1916_v29 = vld [vmem:[%s1971_s22 + $0xe8] sm:$0xff]   ;;  %v1918_v31 = vld [vmem:[%s1971_s22 + $0xf0] sm:$0xff]  }
  0x1a   : > { %1816 = vmatmul.mubr.msk.bf16.gmra.mrb[4].mxu0 %vm422_vm0, %v1895_v8  ;;  %v1919_v32 = vld [vmem:[%s1971_s22 + $0x78] sm:$0xff]  }
  0x1b   : > { %1848 = vmatmul.mubr.msk.bf16.gmra.mrb[4].mxu1 %vm422_vm0, %v1896_v9  ;;  %1819 = vmatprep.mubr.msk.bf16.mxu0 %vm422_vm0, %v1897_v10  ;;  %v1920_v33 = vld [vmem:[%s1971_s22 + $0xf8] sm:$0xff]  }
  0x1c   : > { %1851 = vmatprep.mubr.msk.bf16.mxu1 %vm422_vm0, %v1898_v11 }
  0x22   : > { %1820 = vmatmul.mubr.msk.bf16.gmra.mrb[8].mxu0 %vm422_vm0, %v1899_v12 }
  0x23   : > { %1852 = vmatmul.mubr.msk.bf16.gmra.mrb[8].mxu1 %vm422_vm0, %v1900_v13  ;;  %1823 = vmatprep.mubr.msk.bf16.mxu0 %vm422_vm0, %v1901_v14 }
  0x24   : > { %1855 = vmatprep.mubr.msk.bf16.mxu1 %vm422_vm0, %v1902_v15 }
  0x2a   : > { %1824 = vmatmul.mubr.msk.bf16.gmra.mrb[12].mxu0 %vm422_vm0, %v1903_v16 }
  0x2b   : > { %1856 = vmatmul.mubr.msk.bf16.gmra.mrb[12].mxu1 %vm422_vm0, %v1904_v17  ;;  %1827 = vmatprep.mubr.msk.bf16.mxu0 %vm422_vm0, %v1905_v18 }
  0x2c   : > { %1859 = vmatprep.mubr.msk.bf16.mxu1 %vm422_vm0, %v1906_v19 }
  0x32   : > { %1828 = vmatmul.mubr.msk.bf16.gmra.mrb[16].mxu0 %vm422_vm0, %v1907_v20 }
  0x33   : > { %1860 = vmatmul.mubr.msk.bf16.gmra.mrb[16].mxu1 %vm422_vm0, %v1908_v21  ;;  %1831 = vmatprep.mubr.msk.bf16.mxu0 %vm422_vm0, %v1909_v22 }
  0x34   : > { %1863 = vmatprep.mubr.msk.bf16.mxu1 %vm422_vm0, %v1910_v23 }
  0x3a   : > { %1832 = vmatmul.mubr.msk.bf16.gmra.mrb[20].mxu0 %vm422_vm0, %v1911_v24 }
  0x3b   : > { %1864 = vmatmul.mubr.msk.bf16.gmra.mrb[20].mxu1 %vm422_vm0, %v1912_v25  ;;  %1835 = vmatprep.mubr.msk.bf16.mxu0 %vm422_vm0, %v1913_v26 }
  0x3c   : > { %1867 = vmatprep.mubr.msk.bf16.mxu1 %vm422_vm0, %v1914_v27 }
  0x42   : > { %1836 = vmatmul.mubr.msk.bf16.gmra.mrb[24].mxu0 %vm422_vm0, %v1915_v28 }
  0x43   : > { %1868 = vmatmul.mubr.msk.bf16.gmra.mrb[24].mxu1 %vm422_vm0, %v1916_v29  ;;  %1839 = vmatprep.mubr.msk.bf16.mxu0 %vm422_vm0, %v1917_v30 }
  0x44   : > { %1871 = vmatprep.mubr.msk.bf16.mxu1 %vm422_vm0, %v1918_v31 }
  0x4a   : > { %1840 = vmatmul.mubr.msk.bf16.gmra.mrb[28].mxu0 %vm422_vm0, %v1919_v32 }
  0x4b   : > { %1872 = vmatmul.mubr.msk.bf16.gmra.mrb[28].mxu1 %vm422_vm0, %v1920_v33 }
  0xe5   : > { %v1813_v35 = vpop.f32.mrb[0].mxu0 }
  0xe6   : > { %v562_v36 = vadd.f32 %v1813_v35, %v2040_v34  ;;  %v1845_v37 = vpop.f32.mrb[0].mxu1  ;;  %v553_v38 = vpop.f32.mrb[1].mxu0 }
  0xe7   : > { %v690_v39 = vadd.f32 %v1845_v37, %v2040_v34  ;;  %v554_v40 = vadd.f32 %v2040_v34, %v553_v38  ;;  %v681_v41 = vpop.f32.mrb[1].mxu1  ;;  %v1814_v42 = vpop.f32.mrb[2].mxu0 }
  0xe8   : > { %vm810_vm1 = vcmp.gt.f32.partialorder %v562_v36, 0.0  ;;  %v874_v43 = vmul.f32 0.1, %v562_v36  ;;  %v682_v44 = vadd.f32 %v2040_v34, %v681_v41  ;;  %v565_v45 = vadd.f32 %v1814_v42, %v2040_v34  ;;  %v1846_v46 = vpop.f32.mrb[2].mxu1  ;;  %v556_v47 = vpop.f32.mrb[3].mxu0 }
  0xe9   : > { %vm842_vm2 = vcmp.gt.f32.partialorder %v690_v39, 0.0  ;;  %v906_v48 = vmul.f32 0.1, %v690_v39  ;;  %vm808_vm3 = vcmp.gt.f32.partialorder %v554_v40, 0.0  ;;  %v872_v49 = vmul.f32 0.1, %v554_v40 }
  0xea   : > { %vm840_vm4 = vcmp.gt.f32.partialorder %v682_v44, 0.0  ;;  %v904_v50 = vmul.f32 0.1, %v682_v44  ;;  %vm811_vm5 = vcmp.gt.f32.partialorder %v565_v45, 0.0  ;;  %v684_v51 = vpop.f32.mrb[3].mxu1  ;;  %v938_v52 = vsel %vm810_vm1, %v562_v36, %v874_v43 }
  0xeb   : > { %v875_v53 = vmul.f32 0.1, %v565_v45  ;;  %v693_v54 = vadd.f32 %v1846_v46, %v2040_v34  ;;  %v970_v55 = vsel %vm842_vm2, %v690_v39, %v906_v48  ;;  %v936_v56 = vsel %vm808_vm3, %v554_v40, %v872_v49 }
  0xec   : > { %v557_v57 = vadd.f32 %v2040_v34, %v556_v47  ;;  %v685_v58 = vadd.f32 %v2040_v34, %v684_v51  ;;  %v968_v59 = vsel %vm840_vm4, %v682_v44, %v904_v50 }
  0xed   : > { %v939_v60 = vsel %vm811_vm5, %v565_v45, %v875_v53  ;;  %vm843_vm6 = vcmp.gt.f32.partialorder %v693_v54, 0.0  ;;  %v907_v61 = vmul.f32 0.1, %v693_v54  ;;  %v1817_v62 = vpop.f32.mrb[4].mxu0 }
  0xee   : > { %v1590_v63 = vpack.c.bf16 %v939_v60, %v938_v52  ;;  %vm809_vm7 = vcmp.gt.f32.partialorder %v557_v57, 0.0  ;;  %v873_v0 = vmul.f32 0.1, %v557_v57  ;;  %vm841_vm8 = vcmp.gt.f32.partialorder %v685_v58, 0.0  ;;  %v1849_v1 = vpop.f32.mrb[4].mxu1  ;;  %v569_v2 = vpop.f32.mrb[5].mxu0 }
  0xef   : > { %v971_v3 = vsel %vm843_vm6, %v693_v54, %v907_v61  ;;  %v905_v4 = vmul.f32 0.1, %v685_v58  ;;  %v578_v5 = vadd.f32 %v1817_v62, %v2040_v34  ;;  %v706_v6 = vadd.f32 %v1849_v1, %v2040_v34  ;;  %v697_v7 = vpop.f32.mrb[5].mxu1  ;;  %v1818_v8 = vpop.f32.mrb[6].mxu0 }
  0xf0   : > { %1742 = vst [vmem:[%s2055_s27 + $0x8] sm:$0xff] %v1590_v63   ;;  %v1670_v9 = vpack.c.bf16 %v971_v3, %v970_v55  ;;  %v937_v10 = vsel %vm809_vm7, %v557_v57, %v873_v0  ;;  %v570_v11 = vadd.f32 %v2040_v34, %v569_v2  ;;  %v698_v12 = vadd.f32 %v2040_v34, %v697_v7  ;;  %v1850_v13 = vpop.f32.mrb[6].mxu1  ;;  %v572_v14 = vpop.f32.mrb[7].mxu0 }
  0xf1   : > { %v1585_v15 = vpack.c.bf16 %v937_v10, %v936_v56  ;;  %v969_v16 = vsel %vm841_vm8, %v685_v58, %v905_v4  ;;  %vm814_vm9 = vcmp.gt.f32.partialorder %v578_v5, 0.0  ;;  %v878_v17 = vmul.f32 0.1, %v578_v5  ;;  %v700_v18 = vpop.f32.mrb[7].mxu1 }
  0xf2   : > { %1758 = vst [vmem:[%s2055_s27 + $0x88] sm:$0xff] %v1670_v9   ;;  %v1665_v19 = vpack.c.bf16 %v969_v16, %v968_v59  ;;  %vm846_vm10 = vcmp.gt.f32.partialorder %v706_v6, 0.0  ;;  %v910_v20 = vmul.f32 0.1, %v706_v6  ;;  %vm812_vm11 = vcmp.gt.f32.partialorder %v570_v11, 0.0 }
  0xf3   : > { %1586 = vst [vmem:[%s2055_s27] sm:$0xff] %v1585_v15   ;;  %v942_v21 = vsel %vm814_vm9, %v578_v5, %v878_v17  ;;  %v876_v22 = vmul.f32 0.1, %v570_v11  ;;  %v908_v23 = vmul.f32 0.1, %v698_v12  ;;  %v581_v24 = vadd.f32 %v1818_v8, %v2040_v34 }
  0xf4   : > { %1757 = vst [vmem:[%s2055_s27 + $0x80] sm:$0xff] %v1665_v19   ;;  %v709_v25 = vadd.f32 %v1850_v13, %v2040_v34  ;;  %v573_v26 = vadd.f32 %v2040_v34, %v572_v14  ;;  %v974_v27 = vsel %vm846_vm10, %v706_v6, %v910_v20  ;;  %vm844_vm12 = vcmp.gt.f32.partialorder %v698_v12, 0.0 }
  0xf5   : > { %v940_v28 = vsel %vm812_vm11, %v570_v11, %v876_v22  ;;  %v701_v29 = vadd.f32 %v2040_v34, %v700_v18  ;;  %v1821_v30 = vpop.f32.mrb[8].mxu0  ;;  %vm815_vm13 = vcmp.gt.f32.partialorder %v581_v24, 0.0  ;;  %v879_v31 = vmul.f32 0.1, %v581_v24 }
  0xf6   : > { %vm847_vm14 = vcmp.gt.f32.partialorder %v709_v25, 0.0  ;;  %v911_v32 = vmul.f32 0.1, %v709_v25  ;;  %vm813_vm15 = vcmp.gt.f32.partialorder %v573_v26, 0.0  ;;  %v877_v33 = vmul.f32 0.1, %v573_v26 }
  0xf7   : > { %vm845_vm0 = vcmp.gt.f32.partialorder %v701_v29, 0.0  ;;  %v909_v35 = vmul.f32 0.1, %v701_v29  ;;  %v972_v36 = vsel %vm844_vm12, %v698_v12, %v908_v23  ;;  %v943_v37 = vsel %vm815_vm13, %v581_v24, %v879_v31  ;;  %v1853_v40 = vpop.f32.mrb[8].mxu1  ;;  %v585_v41 = vpop.f32.mrb[9].mxu0 }
  0xf8   : > { %v975_v38 = vsel %vm847_vm14, %v709_v25, %v911_v32  ;;  %v594_v39 = vadd.f32 %v1821_v30, %v2040_v34  ;;  %v1600_v42 = vpack.c.bf16 %v943_v37, %v942_v21  ;;  %v941_v44 = vsel %vm813_vm15, %v573_v26, %v877_v33  ;;  %v713_v46 = vpop.f32.mrb[9].mxu1  ;;  %v1822_v47 = vpop.f32.mrb[10].mxu0 }
  0xf9   : > { %v1680_v43 = vpack.c.bf16 %v975_v38, %v974_v27  ;;  %v973_v45 = vsel %vm845_vm0, %v701_v29, %v909_v35  ;;  %v1595_v48 = vpack.c.bf16 %v941_v44, %v940_v28  ;;  %v1854_v51 = vpop.f32.mrb[10].mxu1  ;;  %v588_v52 = vpop.f32.mrb[11].mxu0  ;;  %v722_v53 = vadd.f32 %v1853_v40, %v2040_v34 }
  0xfa   : > { %v1675_v49 = vpack.c.bf16 %v973_v45, %v972_v36  ;;  %vm818_vm1 = vcmp.gt.f32.partialorder %v594_v39, 0.0  ;;  %v882_v50 = vmul.f32 0.1, %v594_v39  ;;  %1744 = vst [vmem:[%s2055_s27 + $0x18] sm:$0xff] %v1600_v42   ;;  %v586_v54 = vadd.f32 %v2040_v34, %v585_v41  ;;  %v716_v57 = vpop.f32.mrb[11].mxu1 }
  0xfb   : > { %1760 = vst [vmem:[%s2055_s27 + $0x98] sm:$0xff] %v1680_v43   ;;  %v714_v55 = vadd.f32 %v2040_v34, %v713_v46  ;;  %v597_v56 = vadd.f32 %v1822_v47, %v2040_v34  ;;  %1743 = vst [vmem:[%s2055_s27 + $0x10] sm:$0xff] %v1595_v48   ;;  %v725_v59 = vadd.f32 %v1854_v51, %v2040_v34  ;;  %vm850_vm2 = vcmp.gt.f32.partialorder %v722_v53, 0.0 }
  0xfc   : > { %1759 = vst [vmem:[%s2055_s27 + $0x90] sm:$0xff] %v1675_v49   ;;  %v946_v58 = vsel %vm818_vm1, %v594_v39, %v882_v50  ;;  %v589_v60 = vadd.f32 %v2040_v34, %v588_v52  ;;  %v717_v61 = vadd.f32 %v2040_v34, %v716_v57  ;;  %v914_v62 = vmul.f32 0.1, %v722_v53 }
  0xfd   : > { %vm816_vm3 = vcmp.gt.f32.partialorder %v586_v54, 0.0  ;;  %v880_v63 = vmul.f32 0.1, %v586_v54  ;;  %vm848_vm4 = vcmp.gt.f32.partialorder %v714_v55, 0.0  ;;  %v912_v0 = vmul.f32 0.1, %v714_v55 }
  0xfe   : > { %vm819_vm5 = vcmp.gt.f32.partialorder %v597_v56, 0.0  ;;  %v883_v1 = vmul.f32 0.1, %v597_v56  ;;  %v978_v2 = vsel %vm850_vm2, %v722_v53, %v914_v62  ;;  %vm851_vm6 = vcmp.gt.f32.partialorder %v725_v59, 0.0  ;;  %v1825_v5 = vpop.f32.mrb[12].mxu0  ;;  %v1857_v6 = vpop.f32.mrb[12].mxu1 }
  0xff   : > { %v944_v3 = vsel %vm816_vm3, %v586_v54, %v880_v63  ;;  %v915_v4 = vmul.f32 0.1, %v725_v59  ;;  %v976_v7 = vsel %vm848_vm4, %v714_v55, %v912_v0  ;;  %vm817_vm7 = vcmp.gt.f32.partialorder %v589_v60, 0.0  ;;  %v601_v10 = vpop.f32.mrb[13].mxu0  ;;  %v729_v11 = vpop.f32.mrb[13].mxu1 }
 0x100   : > { %v947_v8 = vsel %vm819_vm5, %v597_v56, %v883_v1  ;;  %v881_v9 = vmul.f32 0.1, %v589_v60  ;;  %vm849_vm8 = vcmp.gt.f32.partialorder %v717_v61, 0.0  ;;  %v913_v14 = vmul.f32 0.1, %v717_v61  ;;  %v1826_v15 = vpop.f32.mrb[14].mxu0 }
 0x101   : > { %v1610_v12 = vpack.c.bf16 %v947_v8, %v946_v58  ;;  %v979_v13 = vsel %vm851_vm6, %v725_v59, %v915_v4  ;;  %v1858_v16 = vpop.f32.mrb[14].mxu1  ;;  %v610_v19 = vadd.f32 %v1825_v5, %v2040_v34  ;;  %v738_v20 = vadd.f32 %v1857_v6, %v2040_v34  ;;  %v604_v21 = vpop.f32.mrb[15].mxu0 }
 0x102   : > { %v1690_v17 = vpack.c.bf16 %v979_v13, %v978_v2  ;;  %v945_v18 = vsel %vm817_vm7, %v589_v60, %v881_v9  ;;  %v732_v22 = vpop.f32.mrb[15].mxu1  ;;  %v977_v24 = vsel %vm849_vm8, %v717_v61, %v913_v14  ;;  %v602_v25 = vadd.f32 %v2040_v34, %v601_v10 }
 0x103   : > { %1746 = vst [vmem:[%s2055_s27 + $0x28] sm:$0xff] %v1610_v12   ;;  %v1605_v23 = vpack.c.bf16 %v945_v18, %v944_v3  ;;  %v730_v26 = vadd.f32 %v2040_v34, %v729_v11  ;;  %v1685_v27 = vpack.c.bf16 %v977_v24, %v976_v7  ;;  %vm822_vm9 = vcmp.gt.f32.partialorder %v610_v19, 0.0 }
 0x104   : > { %1762 = vst [vmem:[%s2055_s27 + $0xa8] sm:$0xff] %v1690_v17   ;;  %v886_v28 = vmul.f32 0.1, %v610_v19  ;;  %vm854_vm10 = vcmp.gt.f32.partialorder %v738_v20, 0.0  ;;  %v918_v29 = vmul.f32 0.1, %v738_v20  ;;  %v613_v33 = vadd.f32 %v1826_v15, %v2040_v34 }
 0x105   : > { %1745 = vst [vmem:[%s2055_s27 + $0x20] sm:$0xff] %v1605_v23   ;;  %vm820_vm11 = vcmp.gt.f32.partialorder %v602_v25, 0.0  ;;  %v884_v30 = vmul.f32 0.1, %v602_v25  ;;  %vm852_vm12 = vcmp.gt.f32.partialorder %v730_v26, 0.0  ;;  %1761 = vst [vmem:[%s2055_s27 + $0xa0] sm:$0xff] %v1685_v27   ;;  %v741_v35 = vadd.f32 %v1858_v16, %v2040_v34 }
 0x106   : > { %v950_v31 = vsel %vm822_vm9, %v610_v19, %v886_v28  ;;  %v916_v32 = vmul.f32 0.1, %v730_v26  ;;  %v1829_v36 = vpop.f32.mrb[16].mxu0  ;;  %v1861_v37 = vpop.f32.mrb[16].mxu1  ;;  %v982_v38 = vsel %vm854_vm10, %v738_v20, %v918_v29  ;;  %v605_v40 = vadd.f32 %v2040_v34, %v604_v21 }
 0x107   : > { %v948_v39 = vsel %vm820_vm11, %v602_v25, %v884_v30  ;;  %v733_v41 = vadd.f32 %v2040_v34, %v732_v22  ;;  %v617_v42 = vpop.f32.mrb[17].mxu0  ;;  %v745_v43 = vpop.f32.mrb[17].mxu1  ;;  %vm823_vm13 = vcmp.gt.f32.partialorder %v613_v33, 0.0  ;;  %v887_v45 = vmul.f32 0.1, %v613_v33 }
 0x108   : > { %v980_v44 = vsel %vm852_vm12, %v730_v26, %v916_v32  ;;  %vm855_vm14 = vcmp.gt.f32.partialorder %v741_v35, 0.0  ;;  %v1830_v46 = vpop.f32.mrb[18].mxu0  ;;  %v1862_v47 = vpop.f32.mrb[18].mxu1  ;;  %v919_v48 = vmul.f32 0.1, %v741_v35  ;;  %vm821_vm15 = vcmp.gt.f32.partialorder %v605_v40, 0.0 }
 0x109   : > { %v885_v49 = vmul.f32 0.1, %v605_v40  ;;  %vm853_vm0 = vcmp.gt.f32.partialorder %v733_v41, 0.0  ;;  %v951_v50 = vsel %vm823_vm13, %v613_v33, %v887_v45  ;;  %v917_v51 = vmul.f32 0.1, %v733_v41  ;;  %v620_v54 = vpop.f32.mrb[19].mxu0 }
 0x10a   : > { %v626_v52 = vadd.f32 %v1829_v36, %v2040_v34  ;;  %v754_v53 = vadd.f32 %v1861_v37, %v2040_v34  ;;  %v748_v55 = vpop.f32.mrb[19].mxu1  ;;  %v1620_v56 = vpack.c.bf16 %v951_v50, %v950_v31  ;;  %v983_v57 = vsel %vm855_vm14, %v741_v35, %v919_v48 }
 0x10b   : > { %v949_v58 = vsel %vm821_vm15, %v605_v40, %v885_v49  ;;  %v618_v59 = vadd.f32 %v2040_v34, %v617_v42  ;;  %v1700_v60 = vpack.c.bf16 %v983_v57, %v982_v38  ;;  %v981_v62 = vsel %vm853_vm0, %v733_v41, %v917_v51 }
 0x10c   : > { %v1615_v61 = vpack.c.bf16 %v949_v58, %v948_v39  ;;  %vm826_vm1 = vcmp.gt.f32.partialorder %v626_v52, 0.0  ;;  %1748 = vst [vmem:[%s2055_s27 + $0x38] sm:$0xff] %v1620_v56   ;;  %v1695_v63 = vpack.c.bf16 %v981_v62, %v980_v44  ;;  %v890_v0 = vmul.f32 0.1, %v626_v52 }
 0x10d   : > { %vm858_vm2 = vcmp.gt.f32.partialorder %v754_v53, 0.0  ;;  %v922_v1 = vmul.f32 0.1, %v754_v53  ;;  %v1833_v2 = vpop.f32.mrb[20].mxu0  ;;  %1764 = vst [vmem:[%s2055_s27 + $0xb8] sm:$0xff] %v1700_v60   ;;  %vm824_vm3 = vcmp.gt.f32.partialorder %v618_v59, 0.0  ;;  %v746_v4 = vadd.f32 %v2040_v34, %v745_v43 }
 0x10e   : > { %1747 = vst [vmem:[%s2055_s27 + $0x30] sm:$0xff] %v1615_v61   ;;  %v888_v3 = vmul.f32 0.1, %v618_v59  ;;  %v629_v5 = vadd.f32 %v1830_v46, %v2040_v34  ;;  %v1865_v6 = vpop.f32.mrb[20].mxu1  ;;  %v633_v7 = vpop.f32.mrb[21].mxu0  ;;  %1763 = vst [vmem:[%s2055_s27 + $0xb0] sm:$0xff] %v1695_v63   ;;  %v954_v8 = vsel %vm826_vm1, %v626_v52, %v890_v0  ;;  %v757_v10 = vadd.f32 %v1862_v47, %v2040_v34 }
 0x10f   : > { %v986_v9 = vsel %vm858_vm2, %v754_v53, %v922_v1  ;;  %v621_v11 = vadd.f32 %v2040_v34, %v620_v54  ;;  %v761_v12 = vpop.f32.mrb[21].mxu1  ;;  %v1834_v13 = vpop.f32.mrb[22].mxu0  ;;  %vm856_vm4 = vcmp.gt.f32.partialorder %v746_v4, 0.0  ;;  %v920_v15 = vmul.f32 0.1, %v746_v4 }
 0x110   : > { %v952_v14 = vsel %vm824_vm3, %v618_v59, %v888_v3  ;;  %vm827_vm5 = vcmp.gt.f32.partialorder %v629_v5, 0.0  ;;  %v1866_v16 = vpop.f32.mrb[22].mxu1  ;;  %v636_v17 = vpop.f32.mrb[23].mxu0  ;;  %v891_v18 = vmul.f32 0.1, %v629_v5  ;;  %vm859_vm6 = vcmp.gt.f32.partialorder %v757_v10, 0.0 }
 0x111   : > { %v923_v19 = vmul.f32 0.1, %v757_v10  ;;  %vm825_vm7 = vcmp.gt.f32.partialorder %v621_v11, 0.0  ;;  %v984_v20 = vsel %vm856_vm4, %v746_v4, %v920_v15  ;;  %v889_v21 = vmul.f32 0.1, %v621_v11  ;;  %v764_v24 = vpop.f32.mrb[23].mxu1 }
 0x112   : > { %v749_v22 = vadd.f32 %v2040_v34, %v748_v55  ;;  %v642_v23 = vadd.f32 %v1833_v2, %v2040_v34  ;;  %v955_v25 = vsel %vm827_vm5, %v629_v5, %v891_v18  ;;  %v770_v27 = vadd.f32 %v1865_v6, %v2040_v34 }
 0x113   : > { %v987_v26 = vsel %vm859_vm6, %v757_v10, %v923_v19  ;;  %v634_v28 = vadd.f32 %v2040_v34, %v633_v7  ;;  %v1630_v29 = vpack.c.bf16 %v955_v25, %v954_v8  ;;  %v953_v31 = vsel %vm825_vm7, %v621_v11, %v889_v21 }
 0x114   : > { %v1710_v30 = vpack.c.bf16 %v987_v26, %v986_v9  ;;  %vm857_vm8 = vcmp.gt.f32.partialorder %v749_v22, 0.0  ;;  %v1625_v32 = vpack.c.bf16 %v953_v31, %v952_v14  ;;  %v921_v33 = vmul.f32 0.1, %v749_v22 }
 0x115   : > { %vm830_vm9 = vcmp.gt.f32.partialorder %v642_v23, 0.0  ;;  %v894_v35 = vmul.f32 0.1, %v642_v23  ;;  %v1837_v36 = vpop.f32.mrb[24].mxu0  ;;  %1750 = vst [vmem:[%s2055_s27 + $0x48] sm:$0xff] %v1630_v29   ;;  %vm862_vm10 = vcmp.gt.f32.partialorder %v770_v27, 0.0  ;;  %v762_v41 = vadd.f32 %v2040_v34, %v761_v12 }
 0x116   : > { %1766 = vst [vmem:[%s2055_s27 + $0xc8] sm:$0xff] %v1710_v30   ;;  %v926_v37 = vmul.f32 0.1, %v770_v27  ;;  %vm828_vm11 = vcmp.gt.f32.partialorder %v634_v28, 0.0  ;;  %v892_v38 = vmul.f32 0.1, %v634_v28  ;;  %v985_v39 = vsel %vm857_vm8, %v749_v22, %v921_v33 }
 0x117   : > { %1749 = vst [vmem:[%s2055_s27 + $0x40] sm:$0xff] %v1625_v32   ;;  %v958_v40 = vsel %vm830_vm9, %v642_v23, %v894_v35  ;;  %v645_v42 = vadd.f32 %v1834_v13, %v2040_v34  ;;  %v1869_v43 = vpop.f32.mrb[24].mxu1  ;;  %v649_v44 = vpop.f32.mrb[25].mxu0  ;;  %v1705_v45 = vpack.c.bf16 %v985_v39, %v984_v20  ;;  %v773_v48 = vadd.f32 %v1866_v16, %v2040_v34 }
 0x118   : > { %v990_v46 = vsel %vm862_vm10, %v770_v27, %v926_v37  ;;  %v956_v47 = vsel %vm828_vm11, %v634_v28, %v892_v38  ;;  %v777_v49 = vpop.f32.mrb[25].mxu1  ;;  %v1838_v50 = vpop.f32.mrb[26].mxu0  ;;  %vm860_vm12 = vcmp.gt.f32.partialorder %v762_v41, 0.0  ;;  %v924_v51 = vmul.f32 0.1, %v762_v41 }
 0x119   : > { %vm831_vm13 = vcmp.gt.f32.partialorder %v645_v42, 0.0  ;;  %v895_v52 = vmul.f32 0.1, %v645_v42  ;;  %1765 = vst [vmem:[%s2055_s27 + $0xc0] sm:$0xff] %v1705_v45   ;;  %vm863_vm14 = vcmp.gt.f32.partialorder %v773_v48, 0.0  ;;  %v637_v54 = vadd.f32 %v2040_v34, %v636_v17  ;;  %v1870_v56 = vpop.f32.mrb[26].mxu1 }
 0x11a   : > { %v927_v53 = vmul.f32 0.1, %v773_v48  ;;  %v765_v55 = vadd.f32 %v2040_v34, %v764_v24  ;;  %v652_v57 = vpop.f32.mrb[27].mxu0  ;;  %v988_v58 = vsel %vm860_vm12, %v762_v41, %v924_v51  ;;  %v658_v60 = vadd.f32 %v1837_v36, %v2040_v34  ;;  %v780_v62 = vpop.f32.mrb[27].mxu1 }
 0x11b   : > { %v959_v59 = vsel %vm831_vm13, %v645_v42, %v895_v52  ;;  %v786_v61 = vadd.f32 %v1869_v43, %v2040_v34  ;;  %vm829_vm15 = vcmp.gt.f32.partialorder %v637_v54, 0.0  ;;  %v893_v1 = vmul.f32 0.1, %v637_v54 }
 0x11c   : > { %v1640_v63 = vpack.c.bf16 %v959_v59, %v958_v40  ;;  %v991_v0 = vsel %vm863_vm14, %v773_v48, %v927_v53  ;;  %vm861_vm0 = vcmp.gt.f32.partialorder %v765_v55, 0.0  ;;  %v925_v3 = vmul.f32 0.1, %v765_v55 }
 0x11d   : > { %v1720_v2 = vpack.c.bf16 %v991_v0, %v990_v46  ;;  %vm834_vm1 = vcmp.gt.f32.partialorder %v658_v60, 0.0  ;;  %v1841_v4 = vpop.f32.mrb[28].mxu0  ;;  %v957_v5 = vsel %vm829_vm15, %v637_v54, %v893_v1  ;;  %v898_v6 = vmul.f32 0.1, %v658_v60 }
 0x11e   : > { %1752 = vst [vmem:[%s2055_s27 + $0x58] sm:$0xff] %v1640_v63   ;;  %vm866_vm2 = vcmp.gt.f32.partialorder %v786_v61, 0.0  ;;  %v930_v7 = vmul.f32 0.1, %v786_v61  ;;  %v1873_v8 = vpop.f32.mrb[28].mxu1  ;;  %v1635_v9 = vpack.c.bf16 %v957_v5, %v956_v47  ;;  %v989_v10 = vsel %vm861_vm0, %v765_v55, %v925_v3  ;;  %v665_v13 = vpop.f32.mrb[29].mxu0 }
 0x11f   : > { %1768 = vst [vmem:[%s2055_s27 + $0xd8] sm:$0xff] %v1720_v2   ;;  %v650_v11 = vadd.f32 %v2040_v34, %v649_v44  ;;  %v778_v12 = vadd.f32 %v2040_v34, %v777_v49  ;;  %v793_v14 = vpop.f32.mrb[29].mxu1  ;;  %v1715_v15 = vpack.c.bf16 %v989_v10, %v988_v58  ;;  %v962_v16 = vsel %vm834_vm1, %v658_v60, %v898_v6  ;;  %v1842_v19 = vpop.f32.mrb[30].mxu0 }
 0x120   : > { %v994_v17 = vsel %vm866_vm2, %v786_v61, %v930_v7  ;;  %v661_v18 = vadd.f32 %v1838_v50, %v2040_v34  ;;  %v1874_v20 = vpop.f32.mrb[30].mxu1  ;;  %1751 = vst [vmem:[%s2055_s27 + $0x50] sm:$0xff] %v1635_v9   ;;  %v789_v24 = vadd.f32 %v1870_v56, %v2040_v34  ;;  %v653_v25 = vadd.f32 %v2040_v34, %v652_v57  ;;  %v668_v26 = vpop.f32.mrb[31].mxu0 }
 0x121   : > { %vm832_vm3 = vcmp.gt.f32.partialorder %v650_v11, 0.0  ;;  %v896_v21 = vmul.f32 0.1, %v650_v11  ;;  %vm864_vm4 = vcmp.gt.f32.partialorder %v778_v12, 0.0  ;;  %v928_v22 = vmul.f32 0.1, %v778_v12 }
 0x122   : > { %1767 = vst [vmem:[%s2055_s27 + $0xd0] sm:$0xff] %v1715_v15   ;;  %vm835_vm5 = vcmp.gt.f32.partialorder %v661_v18, 0.0  ;;  %v899_v23 = vmul.f32 0.1, %v661_v18  ;;  %v796_v27 = vpop.f32.mrb[31].mxu1  ;;  %v781_v30 = vadd.f32 %v2040_v34, %v780_v62  ;;  %v674_v31 = vadd.f32 %v1841_v4, %v2040_v34 }
 0x123   : > { %v960_v28 = vsel %vm832_vm3, %v650_v11, %v896_v21  ;;  %v992_v29 = vsel %vm864_vm4, %v778_v12, %v928_v22  ;;  %vm867_vm6 = vcmp.gt.f32.partialorder %v789_v24, 0.0  ;;  %v931_v33 = vmul.f32 0.1, %v789_v24 }
 0x124   : > { %v963_v32 = vsel %vm835_vm5, %v661_v18, %v899_v23  ;;  %vm833_vm7 = vcmp.gt.f32.partialorder %v653_v25, 0.0  ;;  %v897_v36 = vmul.f32 0.1, %v653_v25  ;;  %vm865_vm8 = vcmp.gt.f32.partialorder %v781_v30, 0.0 }
 0x125   : > { %v1650_v35 = vpack.c.bf16 %v963_v32, %v962_v16  ;;  %v929_v37 = vmul.f32 0.1, %v781_v30  ;;  %v995_v38 = vsel %vm867_vm6, %v789_v24, %v931_v33  ;;  %vm838_vm9 = vcmp.gt.f32.partialorder %v674_v31, 0.0 }
 0x126   : > { %v902_v39 = vmul.f32 0.1, %v674_v31  ;;  %v802_v40 = vadd.f32 %v1873_v8, %v2040_v34  ;;  %v1730_v41 = vpack.c.bf16 %v995_v38, %v994_v17  ;;  %v961_v42 = vsel %vm833_vm7, %v653_v25, %v897_v36 }
 0x127   : > { %1754 = vst [vmem:[%s2055_s27 + $0x68] sm:$0xff] %v1650_v35   ;;  %v993_v43 = vsel %vm865_vm8, %v781_v30, %v929_v37  ;;  %v666_v44 = vadd.f32 %v2040_v34, %v665_v13  ;;  %v1645_v45 = vpack.c.bf16 %v961_v42, %v960_v28  ;;  %v794_v49 = vadd.f32 %v2040_v34, %v793_v14 }
 0x128   : > { %v1725_v46 = vpack.c.bf16 %v993_v43, %v992_v29  ;;  %1770 = vst [vmem:[%s2055_s27 + $0xe8] sm:$0xff] %v1730_v41   ;;  %v966_v47 = vsel %vm838_vm9, %v674_v31, %v902_v39  ;;  %v934_v48 = vmul.f32 0.1, %v802_v40  ;;  %v677_v50 = vadd.f32 %v1842_v19, %v2040_v34 }
 0x129   : > { %1753 = vst [vmem:[%s2055_s27 + $0x60] sm:$0xff] %v1645_v45   ;;  %v805_v51 = vadd.f32 %v1874_v20, %v2040_v34  ;;  %v669_v52 = vadd.f32 %v2040_v34, %v668_v26  ;;  %v797_v53 = vadd.f32 %v2040_v34, %v796_v27  ;;  %vm870_vm10 = vcmp.gt.f32.partialorder %v802_v40, 0.0 }
 0x12a   : > { %1769 = vst [vmem:[%s2055_s27 + $0xe0] sm:$0xff] %v1725_v46   ;;  %vm836_vm11 = vcmp.gt.f32.partialorder %v666_v44, 0.0  ;;  %v900_v54 = vmul.f32 0.1, %v666_v44  ;;  %v932_v55 = vmul.f32 0.1, %v794_v49  ;;  %v998_v59 = vsel %vm870_vm10, %v802_v40, %v934_v48 }
 0x12b   : > { %vm839_vm12 = vcmp.gt.f32.partialorder %v677_v50, 0.0  ;;  %v903_v56 = vmul.f32 0.1, %v677_v50  ;;  %vm871_vm13 = vcmp.gt.f32.partialorder %v805_v51, 0.0  ;;  %v935_v57 = vmul.f32 0.1, %v805_v51 }
 0x12c   : > { %vm868_vm14 = vcmp.gt.f32.partialorder %v794_v49, 0.0  ;;  %vm837_vm15 = vcmp.gt.f32.partialorder %v669_v52, 0.0  ;;  %v901_v58 = vmul.f32 0.1, %v669_v52  ;;  %vm869_vm0 = vcmp.gt.f32.partialorder %v797_v53, 0.0 }
 0x12d   : > { %v967_v60 = vsel %vm839_vm12, %v677_v50, %v903_v56  ;;  %v999_v61 = vsel %vm871_vm13, %v805_v51, %v935_v57  ;;  %v933_v34 = vmul.f32 0.1, %v797_v53  ;;  %v964_v62 = vsel %vm836_vm11, %v666_v44, %v900_v54 }
 0x12e   : > { %v1660_v63 = vpack.c.bf16 %v967_v60, %v966_v47  ;;  %v1740_v0 = vpack.c.bf16 %v999_v61, %v998_v59  ;;  %v965_v1 = vsel %vm837_vm15, %v669_v52, %v901_v58  ;;  %v996_v2 = vsel %vm868_vm14, %v794_v49, %v932_v55 }
 0x12f   : > { %v1655_v3 = vpack.c.bf16 %v965_v1, %v964_v62  ;;  %v997_v4 = vsel %vm869_vm0, %v797_v53, %v933_v34 }
 0x130   : > { %1756 = vst [vmem:[%s2055_s27 + $0x78] sm:$0xff] %v1660_v63   ;;  %1772 = vst [vmem:[%s2055_s27 + $0xf8] sm:$0xff] %v1740_v0   ;;  %v1735_v5 = vpack.c.bf16 %v997_v4, %v996_v2 }
 0x131   : > { %1755 = vst [vmem:[%s2055_s27 + $0x70] sm:$0xff] %v1655_v3  }
 0x132   : > { %1771 = vst [vmem:[%s2055_s27 + $0xf0] sm:$0xff] %v1735_v5  }
 0x133 PF: > { %s13_s12 = sadd.s32 1, %s1927_s12  }
 0x134   : > { %p10_p4 = scmp.ge.s32.totalorder %s13_s12, 6  }
 0x136   :  { %12 = sbr.rel (!%p10_p4) target bundleno = 1 (0x1), region = 62 }

// kernel: _forward_impl.11
= control target key start
LH: loop header
LB: loop body
LE: loop exit
PB: predicated region body
PF: predicated region fallthrough
CT: control target
= control target key end

     0   :  { %s1194_s12 = smov 0   ;;  %s1328_s0 = inlined_call_operand.vmem [shape: bf16[512,80], index: 0, kind: input, shape index: {}]   ;;  %s1329_s1 = inlined_call_operand.vmem [shape: bf16[80,128], index: 1, kind: input, shape index: {}]   ;;  %s1330_s2 = inlined_call_operand.vmem [shape: f32[1,128], index: 2, kind: input, shape index: {}]   ;;  %s1331_s3 = inlined_call_operand.vmem [shape: bf16[512,128], index: 3, kind: output, shape index: {}]  }
   0x1 LB: > { %s856_s13 = sadd.s32 4294967295, %s1172_s12   ;;  %p860_p0 = scmp.ge.s32.totalorder %s1172_s12, 1  ;;  %s1172_s12 = sphi %s1194_s12, %s13_s12  }
   0x2   : > { %p138_p1 = scmp.lt.s32.totalorder %s1172_s12, 3 }
   0x4   : > { %p139_p2 = pnand %p860_p0, %p138_p1 }
   0x5   : > { %v1145_v0 = vld [vmem:[%s1329_s1] sm:$0xff] (!%p139_p2)   ;;  %s861_s16 = sshll.u32 (!%p139_p2), %s856_s13, 5  ;;  %v1146_v1 = vld [vmem:[%s1329_s1 + $0x8] sm:$0xff] (!%p139_p2)   ;;  %v1147_v2 = vld [vmem:[%s1329_s1 + $0x10] sm:$0xff] (!%p139_p2)   ;;  %vm334_vm0 = vcmask (!%p139_p2), 654336  }
   0x6   : > { %142 = sbr.rel (%p139_p2) target bundleno = 281 (0x119), region = 32  ;;  %p163_p3 = scmp.lt.s32.totalorder (!%p139_p2), %s861_s16, 63  ;;  %1085 = vmatprep.subr.bf16.mxu0 (!%p139_p2), %v1145_v0  ;;  %1127 = vmatprep.subr.bf16.mxu1 (!%p139_p2), %v1145_v0  ;;  %v1148_v3 = vld [vmem:[%s1329_s1 + $0x18] sm:$0xff] (!%p139_p2)   ;;  %v1149_v6 = vld [vmem:[%s1329_s1 + $0x20] sm:$0xff] (!%p139_p2)  }
   0x7   : > { %1086 = vmatpush3.bf16.msra.mxu0 (!%p139_p2), %v1145_v0  ;;  %1132 = vmatpush3.bf16.msra.mxu1 (!%p139_p2), %v1145_v0  ;;  %v1262_v21 = vld [vmem:[%s1330_s2] ss:$0 sm:$0xff] (!%p139_p2) }
   0x8   : > { %1087 = vmatprep.subr.bf16.mxu0 (!%p139_p2), %v1146_v1  ;;  %1128 = vmatprep.subr.bf16.mxu1 (!%p139_p2), %v1146_v1 }
   0xb   : > { %1088 = vmatpush3.bf16.msra.mxu0 (!%p139_p2), %v1146_v1  ;;  %1133 = vmatpush3.bf16.msra.mxu1 (!%p139_p2), %v1146_v1 }
   0xc   : > { %1089 = vmatprep.subr.bf16.mxu0 (!%p139_p2), %v1147_v2  ;;  %1129 = vmatprep.subr.bf16.mxu1 (!%p139_p2), %v1147_v2 }
   0xd   : > { %s1333_s16 = smov (!%p163_p3, %s861_s16), 63 }
   0xe   : > { %s862_s21 = sshll.u32 %s1333_s16, 2 }
   0xf   : > { %s1222_s26 = scalar_lea.vmem %s1328_s0, %s862_s21  ;;  %1090 = vmatpush3.bf16.msra.mxu0 %v1147_v2  ;;  %1134 = vmatpush3.bf16.msra.mxu1 %v1147_v2  ;;  %s1279_s6 = scalar_lea.vmem %s1331_s3, %s862_s21 }
  0x10   : > { %v1150_v4 = vld [vmem:[%s1222_s26] sm:$0xff]   ;;  %1091 = vmatprep.subr.bf16.mxu0 %v1148_v3  ;;  %1130 = vmatprep.subr.bf16.mxu1 %v1148_v3  ;;  %v1152_v7 = vld [vmem:[%s1222_s26 + $0x8] sm:$0xff]   ;;  %v1154_v9 = vld [vmem:[%s1222_s26 + $0x10] sm:$0xff]  }
  0x11   : > { %v1151_v5 = vld [vmem:[%s1222_s26 + $0x40] sm:$0xff]   ;;  %1095 = vmatprep.mubr.msk.bf16.mxu0 %vm334_vm0, %v1150_v4  ;;  %v1153_v8 = vld [vmem:[%s1222_s26 + $0x48] sm:$0xff]   ;;  %v1155_v10 = vld [vmem:[%s1222_s26 + $0x50] sm:$0xff]  }
  0x12   : > { %1111 = vmatprep.mubr.msk.bf16.mxu1 %vm334_vm0, %v1151_v5  ;;  %v1156_v11 = vld [vmem:[%s1222_s26 + $0x18] sm:$0xff]   ;;  %v1158_v13 = vld [vmem:[%s1222_s26 + $0x20] sm:$0xff]   ;;  %v1160_v15 = vld [vmem:[%s1222_s26 + $0x28] sm:$0xff]  }
  0x13   : > { %1092 = vmatpush3.bf16.msra.mxu0 %v1148_v3  ;;  %1135 = vmatpush3.bf16.msra.mxu1 %v1148_v3  ;;  %v1157_v12 = vld [vmem:[%s1222_s26 + $0x58] sm:$0xff]   ;;  %v1159_v14 = vld [vmem:[%s1222_s26 + $0x60] sm:$0xff]   ;;  %v1161_v16 = vld [vmem:[%s1222_s26 + $0x68] sm:$0xff]  }
  0x14   : > { %1093 = vmatprep.subr.bf16.mxu0 %v1149_v6  ;;  %1131 = vmatprep.subr.bf16.mxu1 %v1149_v6  ;;  %v1162_v17 = vld [vmem:[%s1222_s26 + $0x30] sm:$0xff]   ;;  %v1164_v19 = vld [vmem:[%s1222_s26 + $0x38] sm:$0xff]  }
  0x15   : > { %v1163_v18 = vld [vmem:[%s1222_s26 + $0x70] sm:$0xff]   ;;  %v1165_v20 = vld [vmem:[%s1222_s26 + $0x78] sm:$0xff]  }
  0x17   : > { %1094 = vmatpush3.bf16.msra.mxu0 %v1149_v6  ;;  %1136 = vmatpush3.bf16.msra.mxu1 %v1149_v6 }
  0x1a   : > { %1096 = vmatmul.mubr.msk.bf16.vlgmr.msra.gmra.mrb[0].mxu0 %vm334_vm0, %v1152_v7  ;;  %1112 = vmatmul.mubr.msk.bf16.vlgmr.msra.gmra.mrb[0].mxu1 %vm334_vm0, %v1153_v8 }
  0x1b   : > { %1099 = vmatprep.mubr.msk.bf16.mxu0 %vm334_vm0, %v1154_v9  ;;  %1115 = vmatprep.mubr.msk.bf16.mxu1 %vm334_vm0, %v1155_v10 }
  0x22   : > { %1100 = vmatmul.mubr.msk.bf16.gmra.mrb[4].mxu0 %vm334_vm0, %v1156_v11  ;;  %1116 = vmatmul.mubr.msk.bf16.gmra.mrb[4].mxu1 %vm334_vm0, %v1157_v12 }
  0x23   : > { %1103 = vmatprep.mubr.msk.bf16.mxu0 %vm334_vm0, %v1158_v13  ;;  %1119 = vmatprep.mubr.msk.bf16.mxu1 %vm334_vm0, %v1159_v14 }
  0x2a   : > { %1104 = vmatmul.mubr.msk.bf16.gmra.mrb[8].mxu0 %vm334_vm0, %v1160_v15  ;;  %1120 = vmatmul.mubr.msk.bf16.gmra.mrb[8].mxu1 %vm334_vm0, %v1161_v16 }
  0x2b   : > { %1107 = vmatprep.mubr.msk.bf16.mxu0 %vm334_vm0, %v1162_v17  ;;  %1123 = vmatprep.mubr.msk.bf16.mxu1 %vm334_vm0, %v1163_v18 }
  0x32   : > { %1108 = vmatmul.mubr.msk.bf16.gmra.mrb[12].mxu0 %vm334_vm0, %v1164_v19  ;;  %1124 = vmatmul.mubr.msk.bf16.gmra.mrb[12].mxu1 %vm334_vm0, %v1165_v20 }
  0xed   : > { %v1097_v22 = vpop.f32.mrb[0].mxu0  ;;  %v1113_v23 = vpop.f32.mrb[0].mxu1 }
  0xee   : > { %v426_v24 = vadd.f32 %v1097_v22, %v1262_v21  ;;  %v490_v25 = vadd.f32 %v1113_v23, %v1262_v21  ;;  %v417_v26 = vpop.f32.mrb[1].mxu0  ;;  %v481_v27 = vpop.f32.mrb[1].mxu1 }
  0xef   : > { %v418_v28 = vadd.f32 %v1262_v21, %v417_v26  ;;  %v482_v29 = vadd.f32 %v1262_v21, %v481_v27  ;;  %v1098_v30 = vpop.f32.mrb[2].mxu0  ;;  %v1114_v31 = vpop.f32.mrb[2].mxu1 }
  0xf0   : > { %vm546_vm1 = vcmp.gt.f32.partialorder %v426_v24, 0.0  ;;  %v578_v32 = vmul.f32 0.1, %v426_v24  ;;  %vm562_vm2 = vcmp.gt.f32.partialorder %v490_v25, 0.0  ;;  %v594_v33 = vmul.f32 0.1, %v490_v25 }
  0xf1   : > { %vm544_vm3 = vcmp.gt.f32.partialorder %v418_v28, 0.0  ;;  %v576_v34 = vmul.f32 0.1, %v418_v28  ;;  %vm560_vm4 = vcmp.gt.f32.partialorder %v482_v29, 0.0  ;;  %v592_v35 = vmul.f32 0.1, %v482_v29 }
  0xf2   : > { %v429_v36 = vadd.f32 %v1098_v30, %v1262_v21  ;;  %v493_v37 = vadd.f32 %v1114_v31, %v1262_v21  ;;  %v420_v38 = vpop.f32.mrb[3].mxu0  ;;  %v484_v39 = vpop.f32.mrb[3].mxu1  ;;  %v610_v40 = vsel %vm546_vm1, %v426_v24, %v578_v32  ;;  %v626_v41 = vsel %vm562_vm2, %v490_v25, %v594_v33 }
  0xf3   : > { %v421_v42 = vadd.f32 %v1262_v21, %v420_v38  ;;  %v485_v43 = vadd.f32 %v1262_v21, %v484_v39  ;;  %v608_v48 = vsel %vm544_vm3, %v418_v28, %v576_v34  ;;  %v624_v49 = vsel %vm560_vm4, %v482_v29, %v592_v35 }
  0xf4   : > { %vm547_vm5 = vcmp.gt.f32.partialorder %v429_v36, 0.0  ;;  %v579_v44 = vmul.f32 0.1, %v429_v36  ;;  %vm563_vm6 = vcmp.gt.f32.partialorder %v493_v37, 0.0  ;;  %v595_v45 = vmul.f32 0.1, %v493_v37 }
  0xf5   : > { %vm545_vm7 = vcmp.gt.f32.partialorder %v421_v42, 0.0  ;;  %v577_v46 = vmul.f32 0.1, %v421_v42  ;;  %vm561_vm8 = vcmp.gt.f32.partialorder %v485_v43, 0.0  ;;  %v593_v47 = vmul.f32 0.1, %v485_v43 }
  0xf6   : > { %v611_v50 = vsel %vm547_vm5, %v429_v36, %v579_v44  ;;  %v627_v51 = vsel %vm563_vm6, %v493_v37, %v595_v45  ;;  %v1101_v52 = vpop.f32.mrb[4].mxu0  ;;  %v1117_v53 = vpop.f32.mrb[4].mxu1 }
  0xf7   : > { %v977_v54 = vpack.c.bf16 %v611_v50, %v610_v40  ;;  %v1017_v55 = vpack.c.bf16 %v627_v51, %v626_v41  ;;  %v609_v56 = vsel %vm545_vm7, %v421_v42, %v577_v46  ;;  %v625_v57 = vsel %vm561_vm8, %v485_v43, %v593_v47  ;;  %v433_v58 = vpop.f32.mrb[5].mxu0  ;;  %v497_v59 = vpop.f32.mrb[5].mxu1 }
  0xf8   : > { %v972_v60 = vpack.c.bf16 %v609_v56, %v608_v48  ;;  %v1012_v61 = vpack.c.bf16 %v625_v57, %v624_v49  ;;  %v442_v62 = vadd.f32 %v1101_v52, %v1262_v21  ;;  %v506_v63 = vadd.f32 %v1117_v53, %v1262_v21  ;;  %v1102_v0 = vpop.f32.mrb[6].mxu0  ;;  %v1118_v1 = vpop.f32.mrb[6].mxu1 }
  0xf9   : > { %1049 = vst [vmem:[%s1279_s6 + $0x8] sm:$0xff] %v977_v54   ;;  %1057 = vst [vmem:[%s1279_s6 + $0x48] sm:$0xff] %v1017_v55   ;;  %v434_v2 = vadd.f32 %v1262_v21, %v433_v58  ;;  %v498_v3 = vadd.f32 %v1262_v21, %v497_v59  ;;  %v445_v4 = vadd.f32 %v1102_v0, %v1262_v21  ;;  %v436_v6 = vpop.f32.mrb[7].mxu0  ;;  %v500_v7 = vpop.f32.mrb[7].mxu1 }
  0xfa   : > { %v509_v5 = vadd.f32 %v1118_v1, %v1262_v21  ;;  %973 = vst [vmem:[%s1279_s6] sm:$0xff] %v972_v60   ;;  %1056 = vst [vmem:[%s1279_s6 + $0x40] sm:$0xff] %v1012_v61   ;;  %vm550_vm9 = vcmp.gt.f32.partialorder %v442_v62, 0.0  ;;  %v582_v8 = vmul.f32 0.1, %v442_v62  ;;  %vm566_vm10 = vcmp.gt.f32.partialorder %v506_v63, 0.0 }
  0xfb   : > { %v598_v9 = vmul.f32 0.1, %v506_v63  ;;  %vm548_vm11 = vcmp.gt.f32.partialorder %v434_v2, 0.0  ;;  %v580_v10 = vmul.f32 0.1, %v434_v2  ;;  %vm564_vm12 = vcmp.gt.f32.partialorder %v498_v3, 0.0 }
  0xfc   : > { %v614_v11 = vsel %vm550_vm9, %v442_v62, %v582_v8  ;;  %v596_v12 = vmul.f32 0.1, %v498_v3  ;;  %vm551_vm13 = vcmp.gt.f32.partialorder %v445_v4, 0.0  ;;  %v583_v13 = vmul.f32 0.1, %v445_v4 }
  0xfd   : > { %v630_v14 = vsel %vm566_vm10, %v506_v63, %v598_v9  ;;  %v612_v15 = vsel %vm548_vm11, %v434_v2, %v580_v10  ;;  %vm567_vm14 = vcmp.gt.f32.partialorder %v509_v5, 0.0  ;;  %v599_v16 = vmul.f32 0.1, %v509_v5  ;;  %v1105_v17 = vpop.f32.mrb[8].mxu0  ;;  %v1121_v18 = vpop.f32.mrb[8].mxu1 }
  0xfe   : > { %v615_v19 = vsel %vm551_vm13, %v445_v4, %v583_v13  ;;  %v437_v20 = vadd.f32 %v1262_v21, %v436_v6  ;;  %v501_v22 = vadd.f32 %v1262_v21, %v500_v7  ;;  %v458_v23 = vadd.f32 %v1105_v17, %v1262_v21  ;;  %v449_v24 = vpop.f32.mrb[9].mxu0  ;;  %v513_v25 = vpop.f32.mrb[9].mxu1 }
  0xff   : > { %v987_v26 = vpack.c.bf16 %v615_v19, %v614_v11  ;;  %v631_v27 = vsel %vm567_vm14, %v509_v5, %v599_v16  ;;  %v522_v28 = vadd.f32 %v1121_v18, %v1262_v21  ;;  %v450_v29 = vadd.f32 %v1262_v21, %v449_v24  ;;  %v1106_v30 = vpop.f32.mrb[10].mxu0  ;;  %v1122_v31 = vpop.f32.mrb[10].mxu1 }
 0x100   : > { %v1027_v32 = vpack.c.bf16 %v631_v27, %v630_v14  ;;  %vm549_vm15 = vcmp.gt.f32.partialorder %v437_v20, 0.0  ;;  %v581_v33 = vmul.f32 0.1, %v437_v20  ;;  %vm565_vm0 = vcmp.gt.f32.partialorder %v501_v22, 0.0  ;;  %v452_v34 = vpop.f32.mrb[11].mxu0  ;;  %v516_v35 = vpop.f32.mrb[11].mxu1 }
 0x101   : > { %1051 = vst [vmem:[%s1279_s6 + $0x18] sm:$0xff] %v987_v26   ;;  %v597_v36 = vmul.f32 0.1, %v501_v22  ;;  %vm554_vm1 = vcmp.gt.f32.partialorder %v458_v23, 0.0  ;;  %v586_v37 = vmul.f32 0.1, %v458_v23  ;;  %v628_v38 = vsel %vm564_vm12, %v498_v3, %v596_v12 }
 0x102   : > { %vm570_vm2 = vcmp.gt.f32.partialorder %v522_v28, 0.0  ;;  %1059 = vst [vmem:[%s1279_s6 + $0x58] sm:$0xff] %v1027_v32   ;;  %v613_v39 = vsel %vm549_vm15, %v437_v20, %v581_v33  ;;  %v602_v40 = vmul.f32 0.1, %v522_v28  ;;  %vm552_vm3 = vcmp.gt.f32.partialorder %v450_v29, 0.0 }
 0x103   : > { %v982_v41 = vpack.c.bf16 %v613_v39, %v612_v15  ;;  %v629_v42 = vsel %vm565_vm0, %v501_v22, %v597_v36  ;;  %v584_v43 = vmul.f32 0.1, %v450_v29  ;;  %v514_v44 = vadd.f32 %v1262_v21, %v513_v25 }
 0x104   : > { %v1022_v45 = vpack.c.bf16 %v629_v42, %v628_v38  ;;  %v618_v46 = vsel %vm554_vm1, %v458_v23, %v586_v37  ;;  %v634_v47 = vsel %vm570_vm2, %v522_v28, %v602_v40  ;;  %v461_v48 = vadd.f32 %v1106_v30, %v1262_v21 }
 0x105   : > { %1050 = vst [vmem:[%s1279_s6 + $0x10] sm:$0xff] %v982_v41   ;;  %vm568_vm4 = vcmp.gt.f32.partialorder %v514_v44, 0.0  ;;  %v600_v49 = vmul.f32 0.1, %v514_v44  ;;  %v525_v50 = vadd.f32 %v1122_v31, %v1262_v21  ;;  %v453_v51 = vadd.f32 %v1262_v21, %v452_v34  ;;  %v1109_v52 = vpop.f32.mrb[12].mxu0  ;;  %v1125_v53 = vpop.f32.mrb[12].mxu1 }
 0x106   : > { %1058 = vst [vmem:[%s1279_s6 + $0x50] sm:$0xff] %v1022_v45   ;;  %vm555_vm5 = vcmp.gt.f32.partialorder %v461_v48, 0.0  ;;  %v587_v54 = vmul.f32 0.1, %v461_v48  ;;  %v517_v55 = vadd.f32 %v1262_v21, %v516_v35  ;;  %v474_v56 = vadd.f32 %v1109_v52, %v1262_v21  ;;  %v465_v57 = vpop.f32.mrb[13].mxu0  ;;  %v529_v58 = vpop.f32.mrb[13].mxu1 }
 0x107   : > { %v616_v59 = vsel %vm552_vm3, %v450_v29, %v584_v43  ;;  %vm571_vm6 = vcmp.gt.f32.partialorder %v525_v50, 0.0  ;;  %v603_v60 = vmul.f32 0.1, %v525_v50  ;;  %vm553_vm7 = vcmp.gt.f32.partialorder %v453_v51, 0.0  ;;  %v1110_v61 = vpop.f32.mrb[14].mxu0  ;;  %v1126_v62 = vpop.f32.mrb[14].mxu1 }
 0x108   : > { %v619_v63 = vsel %vm555_vm5, %v461_v48, %v587_v54  ;;  %v585_v0 = vmul.f32 0.1, %v453_v51  ;;  %vm569_vm8 = vcmp.gt.f32.partialorder %v517_v55, 0.0  ;;  %v601_v1 = vmul.f32 0.1, %v517_v55  ;;  %v468_v2 = vpop.f32.mrb[15].mxu0 }
 0x109   : > { %v632_v3 = vsel %vm568_vm4, %v514_v44, %v600_v49  ;;  %v997_v4 = vpack.c.bf16 %v619_v63, %v618_v46  ;;  %v635_v5 = vsel %vm571_vm6, %v525_v50, %v603_v60  ;;  %v590_v6 = vmul.f32 0.1, %v474_v56  ;;  %v532_v7 = vpop.f32.mrb[15].mxu1 }
 0x10a   : > { %v1037_v8 = vpack.c.bf16 %v635_v5, %v634_v47  ;;  %v617_v9 = vsel %vm553_vm7, %v453_v51, %v585_v0  ;;  %v633_v10 = vsel %vm569_vm8, %v517_v55, %v601_v1  ;;  %v538_v11 = vadd.f32 %v1125_v53, %v1262_v21 }
 0x10b   : > { %1053 = vst [vmem:[%s1279_s6 + $0x28] sm:$0xff] %v997_v4   ;;  %v992_v12 = vpack.c.bf16 %v617_v9, %v616_v59  ;;  %v1032_v13 = vpack.c.bf16 %v633_v10, %v632_v3  ;;  %vm558_vm9 = vcmp.gt.f32.partialorder %v474_v56, 0.0  ;;  %v466_v14 = vadd.f32 %v1262_v21, %v465_v57 }
 0x10c   : > { %1061 = vst [vmem:[%s1279_s6 + $0x68] sm:$0xff] %v1037_v8   ;;  %vm574_vm10 = vcmp.gt.f32.partialorder %v538_v11, 0.0  ;;  %v606_v15 = vmul.f32 0.1, %v538_v11  ;;  %v530_v16 = vadd.f32 %v1262_v21, %v529_v58  ;;  %v477_v17 = vadd.f32 %v1110_v61, %v1262_v21 }
 0x10d   : > { %1052 = vst [vmem:[%s1279_s6 + $0x20] sm:$0xff] %v992_v12   ;;  %1060 = vst [vmem:[%s1279_s6 + $0x60] sm:$0xff] %v1032_v13   ;;  %v588_v18 = vmul.f32 0.1, %v466_v14  ;;  %v541_v19 = vadd.f32 %v1126_v62, %v1262_v21  ;;  %v469_v20 = vadd.f32 %v1262_v21, %v468_v2  ;;  %v622_v22 = vsel %vm558_vm9, %v474_v56, %v590_v6 }
 0x10e   : > { %vm556_vm11 = vcmp.gt.f32.partialorder %v466_v14, 0.0  ;;  %vm559_vm12 = vcmp.gt.f32.partialorder %v477_v17, 0.0  ;;  %v638_v23 = vsel %vm574_vm10, %v538_v11, %v606_v15  ;;  %v591_v24 = vmul.f32 0.1, %v477_v17 }
 0x10f   : > { %vm575_vm13 = vcmp.gt.f32.partialorder %v541_v19, 0.0  ;;  %v607_v25 = vmul.f32 0.1, %v541_v19  ;;  %vm572_vm14 = vcmp.gt.f32.partialorder %v530_v16, 0.0  ;;  %vm557_vm15 = vcmp.gt.f32.partialorder %v469_v20, 0.0 }
 0x110   : > { %v589_v26 = vmul.f32 0.1, %v469_v20  ;;  %v533_v27 = vadd.f32 %v1262_v21, %v532_v7  ;;  %v620_v28 = vsel %vm556_vm11, %v466_v14, %v588_v18  ;;  %v604_v29 = vmul.f32 0.1, %v530_v16 }
 0x111   : > { %v623_v30 = vsel %vm559_vm12, %v477_v17, %v591_v24  ;;  %v639_v31 = vsel %vm575_vm13, %v541_v19, %v607_v25 }
 0x112   : > { %v1007_v32 = vpack.c.bf16 %v623_v30, %v622_v22  ;;  %v1047_v33 = vpack.c.bf16 %v639_v31, %v638_v23  ;;  %v621_v34 = vsel %vm557_vm15, %v469_v20, %v589_v26  ;;  %vm573_vm0 = vcmp.gt.f32.partialorder %v533_v27, 0.0 }
 0x113   : > { %v1002_v35 = vpack.c.bf16 %v621_v34, %v620_v28  ;;  %v605_v36 = vmul.f32 0.1, %v533_v27  ;;  %v636_v37 = vsel %vm572_vm14, %v530_v16, %v604_v29 }
 0x114   : > { %1055 = vst [vmem:[%s1279_s6 + $0x38] sm:$0xff] %v1007_v32   ;;  %1063 = vst [vmem:[%s1279_s6 + $0x78] sm:$0xff] %v1047_v33  }
 0x115   : > { %1054 = vst [vmem:[%s1279_s6 + $0x30] sm:$0xff] %v1002_v35   ;;  %v637_v38 = vsel %vm573_vm0, %v533_v27, %v605_v36 }
 0x116   : > { %v1042_v39 = vpack.c.bf16 %v637_v38, %v636_v37 }
 0x118   : > { %1062 = vst [vmem:[%s1279_s6 + $0x70] sm:$0xff] %v1042_v39  }
 0x119 PF: > { %s13_s12 = sadd.s32 1, %s1172_s12  }
 0x11a   : > { %p10_p4 = scmp.ge.s32.totalorder %s13_s12, 4  }
 0x11c   :  { %12 = sbr.rel (!%p10_p4) target bundleno = 1 (0x1), region = 62 }

// kernel: _forward_impl.12
= control target key start
LH: loop header
LB: loop body
LE: loop exit
PB: predicated region body
PF: predicated region fallthrough
CT: control target
= control target key end

     0   :  { %s1298_s12 = smov 0   ;;  %s1451_s0 = inlined_call_operand.vmem [shape: bf16[512,144], index: 0, kind: input, shape index: {}]   ;;  %s1452_s1 = inlined_call_operand.vmem [shape: bf16[144,128], index: 1, kind: input, shape index: {}]   ;;  %s1453_s2 = inlined_call_operand.vmem [shape: f32[1,128], index: 2, kind: input, shape index: {}]   ;;  %s1454_s3 = inlined_call_operand.vmem [shape: bf16[512,128], index: 3, kind: output, shape index: {}]  }
   0x1 LB: > { %s955_s13 = sadd.s32 4294967295, %s1275_s12   ;;  %p959_p0 = scmp.ge.s32.totalorder %s1275_s12, 1  ;;  %s1275_s12 = sphi %s1298_s12, %s13_s12  }
   0x2   : > { %p139_p1 = scmp.lt.s32.totalorder %s1275_s12, 3 }
   0x4   : > { %p140_p2 = pnand %p959_p0, %p139_p1 }
   0x5   : > { %v1212_v0 = vld [vmem:[%s1452_s1] sm:$0xff] (!%p140_p2)   ;;  %v1277_v1 = vmov (!%p140_p2), 0   ;;  %s960_s16 = sshll.u32 (!%p140_p2), %s955_s13, 5  ;;  %v1213_v2 = vld [vmem:[%s1452_s1 + $0x8] sm:$0xff] (!%p140_p2)   ;;  %v1214_v3 = vld [vmem:[%s1452_s1 + $0x10] sm:$0xff] (!%p140_p2)   ;;  %vm433_vm0 = vcmask (!%p140_p2), 130048  }
   0x6   : > { %143 = sbr.rel (%p140_p2) target bundleno = 320 (0x140), region = 32  ;;  %482 = vmatprep.subr.bf16.mxu0 (!%p140_p2), %v1277_v1  ;;  %1185 = vmatprep.subr.bf16.mxu1 (!%p140_p2), %v1277_v1  ;;  %p165_p3 = scmp.lt.s32.totalorder (!%p140_p2), %s960_s16, 63  ;;  %v1215_v4 = vld [vmem:[%s1452_s1 + $0x18] sm:$0xff] (!%p140_p2)   ;;  %v1216_v7 = vld [vmem:[%s1452_s1 + $0x20] sm:$0xff] (!%p140_p2)   ;;  %v1217_v8 = vld [vmem:[%s1452_s1 + $0x28] sm:$0xff] (!%p140_p2)  }
   0x7   : > { %483 = vmatpush1.bf16.msra.mxu0 (!%p140_p2), %v1212_v0  ;;  %1194 = vmatpush1.bf16.msra.mxu1 (!%p140_p2), %v1212_v0  ;;  %v1218_v9 = vld [vmem:[%s1452_s1 + $0x30] sm:$0xff] (!%p140_p2)   ;;  %v1219_v10 = vld [vmem:[%s1452_s1 + $0x38] sm:$0xff] (!%p140_p2)   ;;  %v1220_v11 = vld [vmem:[%s1452_s1 + $0x40] sm:$0xff] (!%p140_p2)  }
   0x8   : > { %484 = vmatprep.subr.bf16.mxu0 (!%p140_p2), %v1277_v1  ;;  %1186 = vmatprep.subr.bf16.mxu1 (!%p140_p2), %v1277_v1  ;;  %v1392_v42 = vld [vmem:[%s1453_s2] ss:$0 sm:$0xff] (!%p140_p2) }
   0xb   : > { %485 = vmatpush1.bf16.msra.mxu0 (!%p140_p2), %v1213_v2  ;;  %1195 = vmatpush1.bf16.msra.mxu1 (!%p140_p2), %v1213_v2 }
   0xc   : > { %486 = vmatprep.subr.bf16.mxu0 (!%p140_p2), %v1277_v1  ;;  %1187 = vmatprep.subr.bf16.mxu1 (!%p140_p2), %v1277_v1 }
   0xd   : > { %s1456_s16 = smov (!%p165_p3, %s960_s16), 63 }
   0xe   : > { %s1057_s21 = sshll.u32 %s1456_s16, 3  ;;  %s964_s13 = sshll.u32 %s1456_s16, 2 }
   0xf   : > { %s1321_s24 = scalar_lea.vmem %s1451_s0, %s1057_s21  ;;  %487 = vmatpush1.bf16.msra.mxu0 %v1214_v3  ;;  %1196 = vmatpush1.bf16.msra.mxu1 %v1214_v3  ;;  %s1402_s17 = scalar_lea.vmem %s1454_s3, %s964_s13 }
  0x10   : > { %v1223_v5 = vld [vmem:[%s1321_s24 + $0x4] ss:$8 sps:$4 sm:$0xff]   ;;  %488 = vmatprep.subr.bf16.mxu0 %v1277_v1  ;;  %1188 = vmatprep.subr.bf16.mxu1 %v1277_v1  ;;  %v1221_v12 = vld [vmem:[%s1321_s24] ss:$8 sps:$4 sm:$0xff]   ;;  %v1227_v14 = vld [vmem:[%s1321_s24 + $0x14] ss:$8 sps:$4 sm:$0xff]  }
  0x11   : > { %v1226_v6 = vld [vmem:[%s1321_s24 + $0x84] ss:$8 sps:$4 sm:$0xff]   ;;  %1007 = vmatprep.mubr.msk.bf16.mxu0 %vm433_vm0, %v1223_v5  ;;  %v1224_v13 = vld [vmem:[%s1321_s24 + $0x80] ss:$8 sps:$4 sm:$0xff]   ;;  %v1229_v15 = vld [vmem:[%s1321_s24 + $0x94] ss:$8 sps:$4 sm:$0xff]  }
  0x12   : > { %1015 = vmatprep.mubr.msk.bf16.mxu1 %vm433_vm0, %v1226_v6  ;;  %v1231_v16 = vld [vmem:[%s1321_s24 + $0x10] ss:$8 sps:$4 sm:$0xff]   ;;  %v1233_v18 = vld [vmem:[%s1321_s24 + $0x24] ss:$8 sps:$4 sm:$0xff]   ;;  %v1237_v20 = vld [vmem:[%s1321_s24 + $0x20] ss:$8 sps:$4 sm:$0xff]  }
  0x13   : > { %489 = vmatpush1.bf16.msra.mxu0 %v1215_v4  ;;  %1197 = vmatpush1.bf16.msra.mxu1 %v1215_v4  ;;  %v1232_v17 = vld [vmem:[%s1321_s24 + $0x90] ss:$8 sps:$4 sm:$0xff]   ;;  %v1235_v19 = vld [vmem:[%s1321_s24 + $0xa4] ss:$8 sps:$4 sm:$0xff]   ;;  %v1238_v21 = vld [vmem:[%s1321_s24 + $0xa0] ss:$8 sps:$4 sm:$0xff]  }
  0x14   : > { %490 = vmatprep.subr.bf16.mxu0 %v1277_v1  ;;  %1189 = vmatprep.subr.bf16.mxu1 %v1277_v1  ;;  %v1239_v22 = vld [vmem:[%s1321_s24 + $0x34] ss:$8 sps:$4 sm:$0xff]   ;;  %v1243_v24 = vld [vmem:[%s1321_s24 + $0x30] ss:$8 sps:$4 sm:$0xff]   ;;  %v1245_v26 = vld [vmem:[%s1321_s24 + $0x44] ss:$8 sps:$4 sm:$0xff]  }
  0x15   : > { %v1241_v23 = vld [vmem:[%s1321_s24 + $0xb4] ss:$8 sps:$4 sm:$0xff]   ;;  %v1244_v25 = vld [vmem:[%s1321_s24 + $0xb0] ss:$8 sps:$4 sm:$0xff]   ;;  %v1247_v27 = vld [vmem:[%s1321_s24 + $0xc4] ss:$8 sps:$4 sm:$0xff]  }
  0x16   : > { %v1249_v28 = vld [vmem:[%s1321_s24 + $0x40] ss:$8 sps:$4 sm:$0xff]   ;;  %v1251_v30 = vld [vmem:[%s1321_s24 + $0x54] ss:$8 sps:$4 sm:$0xff]   ;;  %v1255_v32 = vld [vmem:[%s1321_s24 + $0x50] ss:$8 sps:$4 sm:$0xff]  }
  0x17   : > { %491 = vmatpush1.bf16.msra.mxu0 %v1216_v7  ;;  %1198 = vmatpush1.bf16.msra.mxu1 %v1216_v7  ;;  %v1250_v29 = vld [vmem:[%s1321_s24 + $0xc0] ss:$8 sps:$4 sm:$0xff]   ;;  %v1253_v31 = vld [vmem:[%s1321_s24 + $0xd4] ss:$8 sps:$4 sm:$0xff]   ;;  %v1256_v33 = vld [vmem:[%s1321_s24 + $0xd0] ss:$8 sps:$4 sm:$0xff]  }
  0x18   : > { %492 = vmatprep.subr.bf16.mxu0 %v1277_v1  ;;  %1190 = vmatprep.subr.bf16.mxu1 %v1277_v1  ;;  %v1257_v34 = vld [vmem:[%s1321_s24 + $0x64] ss:$8 sps:$4 sm:$0xff]   ;;  %v1261_v36 = vld [vmem:[%s1321_s24 + $0x60] ss:$8 sps:$4 sm:$0xff]   ;;  %v1263_v38 = vld [vmem:[%s1321_s24 + $0x74] ss:$8 sps:$4 sm:$0xff]  }
  0x19   : > { %v1259_v35 = vld [vmem:[%s1321_s24 + $0xe4] ss:$8 sps:$4 sm:$0xff]   ;;  %v1262_v37 = vld [vmem:[%s1321_s24 + $0xe0] ss:$8 sps:$4 sm:$0xff]   ;;  %v1265_v39 = vld [vmem:[%s1321_s24 + $0xf4] ss:$8 sps:$4 sm:$0xff]  }
  0x1a   : > { %v1267_v40 = vld [vmem:[%s1321_s24 + $0x70] ss:$8 sps:$4 sm:$0xff]  }
  0x1b   : > { %493 = vmatpush1.bf16.msra.mxu0 %v1217_v8  ;;  %1199 = vmatpush1.bf16.msra.mxu1 %v1217_v8  ;;  %v1268_v41 = vld [vmem:[%s1321_s24 + $0xf0] ss:$8 sps:$4 sm:$0xff]  }
  0x1c   : > { %494 = vmatprep.subr.bf16.mxu0 %v1277_v1  ;;  %1191 = vmatprep.subr.bf16.mxu1 %v1277_v1 }
  0x1f   : > { %495 = vmatpush1.bf16.msra.mxu0 %v1218_v9  ;;  %1200 = vmatpush1.bf16.msra.mxu1 %v1218_v9 }
  0x20   : > { %496 = vmatprep.subr.bf16.mxu0 %v1277_v1  ;;  %1192 = vmatprep.subr.bf16.mxu1 %v1277_v1 }
  0x23   : > { %497 = vmatpush1.bf16.msra.mxu0 %v1219_v10  ;;  %1201 = vmatpush1.bf16.msra.mxu1 %v1219_v10 }
  0x24   : > { %498 = vmatprep.subr.bf16.mxu0 %v1277_v1  ;;  %1193 = vmatprep.subr.bf16.mxu1 %v1277_v1 }
  0x27   : > { %499 = vmatpush1.bf16.msra.mxu0 %v1220_v11  ;;  %1202 = vmatpush1.bf16.msra.mxu1 %v1220_v11 }
  0x2a   : > { %515 = vmatmul.mubr.bf16.vlgmr.msra.gmra.mrb[0].mxu0 %v1221_v12  ;;  %579 = vmatmul.mubr.bf16.vlgmr.msra.gmra.mrb[0].mxu1 %v1224_v13 }
  0x2b   : > { %1008 = vmatprep.mubr.msk.bf16.mxu0 %vm433_vm0, %v1227_v14  ;;  %1016 = vmatprep.mubr.msk.bf16.mxu1 %vm433_vm0, %v1229_v15 }
  0x32   : > { %523 = vmatmul.mubr.bf16.gmra.mrb[4].mxu0 %v1231_v16  ;;  %587 = vmatmul.mubr.bf16.gmra.mrb[4].mxu1 %v1232_v17 }
  0x33   : > { %1009 = vmatprep.mubr.msk.bf16.mxu0 %vm433_vm0, %v1233_v18  ;;  %1017 = vmatprep.mubr.msk.bf16.mxu1 %vm433_vm0, %v1235_v19 }
  0x3a   : > { %531 = vmatmul.mubr.bf16.gmra.mrb[8].mxu0 %v1237_v20  ;;  %595 = vmatmul.mubr.bf16.gmra.mrb[8].mxu1 %v1238_v21 }
  0x3b   : > { %1010 = vmatprep.mubr.msk.bf16.mxu0 %vm433_vm0, %v1239_v22  ;;  %1018 = vmatprep.mubr.msk.bf16.mxu1 %vm433_vm0, %v1241_v23 }
  0x42   : > { %539 = vmatmul.mubr.bf16.gmra.mrb[12].mxu0 %v1243_v24  ;;  %603 = vmatmul.mubr.bf16.gmra.mrb[12].mxu1 %v1244_v25 }
  0x43   : > { %1011 = vmatprep.mubr.msk.bf16.mxu0 %vm433_vm0, %v1245_v26  ;;  %1019 = vmatprep.mubr.msk.bf16.mxu1 %vm433_vm0, %v1247_v27 }
  0x4a   : > { %547 = vmatmul.mubr.bf16.gmra.mrb[16].mxu0 %v1249_v28  ;;  %611 = vmatmul.mubr.bf16.gmra.mrb[16].mxu1 %v1250_v29 }
  0x4b   : > { %1012 = vmatprep.mubr.msk.bf16.mxu0 %vm433_vm0, %v1251_v30  ;;  %1020 = vmatprep.mubr.msk.bf16.mxu1 %vm433_vm0, %v1253_v31 }
  0x52   : > { %555 = vmatmul.mubr.bf16.gmra.mrb[20].mxu0 %v1255_v32  ;;  %619 = vmatmul.mubr.bf16.gmra.mrb[20].mxu1 %v1256_v33 }
  0x53   : > { %1013 = vmatprep.mubr.msk.bf16.mxu0 %vm433_vm0, %v1257_v34  ;;  %1021 = vmatprep.mubr.msk.bf16.mxu1 %vm433_vm0, %v1259_v35 }
  0x5a   : > { %563 = vmatmul.mubr.bf16.gmra.mrb[24].mxu0 %v1261_v36  ;;  %627 = vmatmul.mubr.bf16.gmra.mrb[24].mxu1 %v1262_v37 }
  0x5b   : > { %1014 = vmatprep.mubr.msk.bf16.mxu0 %vm433_vm0, %v1263_v38  ;;  %1022 = vmatprep.mubr.msk.bf16.mxu1 %vm433_vm0, %v1265_v39 }
  0x62   : > { %571 = vmatmul.mubr.bf16.gmra.mrb[28].mxu0 %v1267_v40  ;;  %635 = vmatmul.mubr.bf16.gmra.mrb[28].mxu1 %v1268_v41 }
  0xfd   : > { %v516_v43 = vpop.f32.mrb[0].mxu0  ;;  %v580_v44 = vpop.f32.mrb[0].mxu1 }
  0xfe   : > { %v517_v45 = vadd.f32 %v1392_v42, %v516_v43  ;;  %v581_v46 = vadd.f32 %v1392_v42, %v580_v44  ;;  %v518_v47 = vpop.f32.mrb[1].mxu0  ;;  %v582_v48 = vpop.f32.mrb[1].mxu1 }
  0xff   : > { %v519_v49 = vpop.f32.mrb[2].mxu0  ;;  %v583_v50 = vpop.f32.mrb[2].mxu1 }
 0x100   : > { %v675_v51 = vmul.f32 0.1, %v517_v45  ;;  %v691_v52 = vmul.f32 0.1, %v581_v46  ;;  %v520_v53 = vadd.f32 %v1392_v42, %v519_v49  ;;  %v584_v54 = vadd.f32 %v1392_v42, %v583_v50  ;;  %v521_v55 = vpop.f32.mrb[3].mxu0  ;;  %v585_v56 = vpop.f32.mrb[3].mxu1 }
 0x101   : > { %vm643_vm1 = vcmp.gt.f32.partialorder %v517_v45, 0.0  ;;  %vm659_vm2 = vcmp.gt.f32.partialorder %v581_v46, 0.0 }
 0x102   : > { %vm644_vm3 = vcmp.gt.f32.partialorder %v520_v53, 0.0  ;;  %v676_v57 = vmul.f32 0.1, %v520_v53  ;;  %vm660_vm4 = vcmp.gt.f32.partialorder %v584_v54, 0.0  ;;  %v692_v58 = vmul.f32 0.1, %v584_v54 }
 0x103   : > { %v707_v59 = vsel %vm643_vm1, %v517_v45, %v675_v51  ;;  %v723_v60 = vsel %vm659_vm2, %v581_v46, %v691_v52 }
 0x104   : > { %v708_v61 = vsel %vm644_vm3, %v520_v53, %v676_v57  ;;  %v724_v62 = vsel %vm660_vm4, %v584_v54, %v692_v58 }
 0x105   : > { %v524_v63 = vpop.f32.mrb[4].mxu0  ;;  %v588_v0 = vpop.f32.mrb[4].mxu1  ;;  %v1093_v1 = vpack.c.bf16 %v708_v61, %v707_v59  ;;  %v1133_v2 = vpack.c.bf16 %v724_v62, %v723_v60 }
 0x106   : > { %v525_v3 = vadd.f32 %v1392_v42, %v524_v63  ;;  %v589_v4 = vadd.f32 %v1392_v42, %v588_v0  ;;  %v526_v5 = vpop.f32.mrb[5].mxu0  ;;  %v590_v6 = vpop.f32.mrb[5].mxu1 }
 0x107   : > { %v527_v7 = vpop.f32.mrb[6].mxu0  ;;  %v591_v8 = vpop.f32.mrb[6].mxu1  ;;  %1094 = vst [vmem:[%s1402_s17] sm:$0xff] %v1093_v1   ;;  %1177 = vst [vmem:[%s1402_s17 + $0x40] sm:$0xff] %v1133_v2  }
 0x108   : > { %v677_v9 = vmul.f32 0.1, %v525_v3  ;;  %v693_v10 = vmul.f32 0.1, %v589_v4  ;;  %v528_v11 = vadd.f32 %v1392_v42, %v527_v7  ;;  %v592_v12 = vadd.f32 %v1392_v42, %v591_v8  ;;  %v529_v13 = vpop.f32.mrb[7].mxu0  ;;  %v593_v14 = vpop.f32.mrb[7].mxu1 }
 0x109   : > { %vm645_vm5 = vcmp.gt.f32.partialorder %v525_v3, 0.0  ;;  %vm661_vm6 = vcmp.gt.f32.partialorder %v589_v4, 0.0 }
 0x10a   : > { %vm646_vm7 = vcmp.gt.f32.partialorder %v528_v11, 0.0  ;;  %v678_v15 = vmul.f32 0.1, %v528_v11  ;;  %vm662_vm8 = vcmp.gt.f32.partialorder %v592_v12, 0.0  ;;  %v694_v16 = vmul.f32 0.1, %v592_v12 }
 0x10b   : > { %v709_v17 = vsel %vm645_vm5, %v525_v3, %v677_v9  ;;  %v725_v18 = vsel %vm661_vm6, %v589_v4, %v693_v10 }
 0x10c   : > { %v710_v19 = vsel %vm646_vm7, %v528_v11, %v678_v15  ;;  %v726_v20 = vsel %vm662_vm8, %v592_v12, %v694_v16 }
 0x10d   : > { %v532_v21 = vpop.f32.mrb[8].mxu0  ;;  %v596_v22 = vpop.f32.mrb[8].mxu1  ;;  %v1098_v23 = vpack.c.bf16 %v710_v19, %v709_v17  ;;  %v1138_v24 = vpack.c.bf16 %v726_v20, %v725_v18 }
 0x10e   : > { %v533_v25 = vadd.f32 %v1392_v42, %v532_v21  ;;  %v597_v26 = vadd.f32 %v1392_v42, %v596_v22  ;;  %v534_v27 = vpop.f32.mrb[9].mxu0  ;;  %v598_v28 = vpop.f32.mrb[9].mxu1 }
 0x10f   : > { %v535_v29 = vpop.f32.mrb[10].mxu0  ;;  %v599_v30 = vpop.f32.mrb[10].mxu1  ;;  %1170 = vst [vmem:[%s1402_s17 + $0x8] sm:$0xff] %v1098_v23   ;;  %1178 = vst [vmem:[%s1402_s17 + $0x48] sm:$0xff] %v1138_v24  }
 0x110   : > { %v679_v31 = vmul.f32 0.1, %v533_v25  ;;  %v695_v32 = vmul.f32 0.1, %v597_v26  ;;  %v536_v33 = vadd.f32 %v1392_v42, %v535_v29  ;;  %v600_v34 = vadd.f32 %v1392_v42, %v599_v30  ;;  %v537_v35 = vpop.f32.mrb[11].mxu0  ;;  %v601_v36 = vpop.f32.mrb[11].mxu1 }
 0x111   : > { %vm647_vm9 = vcmp.gt.f32.partialorder %v533_v25, 0.0  ;;  %vm663_vm10 = vcmp.gt.f32.partialorder %v597_v26, 0.0 }
 0x112   : > { %vm648_vm11 = vcmp.gt.f32.partialorder %v536_v33, 0.0  ;;  %v680_v37 = vmul.f32 0.1, %v536_v33  ;;  %vm664_vm12 = vcmp.gt.f32.partialorder %v600_v34, 0.0  ;;  %v696_v38 = vmul.f32 0.1, %v600_v34 }
 0x113   : > { %v711_v39 = vsel %vm647_vm9, %v533_v25, %v679_v31  ;;  %v727_v40 = vsel %vm663_vm10, %v597_v26, %v695_v32 }
 0x114   : > { %v712_v41 = vsel %vm648_vm11, %v536_v33, %v680_v37  ;;  %v728_v43 = vsel %vm664_vm12, %v600_v34, %v696_v38 }
 0x115   : > { %v540_v44 = vpop.f32.mrb[12].mxu0  ;;  %v604_v45 = vpop.f32.mrb[12].mxu1  ;;  %v1103_v46 = vpack.c.bf16 %v712_v41, %v711_v39  ;;  %v1143_v47 = vpack.c.bf16 %v728_v43, %v727_v40 }
 0x116   : > { %v541_v48 = vadd.f32 %v1392_v42, %v540_v44  ;;  %v605_v49 = vadd.f32 %v1392_v42, %v604_v45  ;;  %v542_v50 = vpop.f32.mrb[13].mxu0  ;;  %v606_v51 = vpop.f32.mrb[13].mxu1 }
 0x117   : > { %v543_v52 = vpop.f32.mrb[14].mxu0  ;;  %v607_v53 = vpop.f32.mrb[14].mxu1  ;;  %1171 = vst [vmem:[%s1402_s17 + $0x10] sm:$0xff] %v1103_v46   ;;  %1179 = vst [vmem:[%s1402_s17 + $0x50] sm:$0xff] %v1143_v47  }
 0x118   : > { %v681_v54 = vmul.f32 0.1, %v541_v48  ;;  %v697_v55 = vmul.f32 0.1, %v605_v49  ;;  %v544_v56 = vadd.f32 %v1392_v42, %v543_v52  ;;  %v608_v57 = vadd.f32 %v1392_v42, %v607_v53  ;;  %v545_v58 = vpop.f32.mrb[15].mxu0  ;;  %v609_v59 = vpop.f32.mrb[15].mxu1 }
 0x119   : > { %vm649_vm13 = vcmp.gt.f32.partialorder %v541_v48, 0.0  ;;  %vm665_vm14 = vcmp.gt.f32.partialorder %v605_v49, 0.0 }
 0x11a   : > { %vm650_vm15 = vcmp.gt.f32.partialorder %v544_v56, 0.0  ;;  %v682_v60 = vmul.f32 0.1, %v544_v56  ;;  %vm666_vm0 = vcmp.gt.f32.partialorder %v608_v57, 0.0  ;;  %v698_v61 = vmul.f32 0.1, %v608_v57 }
 0x11b   : > { %v713_v62 = vsel %vm649_vm13, %v541_v48, %v681_v54  ;;  %v729_v63 = vsel %vm665_vm14, %v605_v49, %v697_v55 }
 0x11c   : > { %v714_v0 = vsel %vm650_vm15, %v544_v56, %v682_v60  ;;  %v730_v1 = vsel %vm666_vm0, %v608_v57, %v698_v61 }
 0x11d   : > { %v548_v2 = vpop.f32.mrb[16].mxu0  ;;  %v612_v3 = vpop.f32.mrb[16].mxu1  ;;  %v1108_v4 = vpack.c.bf16 %v714_v0, %v713_v62  ;;  %v1148_v5 = vpack.c.bf16 %v730_v1, %v729_v63 }
 0x11e   : > { %v549_v6 = vadd.f32 %v1392_v42, %v548_v2  ;;  %v613_v7 = vadd.f32 %v1392_v42, %v612_v3  ;;  %v550_v8 = vpop.f32.mrb[17].mxu0  ;;  %v614_v9 = vpop.f32.mrb[17].mxu1 }
 0x11f   : > { %v551_v10 = vpop.f32.mrb[18].mxu0  ;;  %v615_v11 = vpop.f32.mrb[18].mxu1  ;;  %1172 = vst [vmem:[%s1402_s17 + $0x18] sm:$0xff] %v1108_v4   ;;  %1180 = vst [vmem:[%s1402_s17 + $0x58] sm:$0xff] %v1148_v5  }
 0x120   : > { %v683_v12 = vmul.f32 0.1, %v549_v6  ;;  %v699_v13 = vmul.f32 0.1, %v613_v7  ;;  %v552_v14 = vadd.f32 %v1392_v42, %v551_v10  ;;  %v616_v15 = vadd.f32 %v1392_v42, %v615_v11  ;;  %v553_v16 = vpop.f32.mrb[19].mxu0  ;;  %v617_v17 = vpop.f32.mrb[19].mxu1 }
 0x121   : > { %vm651_vm1 = vcmp.gt.f32.partialorder %v549_v6, 0.0  ;;  %vm667_vm2 = vcmp.gt.f32.partialorder %v613_v7, 0.0 }
 0x122   : > { %vm652_vm3 = vcmp.gt.f32.partialorder %v552_v14, 0.0  ;;  %v684_v18 = vmul.f32 0.1, %v552_v14  ;;  %vm668_vm4 = vcmp.gt.f32.partialorder %v616_v15, 0.0  ;;  %v700_v19 = vmul.f32 0.1, %v616_v15 }
 0x123   : > { %v715_v20 = vsel %vm651_vm1, %v549_v6, %v683_v12  ;;  %v731_v21 = vsel %vm667_vm2, %v613_v7, %v699_v13 }
 0x124   : > { %v716_v22 = vsel %vm652_vm3, %v552_v14, %v684_v18  ;;  %v732_v23 = vsel %vm668_vm4, %v616_v15, %v700_v19 }
 0x125   : > { %v556_v24 = vpop.f32.mrb[20].mxu0  ;;  %v620_v25 = vpop.f32.mrb[20].mxu1  ;;  %v1113_v26 = vpack.c.bf16 %v716_v22, %v715_v20  ;;  %v1153_v27 = vpack.c.bf16 %v732_v23, %v731_v21 }
 0x126   : > { %v557_v28 = vadd.f32 %v1392_v42, %v556_v24  ;;  %v621_v29 = vadd.f32 %v1392_v42, %v620_v25  ;;  %v558_v30 = vpop.f32.mrb[21].mxu0  ;;  %v622_v31 = vpop.f32.mrb[21].mxu1 }
 0x127   : > { %v559_v32 = vpop.f32.mrb[22].mxu0  ;;  %v623_v33 = vpop.f32.mrb[22].mxu1  ;;  %1173 = vst [vmem:[%s1402_s17 + $0x20] sm:$0xff] %v1113_v26   ;;  %1181 = vst [vmem:[%s1402_s17 + $0x60] sm:$0xff] %v1153_v27  }
 0x128   : > { %v685_v34 = vmul.f32 0.1, %v557_v28  ;;  %v701_v35 = vmul.f32 0.1, %v621_v29  ;;  %v560_v36 = vadd.f32 %v1392_v42, %v559_v32  ;;  %v624_v37 = vadd.f32 %v1392_v42, %v623_v33  ;;  %v561_v38 = vpop.f32.mrb[23].mxu0  ;;  %v625_v39 = vpop.f32.mrb[23].mxu1 }
 0x129   : > { %vm653_vm5 = vcmp.gt.f32.partialorder %v557_v28, 0.0  ;;  %vm669_vm6 = vcmp.gt.f32.partialorder %v621_v29, 0.0 }
 0x12a   : > { %vm654_vm7 = vcmp.gt.f32.partialorder %v560_v36, 0.0  ;;  %v686_v40 = vmul.f32 0.1, %v560_v36  ;;  %vm670_vm8 = vcmp.gt.f32.partialorder %v624_v37, 0.0  ;;  %v702_v41 = vmul.f32 0.1, %v624_v37 }
 0x12b   : > { %v717_v43 = vsel %vm653_vm5, %v557_v28, %v685_v34  ;;  %v733_v44 = vsel %vm669_vm6, %v621_v29, %v701_v35 }
 0x12c   : > { %v718_v45 = vsel %vm654_vm7, %v560_v36, %v686_v40  ;;  %v734_v46 = vsel %vm670_vm8, %v624_v37, %v702_v41 }
 0x12d   : > { %v564_v47 = vpop.f32.mrb[24].mxu0  ;;  %v628_v48 = vpop.f32.mrb[24].mxu1  ;;  %v1118_v49 = vpack.c.bf16 %v718_v45, %v717_v43  ;;  %v1158_v50 = vpack.c.bf16 %v734_v46, %v733_v44 }
 0x12e   : > { %v565_v51 = vadd.f32 %v1392_v42, %v564_v47  ;;  %v629_v52 = vadd.f32 %v1392_v42, %v628_v48  ;;  %v566_v53 = vpop.f32.mrb[25].mxu0  ;;  %v630_v54 = vpop.f32.mrb[25].mxu1 }
 0x12f   : > { %v567_v55 = vpop.f32.mrb[26].mxu0  ;;  %v631_v56 = vpop.f32.mrb[26].mxu1  ;;  %1174 = vst [vmem:[%s1402_s17 + $0x28] sm:$0xff] %v1118_v49   ;;  %1182 = vst [vmem:[%s1402_s17 + $0x68] sm:$0xff] %v1158_v50  }
 0x130   : > { %v687_v57 = vmul.f32 0.1, %v565_v51  ;;  %v703_v58 = vmul.f32 0.1, %v629_v52  ;;  %v568_v59 = vadd.f32 %v1392_v42, %v567_v55  ;;  %v632_v60 = vadd.f32 %v1392_v42, %v631_v56  ;;  %v569_v61 = vpop.f32.mrb[27].mxu0  ;;  %v633_v62 = vpop.f32.mrb[27].mxu1 }
 0x131   : > { %vm655_vm9 = vcmp.gt.f32.partialorder %v565_v51, 0.0  ;;  %vm671_vm10 = vcmp.gt.f32.partialorder %v629_v52, 0.0 }
 0x132   : > { %vm656_vm11 = vcmp.gt.f32.partialorder %v568_v59, 0.0  ;;  %v688_v63 = vmul.f32 0.1, %v568_v59  ;;  %vm672_vm12 = vcmp.gt.f32.partialorder %v632_v60, 0.0  ;;  %v704_v0 = vmul.f32 0.1, %v632_v60 }
 0x133   : > { %v719_v1 = vsel %vm655_vm9, %v565_v51, %v687_v57  ;;  %v735_v2 = vsel %vm671_vm10, %v629_v52, %v703_v58 }
 0x134   : > { %v720_v3 = vsel %vm656_vm11, %v568_v59, %v688_v63  ;;  %v736_v4 = vsel %vm672_vm12, %v632_v60, %v704_v0 }
 0x135   : > { %v572_v5 = vpop.f32.mrb[28].mxu0  ;;  %v636_v6 = vpop.f32.mrb[28].mxu1  ;;  %v1123_v7 = vpack.c.bf16 %v720_v3, %v719_v1  ;;  %v1163_v8 = vpack.c.bf16 %v736_v4, %v735_v2 }
 0x136   : > { %v573_v9 = vadd.f32 %v1392_v42, %v572_v5  ;;  %v637_v10 = vadd.f32 %v1392_v42, %v636_v6  ;;  %v574_v11 = vpop.f32.mrb[29].mxu0  ;;  %v638_v12 = vpop.f32.mrb[29].mxu1 }
 0x137   : > { %v575_v13 = vpop.f32.mrb[30].mxu0  ;;  %v639_v14 = vpop.f32.mrb[30].mxu1  ;;  %1175 = vst [vmem:[%s1402_s17 + $0x30] sm:$0xff] %v1123_v7   ;;  %1183 = vst [vmem:[%s1402_s17 + $0x70] sm:$0xff] %v1163_v8  }
 0x138   : > { %v689_v15 = vmul.f32 0.1, %v573_v9  ;;  %v705_v16 = vmul.f32 0.1, %v637_v10  ;;  %v576_v17 = vadd.f32 %v1392_v42, %v575_v13  ;;  %v640_v18 = vadd.f32 %v1392_v42, %v639_v14  ;;  %v577_v19 = vpop.f32.mrb[31].mxu0  ;;  %v641_v20 = vpop.f32.mrb[31].mxu1 }
 0x139   : > { %vm657_vm13 = vcmp.gt.f32.partialorder %v573_v9, 0.0  ;;  %vm673_vm14 = vcmp.gt.f32.partialorder %v637_v10, 0.0 }
 0x13a   : > { %vm658_vm15 = vcmp.gt.f32.partialorder %v576_v17, 0.0  ;;  %v690_v21 = vmul.f32 0.1, %v576_v17  ;;  %vm674_vm0 = vcmp.gt.f32.partialorder %v640_v18, 0.0  ;;  %v706_v22 = vmul.f32 0.1, %v640_v18 }
 0x13b   : > { %v721_v23 = vsel %vm657_vm13, %v573_v9, %v689_v15  ;;  %v737_v24 = vsel %vm673_vm14, %v637_v10, %v705_v16 }
 0x13c   : > { %v722_v25 = vsel %vm658_vm15, %v576_v17, %v690_v21  ;;  %v738_v26 = vsel %vm674_vm0, %v640_v18, %v706_v22 }
 0x13d   : > { %v1128_v27 = vpack.c.bf16 %v722_v25, %v721_v23  ;;  %v1168_v28 = vpack.c.bf16 %v738_v26, %v737_v24 }
 0x13f   : > { %1176 = vst [vmem:[%s1402_s17 + $0x38] sm:$0xff] %v1128_v27   ;;  %1184 = vst [vmem:[%s1402_s17 + $0x78] sm:$0xff] %v1168_v28  }
 0x140 PF: > { %s13_s12 = sadd.s32 1, %s1275_s12  }
 0x141   : > { %p10_p4 = scmp.ge.s32.totalorder %s13_s12, 4  }
 0x143   :  { %12 = sbr.rel (!%p10_p4) target bundleno = 1 (0x1), region = 62 }

// kernel: _forward_impl.13
= control target key start
LH: loop header
LB: loop body
LE: loop exit
PB: predicated region body
PF: predicated region fallthrough
CT: control target
= control target key end

     0   :  { %s650_s12 = smov 0   ;;  %s721_s0 = inlined_call_operand.vmem [shape: bf16[128,144], index: 0, kind: input, shape index: {}]   ;;  %s722_s1 = inlined_call_operand.vmem [shape: bf16[144,128], index: 1, kind: input, shape index: {}]   ;;  %s723_s2 = inlined_call_operand.vmem [shape: f32[1,128], index: 2, kind: input, shape index: {}]   ;;  %s724_s3 = inlined_call_operand.vmem [shape: bf16[128,128], index: 3, kind: output, shape index: {}]  }
   0x1 LB: > { %s499_s13 = sadd.s32 4294967295, %s627_s12   ;;  %p503_p0 = scmp.ge.s32.totalorder %s627_s12, 1  ;;  %s627_s12 = sphi %s650_s12, %s13_s12  }
   0x2   : > { %p139_p1 = scmp.lt.s32.totalorder %s627_s12, 3 }
   0x4   : > { %p140_p2 = pnand %p503_p0, %p139_p1 }
   0x5   : > { %v600_v0 = vld [vmem:[%s722_s1] sm:$0xff] (!%p140_p2)   ;;  %v629_v1 = vmov (!%p140_p2), 0   ;;  %s504_s16 = sshll.u32 (!%p140_p2), %s499_s13, 3  ;;  %v601_v2 = vld [vmem:[%s722_s1 + $0x8] sm:$0xff] (!%p140_p2)   ;;  %v602_v3 = vld [vmem:[%s722_s1 + $0x10] sm:$0xff] (!%p140_p2)   ;;  %vm301_vm0 = vcmask (!%p140_p2), 130048  }
   0x6   : > { %143 = sbr.rel (%p140_p2) target bundleno = 272 (0x110), region = 32  ;;  %314 = vmatprep.subr.bf16.mxu0 (!%p140_p2), %v629_v1  ;;  %573 = vmatprep.subr.bf16.mxu1 (!%p140_p2), %v629_v1  ;;  %p165_p3 = scmp.lt.s32.totalorder (!%p140_p2), %s504_s16, 15  ;;  %v603_v4 = vld [vmem:[%s722_s1 + $0x18] sm:$0xff] (!%p140_p2)   ;;  %v604_v7 = vld [vmem:[%s722_s1 + $0x20] sm:$0xff] (!%p140_p2)   ;;  %v605_v8 = vld [vmem:[%s722_s1 + $0x28] sm:$0xff] (!%p140_p2)  }
   0x7   : > { %315 = vmatpush1.bf16.msra.mxu0 (!%p140_p2), %v600_v0  ;;  %582 = vmatpush1.bf16.msra.mxu1 (!%p140_p2), %v600_v0  ;;  %v606_v9 = vld [vmem:[%s722_s1 + $0x30] sm:$0xff] (!%p140_p2)   ;;  %v607_v10 = vld [vmem:[%s722_s1 + $0x38] sm:$0xff] (!%p140_p2)   ;;  %v608_v11 = vld [vmem:[%s722_s1 + $0x40] sm:$0xff] (!%p140_p2)  }
   0x8   : > { %316 = vmatprep.subr.bf16.mxu0 (!%p140_p2), %v629_v1  ;;  %574 = vmatprep.subr.bf16.mxu1 (!%p140_p2), %v629_v1  ;;  %v509_v18 = vld [vmem:[%s723_s2] ss:$0 sm:$0xff] (!%p140_p2) }
   0xb   : > { %317 = vmatpush1.bf16.msra.mxu0 (!%p140_p2), %v601_v2  ;;  %583 = vmatpush1.bf16.msra.mxu1 (!%p140_p2), %v601_v2 }
   0xc   : > { %318 = vmatprep.subr.bf16.mxu0 (!%p140_p2), %v629_v1  ;;  %575 = vmatprep.subr.bf16.mxu1 (!%p140_p2), %v629_v1 }
   0xd   : > { %s726_s16 = smov (!%p165_p3, %s504_s16), 15 }
   0xe   : > { %s541_s21 = sshll.u32 %s726_s16, 3  ;;  %s508_s13 = sshll.u32 %s726_s16, 2 }
   0xf   : > { %s673_s24 = scalar_lea.vmem %s721_s0, %s541_s21  ;;  %319 = vmatpush1.bf16.msra.mxu0 %v602_v3  ;;  %584 = vmatpush1.bf16.msra.mxu1 %v602_v3  ;;  %s712_s17 = scalar_lea.vmem %s724_s3, %s508_s13 }
  0x10   : > { %v611_v5 = vld [vmem:[%s673_s24 + $0x4] ss:$8 sps:$4 sm:$0xff]   ;;  %320 = vmatprep.subr.bf16.mxu0 %v629_v1  ;;  %576 = vmatprep.subr.bf16.mxu1 %v629_v1  ;;  %v609_v12 = vld [vmem:[%s673_s24] ss:$8 sps:$4 sm:$0xff]   ;;  %v615_v14 = vld [vmem:[%s673_s24 + $0x14] ss:$8 sps:$4 sm:$0xff]  }
  0x11   : > { %v614_v6 = vld [vmem:[%s673_s24 + $0x24] ss:$8 sps:$4 sm:$0xff]   ;;  %527 = vmatprep.mubr.msk.bf16.mxu0 %vm301_vm0, %v611_v5  ;;  %v612_v13 = vld [vmem:[%s673_s24 + $0x20] ss:$8 sps:$4 sm:$0xff]   ;;  %v617_v15 = vld [vmem:[%s673_s24 + $0x34] ss:$8 sps:$4 sm:$0xff]  }
  0x12   : > { %529 = vmatprep.mubr.msk.bf16.mxu1 %vm301_vm0, %v614_v6  ;;  %v619_v16 = vld [vmem:[%s673_s24 + $0x10] ss:$8 sps:$4 sm:$0xff]  }
  0x13   : > { %321 = vmatpush1.bf16.msra.mxu0 %v603_v4  ;;  %585 = vmatpush1.bf16.msra.mxu1 %v603_v4  ;;  %v620_v17 = vld [vmem:[%s673_s24 + $0x30] ss:$8 sps:$4 sm:$0xff]  }
  0x14   : > { %322 = vmatprep.subr.bf16.mxu0 %v629_v1  ;;  %577 = vmatprep.subr.bf16.mxu1 %v629_v1 }
  0x17   : > { %323 = vmatpush1.bf16.msra.mxu0 %v604_v7  ;;  %586 = vmatpush1.bf16.msra.mxu1 %v604_v7 }
  0x18   : > { %324 = vmatprep.subr.bf16.mxu0 %v629_v1  ;;  %578 = vmatprep.subr.bf16.mxu1 %v629_v1 }
  0x1b   : > { %325 = vmatpush1.bf16.msra.mxu0 %v605_v8  ;;  %587 = vmatpush1.bf16.msra.mxu1 %v605_v8 }
  0x1c   : > { %326 = vmatprep.subr.bf16.mxu0 %v629_v1  ;;  %579 = vmatprep.subr.bf16.mxu1 %v629_v1 }
  0x1f   : > { %327 = vmatpush1.bf16.msra.mxu0 %v606_v9  ;;  %588 = vmatpush1.bf16.msra.mxu1 %v606_v9 }
  0x20   : > { %328 = vmatprep.subr.bf16.mxu0 %v629_v1  ;;  %580 = vmatprep.subr.bf16.mxu1 %v629_v1 }
  0x23   : > { %329 = vmatpush1.bf16.msra.mxu0 %v607_v10  ;;  %589 = vmatpush1.bf16.msra.mxu1 %v607_v10 }
  0x24   : > { %330 = vmatprep.subr.bf16.mxu0 %v629_v1  ;;  %581 = vmatprep.subr.bf16.mxu1 %v629_v1 }
  0x27   : > { %331 = vmatpush1.bf16.msra.mxu0 %v608_v11  ;;  %590 = vmatpush1.bf16.msra.mxu1 %v608_v11 }
  0x2a   : > { %347 = vmatmul.mubr.bf16.vlgmr.msra.gmra.mrb[0].mxu0 %v609_v12  ;;  %363 = vmatmul.mubr.bf16.vlgmr.msra.gmra.mrb[0].mxu1 %v612_v13 }
  0x2b   : > { %528 = vmatprep.mubr.msk.bf16.mxu0 %vm301_vm0, %v615_v14  ;;  %530 = vmatprep.mubr.msk.bf16.mxu1 %vm301_vm0, %v617_v15 }
  0x32   : > { %355 = vmatmul.mubr.bf16.gmra.mrb[4].mxu0 %v619_v16  ;;  %371 = vmatmul.mubr.bf16.gmra.mrb[4].mxu1 %v620_v17 }
  0xfd   : > { %v348_v19 = vpop.f32.mrb[0].mxu0  ;;  %v364_v20 = vpop.f32.mrb[0].mxu1 }
  0xfe   : > { %v349_v21 = vadd.f32 %v509_v18, %v348_v19  ;;  %v365_v22 = vadd.f32 %v509_v18, %v364_v20  ;;  %v350_v23 = vpop.f32.mrb[1].mxu0  ;;  %v366_v24 = vpop.f32.mrb[1].mxu1 }
  0xff   : > { %v351_v25 = vpop.f32.mrb[2].mxu0  ;;  %v367_v26 = vpop.f32.mrb[2].mxu1 }
 0x100   : > { %v387_v27 = vmul.f32 0.1, %v349_v21  ;;  %v391_v28 = vmul.f32 0.1, %v365_v22  ;;  %v352_v29 = vadd.f32 %v509_v18, %v351_v25  ;;  %v368_v30 = vadd.f32 %v509_v18, %v367_v26  ;;  %v353_v31 = vpop.f32.mrb[3].mxu0  ;;  %v369_v32 = vpop.f32.mrb[3].mxu1 }
 0x101   : > { %vm379_vm1 = vcmp.gt.f32.partialorder %v349_v21, 0.0  ;;  %vm383_vm2 = vcmp.gt.f32.partialorder %v365_v22, 0.0 }
 0x102   : > { %vm380_vm3 = vcmp.gt.f32.partialorder %v352_v29, 0.0  ;;  %v388_v33 = vmul.f32 0.1, %v352_v29  ;;  %vm384_vm4 = vcmp.gt.f32.partialorder %v368_v30, 0.0  ;;  %v392_v34 = vmul.f32 0.1, %v368_v30 }
 0x103   : > { %v395_v35 = vsel %vm379_vm1, %v349_v21, %v387_v27  ;;  %v399_v36 = vsel %vm383_vm2, %v365_v22, %v391_v28 }
 0x104   : > { %v396_v37 = vsel %vm380_vm3, %v352_v29, %v388_v33  ;;  %v400_v38 = vsel %vm384_vm4, %v368_v30, %v392_v34 }
 0x105   : > { %v356_v39 = vpop.f32.mrb[4].mxu0  ;;  %v372_v40 = vpop.f32.mrb[4].mxu1  ;;  %v553_v41 = vpack.c.bf16 %v396_v37, %v395_v35  ;;  %v563_v42 = vpack.c.bf16 %v400_v38, %v399_v36 }
 0x106   : > { %v357_v43 = vadd.f32 %v509_v18, %v356_v39  ;;  %v373_v44 = vadd.f32 %v509_v18, %v372_v40  ;;  %v358_v45 = vpop.f32.mrb[5].mxu0  ;;  %v374_v46 = vpop.f32.mrb[5].mxu1 }
 0x107   : > { %v359_v47 = vpop.f32.mrb[6].mxu0  ;;  %v375_v48 = vpop.f32.mrb[6].mxu1  ;;  %554 = vst [vmem:[%s712_s17] sm:$0xff] %v553_v41   ;;  %571 = vst [vmem:[%s712_s17 + $0x10] sm:$0xff] %v563_v42  }
 0x108   : > { %v389_v49 = vmul.f32 0.1, %v357_v43  ;;  %v393_v50 = vmul.f32 0.1, %v373_v44  ;;  %v360_v51 = vadd.f32 %v509_v18, %v359_v47  ;;  %v376_v52 = vadd.f32 %v509_v18, %v375_v48  ;;  %v361_v53 = vpop.f32.mrb[7].mxu0  ;;  %v377_v54 = vpop.f32.mrb[7].mxu1 }
 0x109   : > { %vm381_vm5 = vcmp.gt.f32.partialorder %v357_v43, 0.0  ;;  %vm385_vm6 = vcmp.gt.f32.partialorder %v373_v44, 0.0 }
 0x10a   : > { %vm382_vm7 = vcmp.gt.f32.partialorder %v360_v51, 0.0  ;;  %v390_v55 = vmul.f32 0.1, %v360_v51  ;;  %vm386_vm8 = vcmp.gt.f32.partialorder %v376_v52, 0.0  ;;  %v394_v56 = vmul.f32 0.1, %v376_v52 }
 0x10b   : > { %v397_v57 = vsel %vm381_vm5, %v357_v43, %v389_v49  ;;  %v401_v58 = vsel %vm385_vm6, %v373_v44, %v393_v50 }
 0x10c   : > { %v398_v59 = vsel %vm382_vm7, %v360_v51, %v390_v55  ;;  %v402_v60 = vsel %vm386_vm8, %v376_v52, %v394_v56 }
 0x10d   : > { %v558_v61 = vpack.c.bf16 %v398_v59, %v397_v57  ;;  %v568_v62 = vpack.c.bf16 %v402_v60, %v401_v58 }
 0x10f   : > { %570 = vst [vmem:[%s712_s17 + $0x8] sm:$0xff] %v558_v61   ;;  %572 = vst [vmem:[%s712_s17 + $0x18] sm:$0xff] %v568_v62  }
 0x110 PF: > { %s13_s12 = sadd.s32 1, %s627_s12  }
 0x111   : > { %p10_p4 = scmp.ge.s32.totalorder %s13_s12, 4  }
 0x113   :  { %12 = sbr.rel (!%p10_p4) target bundleno = 1 (0x1), region = 62 }

// kernel: _forward_impl.16
= control target key start
LH: loop header
LB: loop body
LE: loop exit
PB: predicated region body
PF: predicated region fallthrough
CT: control target
= control target key end

     0   :  { %s549_s12 = smov 0   ;;  %s585_s0 = inlined_call_operand.vmem [shape: bf16[128,32], index: 0, kind: input, shape index: {}]   ;;  %s586_s1 = inlined_call_operand.vmem [shape: bf16[32,128], index: 1, kind: input, shape index: {}]   ;;  %s587_s2 = inlined_call_operand.vmem [shape: f32[1,128], index: 2, kind: input, shape index: {}]   ;;  %s588_s3 = inlined_call_operand.vmem [shape: bf16[128,128], index: 3, kind: output, shape index: {}]  }
   0x1 LB: > { %s424_s13 = sadd.s32 4294967295, %s527_s12   ;;  %p428_p0 = scmp.ge.s32.totalorder %s527_s12, 1  ;;  %s527_s12 = sphi %s549_s12, %s13_s12  }
   0x2   : > { %p138_p1 = scmp.lt.s32.totalorder %s527_s12, 3 }
   0x4   : > { %p139_p2 = pnand %p428_p0, %p138_p1 }
   0x5   : > { %v515_v0 = vld [vmem:[%s586_s1] sm:$0xff] (!%p139_p2)   ;;  %s429_s16 = sshll.u32 (!%p139_p2), %s424_s13, 3  ;;  %v516_v1 = vld [vmem:[%s586_s1 + $0x8] sm:$0xff] (!%p139_p2)   ;;  %vm226_vm0 = vcmask (!%p139_p2), 261120  }
   0x6   : > { %142 = sbr.rel (%p139_p2) target bundleno = 244 (0xf4), region = 32  ;;  %p163_p3 = scmp.lt.s32.totalorder (!%p139_p2), %s429_s16, 15  ;;  %491 = vmatprep.subr.bf16.mxu0 (!%p139_p2), %v515_v0  ;;  %503 = vmatprep.subr.bf16.mxu1 (!%p139_p2), %v515_v0  ;;  %v433_v6 = vld [vmem:[%s587_s2] ss:$0 sm:$0xff] (!%p139_p2) }
   0x7   : > { %492 = vmatpush3.bf16.msra.mxu0 (!%p139_p2), %v515_v0  ;;  %505 = vmatpush3.bf16.msra.mxu1 (!%p139_p2), %v515_v0 }
   0x8   : > { %493 = vmatprep.subr.bf16.mxu0 (!%p139_p2), %v516_v1  ;;  %504 = vmatprep.subr.bf16.mxu1 (!%p139_p2), %v516_v1 }
   0xb   : > { %494 = vmatpush3.bf16.msra.mxu0 (!%p139_p2), %v516_v1  ;;  %506 = vmatpush3.bf16.msra.mxu1 (!%p139_p2), %v516_v1 }
   0xd   : > { %s590_s16 = smov (!%p163_p3, %s429_s16), 15 }
   0xe   : > { %s430_s19 = sshll.u32 %s590_s16, 2 }
   0xf   : > { %s166_s22 = scalar_lea.vmem %s585_s0, %s430_s19  ;;  %s172_s27 = scalar_lea.vmem %s588_s3, %s430_s19 }
  0x10   : > { %v517_v2 = vld [vmem:[%s166_s22] sm:$0xff]   ;;  %v518_v3 = vld [vmem:[%s166_s22 + $0x10] sm:$0xff]   ;;  %v519_v4 = vld [vmem:[%s166_s22 + $0x8] sm:$0xff]  }
  0x11   : > { %495 = vmatprep.mubr.msk.bf16.mxu0 %vm226_vm0, %v517_v2  ;;  %499 = vmatprep.mubr.msk.bf16.mxu1 %vm226_vm0, %v518_v3  ;;  %v520_v5 = vld [vmem:[%s166_s22 + $0x18] sm:$0xff]  }
  0x12   : > { %496 = vmatmul.mubr.msk.bf16.vlgmr.msra.gmra.mrb[0].mxu0 %vm226_vm0, %v519_v4  ;;  %500 = vmatmul.mubr.msk.bf16.vlgmr.msra.gmra.mrb[0].mxu1 %vm226_vm0, %v520_v5 }
  0xe5   : > { %v497_v7 = vpop.f32.mrb[0].mxu0  ;;  %v501_v9 = vpop.f32.mrb[0].mxu1 }
  0xe6   : > { %v282_v8 = vadd.f32 %v497_v7, %v433_v6  ;;  %v273_v10 = vpop.f32.mrb[1].mxu0  ;;  %v298_v11 = vadd.f32 %v501_v9, %v433_v6  ;;  %v289_v13 = vpop.f32.mrb[1].mxu1 }
  0xe7   : > { %v274_v12 = vadd.f32 %v433_v6, %v273_v10  ;;  %v498_v14 = vpop.f32.mrb[2].mxu0  ;;  %v290_v16 = vadd.f32 %v433_v6, %v289_v13  ;;  %v502_v18 = vpop.f32.mrb[2].mxu1 }
  0xe8   : > { %v314_v15 = vmul.f32 0.1, %v282_v8  ;;  %v285_v17 = vadd.f32 %v498_v14, %v433_v6  ;;  %v276_v19 = vpop.f32.mrb[3].mxu0  ;;  %vm306_vm1 = vcmp.gt.f32.partialorder %v282_v8, 0.0  ;;  %vm310_vm2 = vcmp.gt.f32.partialorder %v298_v11, 0.0  ;;  %v292_v21 = vpop.f32.mrb[3].mxu1 }
  0xe9   : > { %v318_v20 = vmul.f32 0.1, %v298_v11  ;;  %vm304_vm4 = vcmp.gt.f32.partialorder %v274_v12, 0.0  ;;  %v312_v22 = vmul.f32 0.1, %v274_v12  ;;  %v301_v24 = vadd.f32 %v502_v18, %v433_v6 }
  0xea   : > { %vm307_vm3 = vcmp.gt.f32.partialorder %v285_v17, 0.0  ;;  %v315_v23 = vmul.f32 0.1, %v285_v17  ;;  %v322_v25 = vsel %vm306_vm1, %v282_v8, %v314_v15  ;;  %vm308_vm5 = vcmp.gt.f32.partialorder %v290_v16, 0.0 }
  0xeb   : > { %v277_v26 = vadd.f32 %v433_v6, %v276_v19  ;;  %v293_v27 = vadd.f32 %v433_v6, %v292_v21  ;;  %v316_v28 = vmul.f32 0.1, %v290_v16  ;;  %vm311_vm6 = vcmp.gt.f32.partialorder %v301_v24, 0.0 }
  0xec   : > { %v323_v29 = vsel %vm307_vm3, %v285_v17, %v315_v23  ;;  %v319_v30 = vmul.f32 0.1, %v301_v24  ;;  %v326_v33 = vsel %vm310_vm2, %v298_v11, %v318_v20  ;;  %v320_v36 = vsel %vm304_vm4, %v274_v12, %v312_v22 }
  0xed   : > { %v470_v31 = vpack.c.bf16 %v323_v29, %v322_v25  ;;  %vm305_vm7 = vcmp.gt.f32.partialorder %v277_v26, 0.0  ;;  %v313_v32 = vmul.f32 0.1, %v277_v26  ;;  %vm309_vm8 = vcmp.gt.f32.partialorder %v293_v27, 0.0 }
  0xee   : > { %v327_v34 = vsel %vm311_vm6, %v301_v24, %v319_v30  ;;  %v317_v35 = vmul.f32 0.1, %v293_v27  ;;  %v324_v39 = vsel %vm308_vm5, %v290_v16, %v316_v28 }
  0xef   : > { %482 = vst [vmem:[%s172_s27 + $0x8] sm:$0xff] %v470_v31   ;;  %v480_v37 = vpack.c.bf16 %v327_v34, %v326_v33  ;;  %v321_v38 = vsel %vm305_vm7, %v277_v26, %v313_v32 }
  0xf0   : > { %v465_v40 = vpack.c.bf16 %v321_v38, %v320_v36  ;;  %v325_v41 = vsel %vm309_vm8, %v293_v27, %v317_v35 }
  0xf1   : > { %484 = vst [vmem:[%s172_s27 + $0x18] sm:$0xff] %v480_v37   ;;  %v475_v42 = vpack.c.bf16 %v325_v41, %v324_v39 }
  0xf2   : > { %466 = vst [vmem:[%s172_s27] sm:$0xff] %v465_v40  }
  0xf3   : > { %483 = vst [vmem:[%s172_s27 + $0x10] sm:$0xff] %v475_v42  }
  0xf4 PF: > { %s13_s12 = sadd.s32 1, %s527_s12  }
  0xf5   : > { %p10_p4 = scmp.ge.s32.totalorder %s13_s12, 4  }
  0xf7   :  { %12 = sbr.rel (!%p10_p4) target bundleno = 1 (0x1), region = 62 }

// kernel: _forward_impl.14
= control target key start
LH: loop header
LB: loop body
LE: loop exit
PB: predicated region body
PF: predicated region fallthrough
CT: control target
= control target key end

     0   :  { %s525_s12 = smov 0   ;;  %s554_s0 = inlined_call_operand.vmem [shape: bf16[128,32], index: 0, kind: input, shape index: {}]   ;;  %s555_s1 = inlined_call_operand.vmem [shape: bf16[32,128], index: 1, kind: input, shape index: {}]   ;;  %s556_s2 = inlined_call_operand.vmem [shape: f32[1,128], index: 2, kind: input, shape index: {}]   ;;  %s557_s3 = inlined_call_operand.vmem [shape: bf16[128,128], index: 3, kind: output, shape index: {}]  }
   0x1 LB: > { %s400_s13 = sadd.s32 4294967295, %s503_s12   ;;  %p404_p0 = scmp.ge.s32.totalorder %s503_s12, 1  ;;  %s503_s12 = sphi %s525_s12, %s13_s12  }
   0x2   : > { %p138_p1 = scmp.lt.s32.totalorder %s503_s12, 3 }
   0x4   : > { %p139_p2 = pnand %p404_p0, %p138_p1 }
   0x5   : > { %v491_v0 = vld [vmem:[%s555_s1] sm:$0xff] (!%p139_p2)   ;;  %s405_s16 = sshll.u32 (!%p139_p2), %s400_s13, 3  ;;  %v492_v1 = vld [vmem:[%s555_s1 + $0x8] sm:$0xff] (!%p139_p2)   ;;  %vm226_vm0 = vcmask (!%p139_p2), 261120  }
   0x6   : > { %142 = sbr.rel (%p139_p2) target bundleno = 238 (0xee), region = 32  ;;  %p163_p3 = scmp.lt.s32.totalorder (!%p139_p2), %s405_s16, 15  ;;  %467 = vmatprep.subr.bf16.mxu0 (!%p139_p2), %v491_v0  ;;  %479 = vmatprep.subr.bf16.mxu1 (!%p139_p2), %v491_v0  ;;  %v409_v7 = vld [vmem:[%s556_s2] ss:$0 sm:$0xff] (!%p139_p2) }
   0x7   : > { %468 = vmatpush3.bf16.msra.mxu0 (!%p139_p2), %v491_v0  ;;  %481 = vmatpush3.bf16.msra.mxu1 (!%p139_p2), %v491_v0 }
   0x8   : > { %469 = vmatprep.subr.bf16.mxu0 (!%p139_p2), %v492_v1  ;;  %480 = vmatprep.subr.bf16.mxu1 (!%p139_p2), %v492_v1 }
   0xb   : > { %470 = vmatpush3.bf16.msra.mxu0 (!%p139_p2), %v492_v1  ;;  %482 = vmatpush3.bf16.msra.mxu1 (!%p139_p2), %v492_v1 }
   0xd   : > { %s559_s16 = smov (!%p163_p3, %s405_s16), 15 }
   0xe   : > { %s406_s19 = sshll.u32 %s559_s16, 2 }
   0xf   : > { %s166_s22 = scalar_lea.vmem %s554_s0, %s406_s19  ;;  %s172_s27 = scalar_lea.vmem %s557_s3, %s406_s19 }
  0x10   : > { %v493_v2 = vld [vmem:[%s166_s22] sm:$0xff]   ;;  %v494_v3 = vld [vmem:[%s166_s22 + $0x10] sm:$0xff]   ;;  %v495_v4 = vld [vmem:[%s166_s22 + $0x8] sm:$0xff]  }
  0x11   : > { %471 = vmatprep.mubr.msk.bf16.mxu0 %vm226_vm0, %v493_v2  ;;  %475 = vmatprep.mubr.msk.bf16.mxu1 %vm226_vm0, %v494_v3  ;;  %v496_v5 = vld [vmem:[%s166_s22 + $0x18] sm:$0xff]  }
  0x12   : > { %472 = vmatmul.mubr.msk.bf16.vlgmr.msra.gmra.mrb[0].mxu0 %vm226_vm0, %v495_v4  ;;  %476 = vmatmul.mubr.msk.bf16.vlgmr.msra.gmra.mrb[0].mxu1 %vm226_vm0, %v496_v5 }
  0xe5   : > { %v473_v6 = vpop.f32.mrb[0].mxu0  ;;  %v477_v8 = vpop.f32.mrb[0].mxu1 }
  0xe6   : > { %v273_v9 = vpop.f32.mrb[1].mxu0  ;;  %v289_v10 = vpop.f32.mrb[1].mxu1  ;;  %v282_v12 = vadd.f32 %v473_v6, %v409_v7  ;;  %v298_v16 = vadd.f32 %v477_v8, %v409_v7 }
  0xe7   : > { %v474_v11 = vpop.f32.mrb[2].mxu0  ;;  %v478_v14 = vpop.f32.mrb[2].mxu1  ;;  %v274_v17 = vadd.f32 %v409_v7, %v273_v9  ;;  %v290_v21 = vadd.f32 %v409_v7, %v289_v10 }
  0xe8   : > { %v285_v13 = vadd.f32 %v474_v11, %v409_v7  ;;  %v276_v15 = vpop.f32.mrb[3].mxu0  ;;  %v301_v18 = vadd.f32 %v478_v14, %v409_v7  ;;  %v292_v20 = vpop.f32.mrb[3].mxu1 }
  0xe9   : > { %v277_v19 = vadd.f32 %v409_v7, %v276_v15  ;;  %v293_v23 = vadd.f32 %v409_v7, %v292_v20 }
  0xea   : > { %v446_v22 = vpack.c.bf16 %v285_v13, %v282_v12  ;;  %v456_v24 = vpack.c.bf16 %v301_v18, %v298_v16 }
  0xeb   : > { %v441_v25 = vpack.c.bf16 %v277_v19, %v274_v17  ;;  %v451_v26 = vpack.c.bf16 %v293_v23, %v290_v21 }
  0xec   : > { %458 = vst [vmem:[%s172_s27 + $0x8] sm:$0xff] %v446_v22   ;;  %460 = vst [vmem:[%s172_s27 + $0x18] sm:$0xff] %v456_v24  }
  0xed   : > { %442 = vst [vmem:[%s172_s27] sm:$0xff] %v441_v25   ;;  %459 = vst [vmem:[%s172_s27 + $0x10] sm:$0xff] %v451_v26  }
  0xee PF: > { %s13_s12 = sadd.s32 1, %s503_s12  }
  0xef   : > { %p10_p4 = scmp.ge.s32.totalorder %s13_s12, 4  }
  0xf1   :  { %12 = sbr.rel (!%p10_p4) target bundleno = 1 (0x1), region = 62 }

// kernel: _forward_impl.17
= control target key start
LH: loop header
LB: loop body
LE: loop exit
PB: predicated region body
PF: predicated region fallthrough
CT: control target
= control target key end

     0   :  { %s550_s12 = smov 0   ;;  %s676_s0 = inlined_call_operand.vmem [shape: bf16[16,128], index: 0, kind: input, shape index: {}]   ;;  %s677_s1 = inlined_call_operand.vmem [shape: f32[16,8], index: 1, kind: input, shape index: {}]   ;;  %s678_s2 = inlined_call_operand.vmem [shape: f32[128,256], index: 2, kind: input, shape index: {}]   ;;  %s679_s3 = inlined_call_operand.vmem [shape: bf16[32,256], index: 3, kind: output, shape index: {}]  }
   0x1 LB: > { %s556_s13 = sadd.s32 4294967295, %s527_s12   ;;  %p442_p0 = scmp.ge.s32.totalorder %s527_s12, 1  ;;  %s527_s12 = sphi %s550_s12, %s13_s12  }
   0x2   : > { %p136_p1 = scmp.lt.s32.totalorder %s527_s12, 3 }
   0x4   : > { %p137_p2 = pnand %p442_p0, %p136_p1 }
   0x5   : > { %p160_p3 = scmp.lt.s32.totalorder (!%p137_p2), %s556_s13, 1  ;;  %v173_v0 = vld [vmem:[%s677_s1] sm:$0xff] (!%p137_p2)  ;;  %vm175_vm0 = vcmask (!%p137_p2), 64512   ;;  %v258_v1 = vld [vmem:[%s678_s2 + $0x8] sm:$0xff] (!%p137_p2)  ;;  %v260_v2 = vld [vmem:[%s678_s2 + $0x18] sm:$0xff] (!%p137_p2)  ;;  %v529_v52 = vmov (!%p137_p2), 0.0  }
   0x6   : > { %140 = sbr.rel (%p137_p2) target bundleno = 451 (0x1c3), region = 32  ;;  %461 = vmatprep.mubr.msk.f32.mxu0 (!%p137_p2), %vm175_vm0, %v173_v0  ;;  %v257_v3 = vld [vmem:[%s678_s2] sm:$0xff] (!%p137_p2)  ;;  %v259_v4 = vld [vmem:[%s678_s2 + $0x10] sm:$0xff] (!%p137_p2)  ;;  %v464_v5 = vpack.c.bf16 (!%p137_p2), %v260_v2, %v258_v1  ;;  %v262_v7 = vld [vmem:[%s678_s2 + $0x28] sm:$0xff] (!%p137_p2)  ;;  %359 = vmatprep.mubr.f32.mxu1 (!%p137_p2), %v529_v52 }
   0x7   : > { %v466_v6 = vpack.c.bf16 (!%p137_p2), %v259_v4, %v257_v3  ;;  %v264_v8 = vld [vmem:[%s678_s2 + $0x38] sm:$0xff] (!%p137_p2)  ;;  %v261_v9 = vld [vmem:[%s678_s2 + $0x20] sm:$0xff] (!%p137_p2)  ;;  %v263_v11 = vld [vmem:[%s678_s2 + $0x30] sm:$0xff] (!%p137_p2) }
   0x8   : > { %v468_v10 = vpack.c.bf16 (!%p137_p2), %v264_v8, %v262_v7  ;;  %v266_v12 = vld [vmem:[%s678_s2 + $0x48] sm:$0xff] (!%p137_p2)  ;;  %v268_v13 = vld [vmem:[%s678_s2 + $0x58] sm:$0xff] (!%p137_p2)  ;;  %496 = vmatprep.subr.bf16.mxu1 (!%p137_p2), %v464_v5  ;;  %v470_v14 = vpack.c.bf16 (!%p137_p2), %v263_v11, %v261_v9  ;;  %v265_v17 = vld [vmem:[%s678_s2 + $0x40] sm:$0xff] (!%p137_p2) }
   0x9   : > { %504 = vmatpush1.bf16.msra.mxu1 (!%p137_p2), %v466_v6  ;;  %v472_v16 = vpack.c.bf16 (!%p137_p2), %v268_v13, %v266_v12  ;;  %v267_v18 = vld [vmem:[%s678_s2 + $0x50] sm:$0xff] (!%p137_p2)  ;;  %v270_v20 = vld [vmem:[%s678_s2 + $0x68] sm:$0xff] (!%p137_p2)  ;;  %v272_v21 = vld [vmem:[%s678_s2 + $0x78] sm:$0xff] (!%p137_p2) }
   0xa   : > { %497 = vmatprep.subr.bf16.mxu1 (!%p137_p2), %v468_v10  ;;  %v174_v22 = vld [vmem:[%s677_s1 + $0x8] sm:$0xff] (!%p137_p2)  ;;  %v474_v23 = vpack.c.bf16 (!%p137_p2), %v267_v18, %v265_v17  ;;  %v476_v24 = vpack.c.bf16 (!%p137_p2), %v272_v21, %v270_v20  ;;  %v269_v25 = vld [vmem:[%s678_s2 + $0x60] sm:$0xff] (!%p137_p2)  ;;  %v271_v26 = vld [vmem:[%s678_s2 + $0x70] sm:$0xff] (!%p137_p2) }
   0xb   : > { %v274_v27 = vld [vmem:[%s678_s2 + $0x88] sm:$0xff] (!%p137_p2)  ;;  %v276_v28 = vld [vmem:[%s678_s2 + $0x98] sm:$0xff] (!%p137_p2)  ;;  %v478_v29 = vpack.c.bf16 (!%p137_p2), %v271_v26, %v269_v25  ;;  %v273_v31 = vld [vmem:[%s678_s2 + $0x80] sm:$0xff] (!%p137_p2) }
   0xc   : > { %v480_v30 = vpack.c.bf16 (!%p137_p2), %v276_v28, %v274_v27  ;;  %v275_v32 = vld [vmem:[%s678_s2 + $0x90] sm:$0xff] (!%p137_p2)  ;;  %v278_v33 = vld [vmem:[%s678_s2 + $0xa8] sm:$0xff] (!%p137_p2)  ;;  %v280_v34 = vld [vmem:[%s678_s2 + $0xb8] sm:$0xff] (!%p137_p2) }
   0xd   : > { %s161_s24 = scalar_select %p160_p3, %s556_s13, 1  ;;  %505 = vmatpush1.bf16.msra.mxu1 %v470_v14  ;;  %v482_v35 = vpack.c.bf16 %v275_v32, %v273_v31  ;;  %v484_v36 = vpack.c.bf16 %v280_v34, %v278_v33  ;;  %v277_v37 = vld [vmem:[%s678_s2 + $0xa0] sm:$0xff]  ;;  %v279_v38 = vld [vmem:[%s678_s2 + $0xb0] sm:$0xff]  ;;  %v282_v39 = vld [vmem:[%s678_s2 + $0xc8] sm:$0xff] }
   0xe   : > { %498 = vmatprep.subr.bf16.mxu1 %v472_v16  ;;  %v284_v40 = vld [vmem:[%s678_s2 + $0xd8] sm:$0xff]  ;;  %v486_v41 = vpack.c.bf16 %v279_v38, %v277_v37  ;;  %v281_v43 = vld [vmem:[%s678_s2 + $0xc0] sm:$0xff]  ;;  %v283_v44 = vld [vmem:[%s678_s2 + $0xd0] sm:$0xff] }
   0xf   : > { %s443_s10 = sshll.u32 %s161_s24, 2  ;;  %v488_v42 = vpack.c.bf16 %v284_v40, %v282_v39  ;;  %v286_v45 = vld [vmem:[%s678_s2 + $0xe8] sm:$0xff]  ;;  %v288_v46 = vld [vmem:[%s678_s2 + $0xf8] sm:$0xff]  ;;  %v490_v47 = vpack.c.bf16 %v283_v44, %v281_v43  ;;  %v285_v49 = vld [vmem:[%s678_s2 + $0xe0] sm:$0xff] }
  0x10   : > { %s163_s15 = scalar_lea.vmem %s676_s0, %s443_s10  ;;  %v492_v48 = vpack.c.bf16 %v288_v46, %v286_v45  ;;  %v287_v50 = vld [vmem:[%s678_s2 + $0xf0] sm:$0xff]  ;;  %s444_s10 = sshll.u32 %s556_s13, 1 }
  0x11   : > { %v171_v15 = vld [vmem:[%s163_s15] sm:$0xf]  ;;  %506 = vmatpush1.bf16.msra.mxu1 %v474_v23  ;;  %v494_v51 = vpack.c.bf16 %v287_v50, %v285_v49  ;;  %p165_p4 = scmp.lt.s32.totalorder %s444_s10, 3 }
  0x12   : > { %v172_v19 = vunpack.c.l.bf16 %v171_v15  ;;  %499 = vmatprep.subr.bf16.mxu1 %v476_v24 }
  0x13   : > { %s681_s10 = smov (!%p165_p4, %s444_s10), 3 }
  0x14   : > { %459 = vmatprep.subr.mxu0 %v172_v19  ;;  %s453_s11 = sshll.u32 %s681_s10, 3 }
  0x15   : > { %460 = vmatpush3.msra.mxu0 %v172_v19  ;;  %507 = vmatpush1.bf16.msra.mxu1 %v478_v29  ;;  %s169_s16 = scalar_lea.vmem %s679_s3, %s453_s11 }
  0x16   : > { %462 = vmatmul.mubr.msk.f32.vlgmr.msra.gmra.mrb[0].mxu0 %vm175_vm0, %v174_v22  ;;  %465 = vmatprep.subr.bf16.mxu0 %v464_v5 }
  0x17   : > { %467 = vmatpush1.bf16.msra.mxu0 %v466_v6  ;;  %500 = vmatprep.subr.bf16.mxu1 %v480_v30 }
  0x18   : > { %469 = vmatprep.subr.bf16.mxu0 %v468_v10  ;;  %353 = vmatprep.mubr.f32.mxu0 %v529_v52 }
  0x19   : > { %508 = vmatpush1.bf16.msra.mxu1 %v482_v35 }
  0x1a   : > { %501 = vmatprep.subr.bf16.mxu1 %v484_v36 }
  0x1b   : > { %471 = vmatpush1.bf16.msra.mxu0 %v470_v14 }
  0x1c   : > { %473 = vmatprep.subr.bf16.mxu0 %v472_v16 }
  0x1d   : > { %509 = vmatpush1.bf16.msra.mxu1 %v486_v41 }
  0x1e   : > { %502 = vmatprep.subr.bf16.mxu1 %v488_v42 }
  0x1f   : > { %475 = vmatpush1.bf16.msra.mxu0 %v474_v23 }
  0x20   : > { %477 = vmatprep.subr.bf16.mxu0 %v476_v24 }
  0x21   : > { %510 = vmatpush1.bf16.msra.mxu1 %v490_v47 }
  0x22   : > { %503 = vmatprep.subr.bf16.mxu1 %v492_v48 }
  0x23   : > { %479 = vmatpush1.bf16.msra.mxu0 %v478_v29 }
  0x24   : > { %481 = vmatprep.subr.bf16.mxu0 %v480_v30 }
  0x25   : > { %511 = vmatpush1.bf16.msra.mxu1 %v494_v51 }
  0x27   : > { %483 = vmatpush1.bf16.msra.mxu0 %v482_v35 }
  0x28   : > { %485 = vmatprep.subr.bf16.mxu0 %v484_v36 }
  0x2b   : > { %487 = vmatpush1.bf16.msra.mxu0 %v486_v41 }
  0x2c   : > { %489 = vmatprep.subr.bf16.mxu0 %v488_v42 }
  0x2f   : > { %491 = vmatpush1.bf16.msra.mxu0 %v490_v47 }
  0x30   : > { %493 = vmatprep.subr.bf16.mxu0 %v492_v48 }
  0x33   : > { %495 = vmatpush1.bf16.msra.mxu0 %v494_v51 }
  0xe9   : > { %v463_v53 = vpop.f32.mrb[0].mxu0 }
  0xea   : > { %v248_v54 = vpop.f32.mrb[1].mxu0  ;;  %360 = vmatmul.mubr.f32.vlgmr.msra.gmra.mrb[0].mxu1 %v463_v53 }
  0xeb   : > { %354 = vmatmul.mubr.f32.vlgmr.msra.gmra.mrb[2].mxu0 %v248_v54 }
 0x1bd   : > { %v361_v55 = vpop.f32.mrb[0].mxu1 }
 0x1be   : > { %v355_v56 = vpop.f32.mrb[2].mxu0  ;;  %v363_v57 = vpop.f32.mrb[1].mxu1 }
 0x1bf   : > { %v455_v58 = vpack.c.bf16 %v363_v57, %v361_v55  ;;  %v357_v59 = vpop.f32.mrb[3].mxu0 }
 0x1c0   : > { %v454_v60 = vpack.c.bf16 %v357_v59, %v355_v56 }
 0x1c1   : > { %379 = vst [vmem:[%s169_s16 + $0x8] sm:$0xff] %v455_v58 }
 0x1c2   : > { %378 = vst [vmem:[%s169_s16] sm:$0xff] %v454_v60 }
 0x1c3 PF: > { %s13_s12 = sadd.s32 1, %s527_s12  }
 0x1c4   : > { %p10_p5 = scmp.ge.s32.totalorder %s13_s12, 4  }
 0x1c6   :  { %12 = sbr.rel (!%p10_p5) target bundleno = 1 (0x1), region = 62 }

// kernel: _forward_impl.15
= control target key start
LH: loop header
LB: loop body
LE: loop exit
PB: predicated region body
PF: predicated region fallthrough
CT: control target
= control target key end

     0   :  { %s331_s12 = smov 0   ;;  %s382_s0 = inlined_call_operand.vmem [shape: f32[16,256], index: 0, kind: input, shape index: {}]   ;;  %s383_s1 = inlined_call_operand.vmem [shape: f32[8,256], index: 1, kind: input, shape index: {}]   ;;  %s384_s2 = inlined_call_operand.vmem [shape: f32[8,256], index: 2, kind: input, shape index: {}]   ;;  %s385_s3 = inlined_call_operand.vmem [shape: f32[16,256], index: 3, kind: output, shape index: {}]  }
   0x1 LB: > { %s270_s13 = sadd.s32 4294967295, %s309_s12   ;;  %p274_p0 = scmp.ge.s32.totalorder %s309_s12, 1  ;;  %s309_s12 = sphi %s331_s12, %s13_s12  }
   0x2   : > { %p137_p1 = scmp.lt.s32.totalorder %s309_s12, 3 }
   0x4   : > { %p138_p2 = pnand %p274_p0, %p137_p1 }
   0x5   : > { %p161_p3 = scmp.lt.s32.totalorder (!%p138_p2), %s270_s13, 1  ;;  %v173_v0 = vlaneseq (!%p138_p2)  ;;  %v197_v18 = vld [vmem:[%s384_s2] sm:$0xff] (!%p138_p2)  ;;  %v198_v20 = vld [vmem:[%s384_s2 + $0x8] sm:$0xff] (!%p138_p2) }
   0x6   : > { %141 = sbr.rel (%p138_p2) target bundleno = 53 (0x35), region = 32  ;;  %v203_v21 = vld [vmem:[%s383_s1] sm:$0xff] (!%p138_p2)  ;;  %v204_v23 = vld [vmem:[%s383_s1 + $0x8] sm:$0xff] (!%p138_p2) }
   0x7   : > { %v174_v1 = vshrl.u32 (!%p138_p2), %v173_v0, 7 }
   0x9   : > { %vm176_vm0 = vcmp.ge.s32.totalorder (!%p138_p2), %v174_v1, 2  ;;  %vm177_vm1 = vcmp.lt.s32.totalorder (!%p138_p2), %v174_v1, 4  ;;  %vm175_vm3 = vcmp.lt.s32.totalorder (!%p138_p2), %v174_v1, 2 }
   0xa   : > { %vm348_vm2 = vmand (!%p138_p2), %vm176_vm0, %vm177_vm1  ;;  %v205_v25 = vsel (!%p138_p2), %vm175_vm3, %v203_v21, 0.0  ;;  %v206_v27 = vsel (!%p138_p2), %vm175_vm3, %v204_v23, 0.0 }
   0xd   : > { %s389_s13 = smov (!%p161_p3, %s270_s13), 1 }
   0xe   : > { %s281_s14 = sshll.u32 %s389_s13, 4 }
   0xf   : > { %s165_s17 = scalar_lea.vmem %s382_s0, %s281_s14  ;;  %s170_s28 = scalar_lea.vmem %s385_s3, %s281_s14 }
  0x10   : > { %v171_v2 = vld [vmem:[%s165_s17] sm:$0xff]  ;;  %v172_v3 = vld [vmem:[%s165_s17 + $0x8] sm:$0xff] }
  0x11   : > { %v179_v4 = vsub.f32 0.0, %v171_v2  ;;  %v180_v5 = vsub.f32 0.0, %v172_v3  ;;  %v191_v9 = vsel %vm348_vm2, %v171_v2, 0.0  ;;  %v192_v10 = vsel %vm348_vm2, %v172_v3, 0.0 }
  0x12   : > { %v193_v11 = vmul.f32 1.442695, %v191_v9  ;;  %v195_v12 = vmul.f32 1.442695, %v192_v10 }
  0x13   : > { %v181_v7 = vmul.f32 1.442695, %v179_v4  ;;  %v183_v8 = vmul.f32 1.442695, %v180_v5 }
  0x15   : > { %291 = vpow2.f32 %v181_v7 }
  0x16   : > { %293 = vpow2.f32 %v183_v8 }
  0x17   : > { %295 = vpow2.f32 %v193_v11 }
  0x18   : > { %297 = vpow2.f32 %v195_v12 }
  0x1f   : > { %v292_v13 = vpop.eup %291 }
  0x20   : > { %v294_v14 = vpop.eup %293  ;;  %v185_v15 = vadd.f32 1.0, %v292_v13 }
  0x21   : > { %v186_v16 = vadd.f32 1.0, %v294_v14  ;;  %v296_v17 = vpop.eup %295 }
  0x22   : > { %299 = vrcp.f32 %v185_v15  ;;  %v298_v19 = vpop.eup %297  ;;  %v199_v22 = vmul.f32 %v296_v17, %v197_v18 }
  0x23   : > { %301 = vrcp.f32 %v186_v16  ;;  %v200_v24 = vmul.f32 %v298_v19, %v198_v20 }
  0x2c   : > { %v300_v26 = vpop.eup %299 }
  0x2d   : > { %v302_v28 = vpop.eup %301  ;;  %v201_v29 = vsel %vm348_vm2, %v199_v22, %v300_v26 }
  0x2e   : > { %v207_v30 = vadd.f32 %v205_v25, %v201_v29  ;;  %v202_v31 = vsel %vm348_vm2, %v200_v24, %v302_v28 }
  0x2f   : > { %v208_v32 = vadd.f32 %v206_v27, %v202_v31 }
  0x30   : > { %v209_v33 = vmul.f32 4.0, %v207_v30 }
  0x31   : > { %v210_v34 = vmul.f32 4.0, %v208_v32 }
  0x32   : > { %v211_v35 = vsel %vm177_vm1, %v209_v33, %v207_v30 }
  0x33   : > { %213 = vst [vmem:[%s170_s28] sm:$0xff] %v211_v35  ;;  %v212_v36 = vsel %vm177_vm1, %v210_v34, %v208_v32 }
  0x34   : > { %214 = vst [vmem:[%s170_s28 + $0x8] sm:$0xff] %v212_v36 }
  0x35 PF: > { %s13_s12 = sadd.s32 1, %s309_s12  }
  0x36   : > { %p10_p4 = scmp.ge.s32.totalorder %s13_s12, 4  }
  0x38   :  { %12 = sbr.rel (!%p10_p4) target bundleno = 1 (0x1), region = 62 }

// kernel: _forward_impl.18
= control target key start
LH: loop header
LB: loop body
LE: loop exit
PB: predicated region body
PF: predicated region fallthrough
CT: control target
= control target key end

     0   :  { %s1053_s12 = smov 0   ;;  %s1172_s0 = inlined_call_operand.vmem [shape: bf16[512,32], index: 0, kind: input, shape index: {}]   ;;  %s1173_s1 = inlined_call_operand.vmem [shape: bf16[32,128], index: 1, kind: input, shape index: {}]   ;;  %s1174_s2 = inlined_call_operand.vmem [shape: f32[1,128], index: 2, kind: input, shape index: {}]   ;;  %s1175_s3 = inlined_call_operand.vmem [shape: bf16[512,128], index: 3, kind: output, shape index: {}]  }
   0x1 LB: > { %s736_s13 = sadd.s32 4294967295, %s1031_s12   ;;  %p740_p0 = scmp.ge.s32.totalorder %s1031_s12, 1  ;;  %s1031_s12 = sphi %s1053_s12, %s13_s12  }
   0x2   : > { %p138_p1 = scmp.lt.s32.totalorder %s1031_s12, 3 }
   0x4   : > { %p139_p2 = pnand %p740_p0, %p138_p1 }
   0x5   : > { %v1007_v0 = vld [vmem:[%s1173_s1] sm:$0xff] (!%p139_p2)   ;;  %s741_s16 = sshll.u32 (!%p139_p2), %s736_s13, 5  ;;  %v1008_v1 = vld [vmem:[%s1173_s1 + $0x8] sm:$0xff] (!%p139_p2)   ;;  %vm310_vm0 = vcmask (!%p139_p2), 261120  }
   0x6   : > { %142 = sbr.rel (%p139_p2) target bundleno = 263 (0x107), region = 32  ;;  %p163_p3 = scmp.lt.s32.totalorder (!%p139_p2), %s741_s16, 63  ;;  %959 = vmatprep.subr.bf16.mxu0 (!%p139_p2), %v1007_v0  ;;  %995 = vmatprep.subr.bf16.mxu1 (!%p139_p2), %v1007_v0  ;;  %v1112_v19 = vld [vmem:[%s1174_s2] ss:$0 sm:$0xff] (!%p139_p2) }
   0x7   : > { %960 = vmatpush3.bf16.msra.mxu0 (!%p139_p2), %v1007_v0  ;;  %997 = vmatpush3.bf16.msra.mxu1 (!%p139_p2), %v1007_v0 }
   0x8   : > { %961 = vmatprep.subr.bf16.mxu0 (!%p139_p2), %v1008_v1  ;;  %996 = vmatprep.subr.bf16.mxu1 (!%p139_p2), %v1008_v1 }
   0xb   : > { %962 = vmatpush3.bf16.msra.mxu0 (!%p139_p2), %v1008_v1  ;;  %998 = vmatpush3.bf16.msra.mxu1 (!%p139_p2), %v1008_v1 }
   0xd   : > { %s1177_s16 = smov (!%p163_p3, %s741_s16), 63 }
   0xe   : > { %s742_s19 = sshll.u32 %s1177_s16, 2 }
   0xf   : > { %s1075_s22 = scalar_lea.vmem %s1172_s0, %s742_s19  ;;  %s1123_s27 = scalar_lea.vmem %s1175_s3, %s742_s19 }
  0x10   : > { %v1009_v2 = vld [vmem:[%s1075_s22] sm:$0xff]   ;;  %v1011_v4 = vld [vmem:[%s1075_s22 + $0x8] sm:$0xff]   ;;  %v1013_v6 = vld [vmem:[%s1075_s22 + $0x10] sm:$0xff]  }
  0x11   : > { %v1010_v3 = vld [vmem:[%s1075_s22 + $0x40] sm:$0xff]   ;;  %963 = vmatprep.mubr.msk.bf16.mxu0 %vm310_vm0, %v1009_v2  ;;  %v1012_v5 = vld [vmem:[%s1075_s22 + $0x48] sm:$0xff]   ;;  %v1014_v7 = vld [vmem:[%s1075_s22 + $0x50] sm:$0xff]  }
  0x12   : > { %979 = vmatprep.mubr.msk.bf16.mxu1 %vm310_vm0, %v1010_v3  ;;  %964 = vmatmul.mubr.msk.bf16.vlgmr.msra.gmra.mrb[0].mxu0 %vm310_vm0, %v1011_v4  ;;  %v1015_v8 = vld [vmem:[%s1075_s22 + $0x18] sm:$0xff]   ;;  %v1017_v10 = vld [vmem:[%s1075_s22 + $0x20] sm:$0xff]   ;;  %v1019_v12 = vld [vmem:[%s1075_s22 + $0x28] sm:$0xff]  }
  0x13   : > { %980 = vmatmul.mubr.msk.bf16.vlgmr.msra.gmra.mrb[0].mxu1 %vm310_vm0, %v1012_v5  ;;  %967 = vmatprep.mubr.msk.bf16.mxu0 %vm310_vm0, %v1013_v6  ;;  %v1016_v9 = vld [vmem:[%s1075_s22 + $0x58] sm:$0xff]   ;;  %v1018_v11 = vld [vmem:[%s1075_s22 + $0x60] sm:$0xff]   ;;  %v1020_v13 = vld [vmem:[%s1075_s22 + $0x68] sm:$0xff]  }
  0x14   : > { %983 = vmatprep.mubr.msk.bf16.mxu1 %vm310_vm0, %v1014_v7  ;;  %v1021_v14 = vld [vmem:[%s1075_s22 + $0x30] sm:$0xff]   ;;  %v1023_v16 = vld [vmem:[%s1075_s22 + $0x38] sm:$0xff]  }
  0x15   : > { %v1022_v15 = vld [vmem:[%s1075_s22 + $0x70] sm:$0xff]   ;;  %v1024_v17 = vld [vmem:[%s1075_s22 + $0x78] sm:$0xff]  }
  0x1a   : > { %968 = vmatmul.mubr.msk.bf16.gmra.mrb[4].mxu0 %vm310_vm0, %v1015_v8 }
  0x1b   : > { %984 = vmatmul.mubr.msk.bf16.gmra.mrb[4].mxu1 %vm310_vm0, %v1016_v9  ;;  %971 = vmatprep.mubr.msk.bf16.mxu0 %vm310_vm0, %v1017_v10 }
  0x1c   : > { %987 = vmatprep.mubr.msk.bf16.mxu1 %vm310_vm0, %v1018_v11 }
  0x22   : > { %972 = vmatmul.mubr.msk.bf16.gmra.mrb[8].mxu0 %vm310_vm0, %v1019_v12 }
  0x23   : > { %988 = vmatmul.mubr.msk.bf16.gmra.mrb[8].mxu1 %vm310_vm0, %v1020_v13  ;;  %975 = vmatprep.mubr.msk.bf16.mxu0 %vm310_vm0, %v1021_v14 }
  0x24   : > { %991 = vmatprep.mubr.msk.bf16.mxu1 %vm310_vm0, %v1022_v15 }
  0x2a   : > { %976 = vmatmul.mubr.msk.bf16.gmra.mrb[12].mxu0 %vm310_vm0, %v1023_v16 }
  0x2b   : > { %992 = vmatmul.mubr.msk.bf16.gmra.mrb[12].mxu1 %vm310_vm0, %v1024_v17 }
  0xe5   : > { %v965_v18 = vpop.f32.mrb[0].mxu0 }
  0xe6   : > { %v981_v20 = vpop.f32.mrb[0].mxu1  ;;  %v393_v21 = vpop.f32.mrb[1].mxu0  ;;  %v402_v24 = vadd.f32 %v965_v18, %v1112_v19 }
  0xe7   : > { %v457_v22 = vpop.f32.mrb[1].mxu1  ;;  %v966_v23 = vpop.f32.mrb[2].mxu0  ;;  %v466_v28 = vadd.f32 %v981_v20, %v1112_v19  ;;  %v394_v29 = vadd.f32 %v1112_v19, %v393_v21 }
  0xe8   : > { %v405_v25 = vadd.f32 %v966_v23, %v1112_v19  ;;  %v982_v26 = vpop.f32.mrb[2].mxu1  ;;  %v396_v27 = vpop.f32.mrb[3].mxu0  ;;  %v458_v33 = vadd.f32 %v1112_v19, %v457_v22 }
  0xe9   : > { %v469_v30 = vadd.f32 %v982_v26, %v1112_v19  ;;  %v397_v31 = vadd.f32 %v1112_v19, %v396_v27  ;;  %v460_v32 = vpop.f32.mrb[3].mxu1 }
  0xea   : > { %v854_v34 = vpack.c.bf16 %v405_v25, %v402_v24  ;;  %v461_v35 = vadd.f32 %v1112_v19, %v460_v32 }
  0xeb   : > { %v894_v36 = vpack.c.bf16 %v469_v30, %v466_v28  ;;  %v849_v37 = vpack.c.bf16 %v397_v31, %v394_v29 }
  0xec   : > { %926 = vst [vmem:[%s1123_s27 + $0x8] sm:$0xff] %v854_v34   ;;  %v889_v38 = vpack.c.bf16 %v461_v35, %v458_v33 }
  0xed   : > { %934 = vst [vmem:[%s1123_s27 + $0x48] sm:$0xff] %v894_v36   ;;  %850 = vst [vmem:[%s1123_s27] sm:$0xff] %v849_v37   ;;  %v969_v39 = vpop.f32.mrb[4].mxu0 }
  0xee   : > { %933 = vst [vmem:[%s1123_s27 + $0x40] sm:$0xff] %v889_v38   ;;  %v985_v40 = vpop.f32.mrb[4].mxu1  ;;  %v409_v41 = vpop.f32.mrb[5].mxu0  ;;  %v418_v44 = vadd.f32 %v969_v39, %v1112_v19 }
  0xef   : > { %v473_v42 = vpop.f32.mrb[5].mxu1  ;;  %v970_v43 = vpop.f32.mrb[6].mxu0  ;;  %v482_v48 = vadd.f32 %v985_v40, %v1112_v19  ;;  %v410_v49 = vadd.f32 %v1112_v19, %v409_v41 }
  0xf0   : > { %v421_v45 = vadd.f32 %v970_v43, %v1112_v19  ;;  %v986_v46 = vpop.f32.mrb[6].mxu1  ;;  %v412_v47 = vpop.f32.mrb[7].mxu0  ;;  %v474_v53 = vadd.f32 %v1112_v19, %v473_v42 }
  0xf1   : > { %v485_v50 = vadd.f32 %v986_v46, %v1112_v19  ;;  %v413_v51 = vadd.f32 %v1112_v19, %v412_v47  ;;  %v476_v52 = vpop.f32.mrb[7].mxu1 }
  0xf2   : > { %v864_v54 = vpack.c.bf16 %v421_v45, %v418_v44  ;;  %v477_v55 = vadd.f32 %v1112_v19, %v476_v52 }
  0xf3   : > { %v904_v56 = vpack.c.bf16 %v485_v50, %v482_v48  ;;  %v859_v57 = vpack.c.bf16 %v413_v51, %v410_v49 }
  0xf4   : > { %928 = vst [vmem:[%s1123_s27 + $0x18] sm:$0xff] %v864_v54   ;;  %v899_v58 = vpack.c.bf16 %v477_v55, %v474_v53 }
  0xf5   : > { %936 = vst [vmem:[%s1123_s27 + $0x58] sm:$0xff] %v904_v56   ;;  %927 = vst [vmem:[%s1123_s27 + $0x10] sm:$0xff] %v859_v57   ;;  %v973_v59 = vpop.f32.mrb[8].mxu0 }
  0xf6   : > { %935 = vst [vmem:[%s1123_s27 + $0x50] sm:$0xff] %v899_v58   ;;  %v989_v60 = vpop.f32.mrb[8].mxu1  ;;  %v425_v61 = vpop.f32.mrb[9].mxu0  ;;  %v434_v0 = vadd.f32 %v973_v59, %v1112_v19 }
  0xf7   : > { %v489_v62 = vpop.f32.mrb[9].mxu1  ;;  %v974_v63 = vpop.f32.mrb[10].mxu0  ;;  %v498_v4 = vadd.f32 %v989_v60, %v1112_v19  ;;  %v426_v5 = vadd.f32 %v1112_v19, %v425_v61 }
  0xf8   : > { %v437_v1 = vadd.f32 %v974_v63, %v1112_v19  ;;  %v990_v2 = vpop.f32.mrb[10].mxu1  ;;  %v428_v3 = vpop.f32.mrb[11].mxu0  ;;  %v490_v9 = vadd.f32 %v1112_v19, %v489_v62 }
  0xf9   : > { %v501_v6 = vadd.f32 %v990_v2, %v1112_v19  ;;  %v429_v7 = vadd.f32 %v1112_v19, %v428_v3  ;;  %v492_v8 = vpop.f32.mrb[11].mxu1 }
  0xfa   : > { %v874_v10 = vpack.c.bf16 %v437_v1, %v434_v0  ;;  %v493_v11 = vadd.f32 %v1112_v19, %v492_v8 }
  0xfb   : > { %v914_v12 = vpack.c.bf16 %v501_v6, %v498_v4  ;;  %v869_v13 = vpack.c.bf16 %v429_v7, %v426_v5 }
  0xfc   : > { %930 = vst [vmem:[%s1123_s27 + $0x28] sm:$0xff] %v874_v10   ;;  %v909_v14 = vpack.c.bf16 %v493_v11, %v490_v9 }
  0xfd   : > { %938 = vst [vmem:[%s1123_s27 + $0x68] sm:$0xff] %v914_v12   ;;  %929 = vst [vmem:[%s1123_s27 + $0x20] sm:$0xff] %v869_v13   ;;  %v977_v15 = vpop.f32.mrb[12].mxu0 }
  0xfe   : > { %937 = vst [vmem:[%s1123_s27 + $0x60] sm:$0xff] %v909_v14   ;;  %v993_v16 = vpop.f32.mrb[12].mxu1  ;;  %v441_v17 = vpop.f32.mrb[13].mxu0  ;;  %v450_v21 = vadd.f32 %v977_v15, %v1112_v19 }
  0xff   : > { %v505_v18 = vpop.f32.mrb[13].mxu1  ;;  %v978_v20 = vpop.f32.mrb[14].mxu0  ;;  %v514_v25 = vadd.f32 %v993_v16, %v1112_v19  ;;  %v442_v26 = vadd.f32 %v1112_v19, %v441_v17 }
 0x100   : > { %v453_v22 = vadd.f32 %v978_v20, %v1112_v19  ;;  %v994_v23 = vpop.f32.mrb[14].mxu1  ;;  %v444_v24 = vpop.f32.mrb[15].mxu0  ;;  %v506_v30 = vadd.f32 %v1112_v19, %v505_v18 }
 0x101   : > { %v517_v27 = vadd.f32 %v994_v23, %v1112_v19  ;;  %v445_v28 = vadd.f32 %v1112_v19, %v444_v24  ;;  %v508_v29 = vpop.f32.mrb[15].mxu1 }
 0x102   : > { %v884_v31 = vpack.c.bf16 %v453_v22, %v450_v21  ;;  %v509_v32 = vadd.f32 %v1112_v19, %v508_v29 }
 0x103   : > { %v924_v33 = vpack.c.bf16 %v517_v27, %v514_v25  ;;  %v879_v34 = vpack.c.bf16 %v445_v28, %v442_v26 }
 0x104   : > { %932 = vst [vmem:[%s1123_s27 + $0x38] sm:$0xff] %v884_v31   ;;  %v919_v35 = vpack.c.bf16 %v509_v32, %v506_v30 }
 0x105   : > { %940 = vst [vmem:[%s1123_s27 + $0x78] sm:$0xff] %v924_v33   ;;  %931 = vst [vmem:[%s1123_s27 + $0x30] sm:$0xff] %v879_v34  }
 0x106   : > { %939 = vst [vmem:[%s1123_s27 + $0x70] sm:$0xff] %v919_v35  }
 0x107 PF: > { %s13_s12 = sadd.s32 1, %s1031_s12  }
 0x108   : > { %p10_p4 = scmp.ge.s32.totalorder %s13_s12, 4  }
 0x10a   :  { %12 = sbr.rel (!%p10_p4) target bundleno = 1 (0x1), region = 62 }

// kernel: _forward_impl.19
= control target key start
LH: loop header
LB: loop body
LE: loop exit
PB: predicated region body
PF: predicated region fallthrough
CT: control target
= control target key end

     0   :  { %s428_s12 = smov 0   ;;  %s547_s0 = inlined_call_operand.vmem [shape: f32[16,768], index: 0, kind: input, shape index: {}]   ;;  %s548_s1 = inlined_call_operand.vmem [shape: f32[8,768], index: 1, kind: input, shape index: {}]   ;;  %s549_s2 = inlined_call_operand.vmem [shape: f32[8,768], index: 2, kind: input, shape index: {}]   ;;  %s550_s3 = inlined_call_operand.vmem [shape: f32[16,768], index: 3, kind: output, shape index: {}]  }
   0x1 LB: > { %s346_s13 = sadd.s32 4294967295, %s406_s12   ;;  %p350_p0 = scmp.ge.s32.totalorder %s406_s12, 1  ;;  %s406_s12 = sphi %s428_s12, %s13_s12  }
   0x2   : > { %p137_p1 = scmp.lt.s32.totalorder %s406_s12, 3 }
   0x4   : > { %p138_p2 = pnand %p350_p0, %p137_p1 }
   0x5   : > { %p161_p3 = scmp.lt.s32.totalorder (!%p138_p2), %s346_s13, 1  ;;  %v177_v0 = vlaneseq (!%p138_p2)  ;;  %v237_v46 = vld [vmem:[%s549_s2] sm:$0xff] (!%p138_p2)  ;;  %v238_v48 = vld [vmem:[%s549_s2 + $0x8] sm:$0xff] (!%p138_p2)  ;;  %v239_v51 = vld [vmem:[%s549_s2 + $0x10] sm:$0xff] (!%p138_p2) }
   0x6   : > { %141 = sbr.rel (%p138_p2) target bundleno = 58 (0x3a), region = 32  ;;  %v255_v50 = vld [vmem:[%s548_s1] sm:$0xff] (!%p138_p2)  ;;  %v256_v54 = vld [vmem:[%s548_s1 + $0x8] sm:$0xff] (!%p138_p2)  ;;  %v240_v55 = vld [vmem:[%s549_s2 + $0x18] sm:$0xff] (!%p138_p2) }
   0x7   : > { %v438_v1 = vshrl.u32 (!%p138_p2), %v177_v0, 7  ;;  %v257_v58 = vld [vmem:[%s548_s1 + $0x10] sm:$0xff] (!%p138_p2)  ;;  %v241_v59 = vld [vmem:[%s549_s2 + $0x20] sm:$0xff] (!%p138_p2)  ;;  %v258_v63 = vld [vmem:[%s548_s1 + $0x18] sm:$0xff] (!%p138_p2) }
   0x8   : > { %v242_v0 = vld [vmem:[%s549_s2 + $0x28] sm:$0xff] (!%p138_p2) }
   0x9   : > { %vm180_vm0 = vcmp.ge.s32.totalorder (!%p138_p2), %v438_v1, 2  ;;  %vm181_vm1 = vcmp.lt.s32.totalorder (!%p138_p2), %v438_v1, 4  ;;  %vm179_vm3 = vcmp.lt.s32.totalorder (!%p138_p2), %v438_v1, 2 }
   0xa   : > { %vm450_vm2 = vmand (!%p138_p2), %vm180_vm0, %vm181_vm1  ;;  %v261_v61 = vsel (!%p138_p2), %vm179_vm3, %v255_v50, 0.0 }
   0xd   : > { %s554_s13 = smov (!%p161_p3, %s346_s13), 1 }
   0xe   : > { %s355_s14 = smul.u32 48, %s554_s13 }
  0x10   : > { %s165_s17 = scalar_lea.vmem %s547_s0, %s355_s14  ;;  %s170_s20 = scalar_lea.vmem %s550_s3, %s355_s14 }
  0x11   : > { %v171_v2 = vld [vmem:[%s165_s17] sm:$0xff]  ;;  %v172_v3 = vld [vmem:[%s165_s17 + $0x8] sm:$0xff]  ;;  %v173_v4 = vld [vmem:[%s165_s17 + $0x10] sm:$0xff] }
  0x12   : > { %v174_v5 = vld [vmem:[%s165_s17 + $0x18] sm:$0xff]  ;;  %v175_v6 = vld [vmem:[%s165_s17 + $0x20] sm:$0xff]  ;;  %v176_v7 = vld [vmem:[%s165_s17 + $0x28] sm:$0xff]  ;;  %v183_v8 = vsub.f32 0.0, %v171_v2  ;;  %v184_v9 = vsub.f32 0.0, %v172_v3  ;;  %v185_v10 = vsub.f32 0.0, %v173_v4 }
  0x13   : > { %v186_v12 = vsub.f32 0.0, %v174_v5  ;;  %v187_v13 = vsub.f32 0.0, %v175_v6  ;;  %v188_v14 = vsub.f32 0.0, %v176_v7  ;;  %v219_v20 = vsel %vm450_vm2, %v171_v2, 0.0 }
  0x14   : > { %v189_v15 = vmul.f32 1.442695, %v183_v8  ;;  %v191_v16 = vmul.f32 1.442695, %v184_v9  ;;  %v193_v17 = vmul.f32 1.442695, %v185_v10 }
  0x15   : > { %v195_v18 = vmul.f32 1.442695, %v186_v12  ;;  %v197_v19 = vmul.f32 1.442695, %v187_v13  ;;  %v199_v21 = vmul.f32 1.442695, %v188_v14 }
  0x16   : > { %364 = vpow2.f32 %v189_v15  ;;  %v220_v22 = vsel %vm450_vm2, %v172_v3, 0.0  ;;  %v221_v23 = vsel %vm450_vm2, %v173_v4, 0.0  ;;  %v225_v24 = vmul.f32 1.442695, %v219_v20  ;;  %v260_v10 = vld [vmem:[%s548_s1 + $0x28] sm:$0xff] }
  0x17   : > { %366 = vpow2.f32 %v191_v16  ;;  %v222_v25 = vsel %vm450_vm2, %v174_v5, 0.0  ;;  %v227_v26 = vmul.f32 1.442695, %v220_v22  ;;  %v223_v27 = vsel %vm450_vm2, %v175_v6, 0.0  ;;  %v259_v5 = vld [vmem:[%s548_s1 + $0x20] sm:$0xff] }
  0x18   : > { %368 = vpow2.f32 %v193_v17  ;;  %v229_v28 = vmul.f32 1.442695, %v221_v23  ;;  %v224_v29 = vsel %vm450_vm2, %v176_v7, 0.0  ;;  %v231_v30 = vmul.f32 1.442695, %v222_v25 }
  0x19   : > { %370 = vpow2.f32 %v195_v18  ;;  %v233_v31 = vmul.f32 1.442695, %v223_v27  ;;  %v235_v32 = vmul.f32 1.442695, %v224_v29  ;;  %v262_v3 = vsel %vm179_vm3, %v256_v54, 0.0 }
  0x1a   : > { %372 = vpow2.f32 %v197_v19  ;;  %v263_v8 = vsel %vm179_vm3, %v257_v58, 0.0  ;;  %v264_v15 = vsel %vm179_vm3, %v258_v63, 0.0  ;;  %v265_v20 = vsel %vm179_vm3, %v259_v5, 0.0 }
  0x1b   : > { %374 = vpow2.f32 %v199_v21  ;;  %v266_v25 = vsel %vm179_vm3, %v260_v10, 0.0 }
  0x1c   : > { %376 = vpow2.f32 %v225_v24 }
  0x1d   : > { %378 = vpow2.f32 %v227_v26 }
  0x1e   : > { %380 = vpow2.f32 %v229_v28 }
  0x1f   : > { %382 = vpow2.f32 %v231_v30 }
  0x20   : > { %v365_v33 = vpop.eup %364  ;;  %384 = vpow2.f32 %v233_v31 }
  0x21   : > { %v367_v34 = vpop.eup %366  ;;  %v201_v35 = vadd.f32 1.0, %v365_v33  ;;  %386 = vpow2.f32 %v235_v32 }
  0x22   : > { %v369_v36 = vpop.eup %368  ;;  %v202_v37 = vadd.f32 1.0, %v367_v34 }
  0x23   : > { %v371_v38 = vpop.eup %370  ;;  %v203_v39 = vadd.f32 1.0, %v369_v36  ;;  %388 = vrcp.f32 %v201_v35 }
  0x24   : > { %v373_v40 = vpop.eup %372  ;;  %v204_v41 = vadd.f32 1.0, %v371_v38  ;;  %390 = vrcp.f32 %v202_v37 }
  0x25   : > { %v375_v42 = vpop.eup %374  ;;  %v205_v43 = vadd.f32 1.0, %v373_v40  ;;  %392 = vrcp.f32 %v203_v39 }
  0x26   : > { %v206_v44 = vadd.f32 1.0, %v375_v42  ;;  %394 = vrcp.f32 %v204_v41  ;;  %v377_v45 = vpop.eup %376 }
  0x27   : > { %396 = vrcp.f32 %v205_v43  ;;  %v379_v47 = vpop.eup %378  ;;  %v243_v53 = vmul.f32 %v377_v45, %v237_v46 }
  0x28   : > { %398 = vrcp.f32 %v206_v44  ;;  %v381_v49 = vpop.eup %380  ;;  %v244_v57 = vmul.f32 %v379_v47, %v238_v48 }
  0x29   : > { %v383_v52 = vpop.eup %382  ;;  %v245_v62 = vmul.f32 %v381_v49, %v239_v51 }
  0x2a   : > { %v385_v56 = vpop.eup %384  ;;  %v246_v4 = vmul.f32 %v383_v52, %v240_v55 }
  0x2b   : > { %v387_v60 = vpop.eup %386  ;;  %v247_v9 = vmul.f32 %v385_v56, %v241_v59 }
  0x2c   : > { %v248_v16 = vmul.f32 %v387_v60, %v242_v0 }
  0x2d   : > { %v389_v2 = vpop.eup %388 }
  0x2e   : > { %v391_v6 = vpop.eup %390  ;;  %v249_v7 = vsel %vm450_vm2, %v243_v53, %v389_v2 }
  0x2f   : > { %v393_v12 = vpop.eup %392  ;;  %v267_v13 = vadd.f32 %v261_v61, %v249_v7  ;;  %v250_v14 = vsel %vm450_vm2, %v244_v57, %v391_v6 }
  0x30   : > { %v395_v17 = vpop.eup %394  ;;  %v268_v18 = vadd.f32 %v262_v3, %v250_v14  ;;  %v251_v19 = vsel %vm450_vm2, %v245_v62, %v393_v12 }
  0x31   : > { %v397_v21 = vpop.eup %396  ;;  %v273_v22 = vmul.f32 2.0, %v267_v13  ;;  %v269_v23 = vadd.f32 %v263_v8, %v251_v19  ;;  %v252_v24 = vsel %vm450_vm2, %v246_v4, %v395_v17 }
  0x32   : > { %v399_v26 = vpop.eup %398  ;;  %v274_v27 = vmul.f32 2.0, %v268_v18  ;;  %v270_v28 = vadd.f32 %v264_v15, %v252_v24  ;;  %v253_v29 = vsel %vm450_vm2, %v247_v9, %v397_v21 }
  0x33   : > { %v279_v30 = vsel %vm181_vm1, %v273_v22, %v267_v13  ;;  %v275_v31 = vmul.f32 2.0, %v269_v23  ;;  %v271_v32 = vadd.f32 %v265_v20, %v253_v29  ;;  %v254_v33 = vsel %vm450_vm2, %v248_v16, %v399_v26 }
  0x34   : > { %285 = vst [vmem:[%s170_s20] sm:$0xff] %v279_v30  ;;  %v280_v34 = vsel %vm181_vm1, %v274_v27, %v268_v18  ;;  %v276_v35 = vmul.f32 2.0, %v270_v28  ;;  %v272_v36 = vadd.f32 %v266_v25, %v254_v33 }
  0x35   : > { %286 = vst [vmem:[%s170_s20 + $0x8] sm:$0xff] %v280_v34  ;;  %v281_v37 = vsel %vm181_vm1, %v275_v31, %v269_v23  ;;  %v277_v38 = vmul.f32 2.0, %v271_v32 }
  0x36   : > { %287 = vst [vmem:[%s170_s20 + $0x10] sm:$0xff] %v281_v37  ;;  %v282_v39 = vsel %vm181_vm1, %v276_v35, %v270_v28  ;;  %v278_v40 = vmul.f32 2.0, %v272_v36 }
  0x37   : > { %288 = vst [vmem:[%s170_s20 + $0x18] sm:$0xff] %v282_v39  ;;  %v283_v11 = vsel %vm181_vm1, %v277_v38, %v271_v32 }
  0x38   : > { %289 = vst [vmem:[%s170_s20 + $0x20] sm:$0xff] %v283_v11  ;;  %v284_v41 = vsel %vm181_vm1, %v278_v40, %v272_v36 }
  0x39   : > { %290 = vst [vmem:[%s170_s20 + $0x28] sm:$0xff] %v284_v41 }
  0x3a PF: > { %s13_s12 = sadd.s32 1, %s406_s12  }
  0x3b   : > { %p10_p4 = scmp.ge.s32.totalorder %s13_s12, 4  }
  0x3d   :  { %12 = sbr.rel (!%p10_p4) target bundleno = 1 (0x1), region = 62 }

</bundles_post_ra>
